<compile_context>
chip_gen: v7x
topology: tpu7x:2x2x1
jax: 0.10.0
libtpu: 0.0.40
codegen_flags: <defaults>
</compile_context>

<pallas_src>
import math

import jax
import jax.numpy as jnp
from jax.experimental import pallas as pl
from jax.experimental.pallas import tpu as pltpu

# --- configuration (small shapes consistent with the module defaults) -------
B = 2                     # batch
INPUT_DIM = 4             # D == d_model of the transformer encoder layers
INPUT_SIZE = 48           # S (time length)
ATTENTION_LAYERS = 1      # number of nn.TransformerEncoderLayer blocks (default)
NUM_HEADS = 1             # attention_heads (default)
HEAD_DIM = INPUT_DIM // NUM_HEADS
DIM_FEEDFORWARD = 2048    # nn.TransformerEncoderLayer default
LN_EPS = 1e-5             # nn.LayerNorm default
BACKCAST_SIZE = INPUT_SIZE
FORECAST_SIZE = 16
THETA_SIZE = BACKCAST_SIZE + FORECAST_SIZE   # generic-basis split
Q_SCALE = 1.0 / math.sqrt(HEAD_DIM)


# --- Pallas kernel ----------------------------------------------------------
def _layer_norm_t(h, gamma, beta):
    # LayerNorm over the embedding axis, which is the SUBLANE axis (axis 0) in the
    # transposed (D, S) layout.  PyTorch semantics (biased variance, eps inside rsqrt).
    mu = jnp.mean(h, axis=0, keepdims=True)
    c = h - mu
    var = jnp.mean(c * c, axis=0, keepdims=True)
    return c * jax.lax.rsqrt(var + LN_EPS) * gamma + beta


def transformer_nbeats_kernel(x_ref, pe_ref,
                              wqkv_ref, bqkv_ref, wout_ref, bout_ref,
                              ln1g_ref, ln1b_ref,
                              wff1_ref, bff1_ref, wff2_ref, bff2_ref,
                              ln2g_ref, ln2b_ref,
                              wlin_ref, blin_ref,
                              theta_ref):
    # One grid step == one batch element.  Activations live in transposed (D, S)
    # layout: d_model on sublanes, tokens on lanes.
    #   x_ref   : (1, D, S)  native module layout, no wrapper transpose
    #   pe_ref  : (D, S)     positional-encoding table, transposed
    #   wqkv_ref: (L, 3D, D) in_proj weight (Q rows pre-scaled); bqkv_ref: (L, 3D, 1)
    #   wout_ref: (L, D, D)  out_proj weight;                    bout_ref: (L, D, 1)
    #   ln*_ref : (L, D, 1)  LayerNorm gamma / beta
    #   wff1_ref: (L, F, D) bf16; bff1_ref: (L, F, 1) f32
    #   wff2_ref: (L, D, F) bf16; bff2_ref: (L, D, 1) f32
    #   wlin_ref: (S, THETA)  basis_parameters weight^T;         blin_ref: (1, THETA)
    h = x_ref[0].astype(jnp.float32) + pe_ref[...]                   # (D, S)

    for l in range(ATTENTION_LAYERS):
        # ---- multi-head self-attention (post-LN encoder layer) -------------
        qkv = jnp.dot(wqkv_ref[l], h,
                      preferred_element_type=jnp.float32) + bqkv_ref[l]   # (3D, S)
        q = qkv[0:INPUT_DIM]                       # already scaled by 1/sqrt(head_dim)
        k = qkv[INPUT_DIM:2 * INPUT_DIM]
        v = qkv[2 * INPUT_DIM:3 * INPUT_DIM]

        heads = []
        for hh in range(NUM_HEADS):
            lo, hi = hh * HEAD_DIM, (hh + 1) * HEAD_DIM
            logits = jnp.einsum('dq,dk->qk', q[lo:hi], k[lo:hi],
                                preferred_element_type=jnp.float32)       # (S, S)
            logits = logits - jnp.max(logits, axis=-1, keepdims=True)
            p = jnp.exp(logits)
            p = p * pl.reciprocal(jnp.sum(p, axis=-1, keepdims=True), approx=True)
            heads.append(jnp.einsum('dk,qk->dq', v[lo:hi], p,
                                    preferred_element_type=jnp.float32))  # (HEAD_DIM, S)
        attn = heads[0] if NUM_HEADS == 1 else jnp.concatenate(heads, axis=0)
        attn = jnp.dot(wout_ref[l], attn,
                       preferred_element_type=jnp.float32) + bout_ref[l]  # (D, S)
        h = _layer_norm_t(h + attn, ln1g_ref[l], ln1b_ref[l])

        # ---- feed-forward (bf16 weights/inputs, f32 accumulation) ----------
        ff = jnp.dot(wff1_ref[l], h.astype(jnp.bfloat16),
                     preferred_element_type=jnp.float32) + bff1_ref[l]    # (F, S)
        ff = jnp.maximum(ff, 0.0)                                         # ReLU
        ff = jnp.dot(wff2_ref[l], ff.astype(jnp.bfloat16),
                     preferred_element_type=jnp.float32) + bff2_ref[l]    # (D, S)
        h = _layer_norm_t(h + ff, ln2g_ref[l], ln2b_ref[l])

    # ---- basis parameters: Linear over the time axis, one dense store ------
    theta_ref[0] = (jnp.dot(h, wlin_ref[...],
                            preferred_element_type=jnp.float32) + blin_ref[...])


# --- wrapper ----------------------------------------------------------------
def make_positional_encoding(seq_len, d_model):
    position = jnp.arange(seq_len, dtype=jnp.float32)[:, None]
    div_term = jnp.exp(jnp.arange(0, d_model, 2, dtype=jnp.float32)
                       * (-math.log(10000.0) / d_model))
    pe = jnp.zeros((seq_len, d_model), jnp.float32)
    pe = pe.at[:, 0::2].set(jnp.sin(position * div_term))
    pe = pe.at[:, 1::2].set(jnp.cos(position * div_term))
    return pe


def prepare_kernel_params(pe, params):
    """Convert native-orientation parameters into the kernel's (W @ h) layout."""
    (wqkv, bqkv, wout, bout, ln1g, ln1b,
     wff1, bff1, wff2, bff2, ln2g, ln2b, wlin, blin) = params
    # fold the 1/sqrt(head_dim) query scale into the Q rows of the in_proj weight/bias
    qscale = jnp.concatenate([jnp.full((INPUT_DIM,), Q_SCALE, jnp.float32),
                              jnp.ones((2 * INPUT_DIM,), jnp.float32)])
    wqkv_k = wqkv * qscale[None, :, None]                # (L, 3D, D)
    bqkv_k = (bqkv * qscale[None, :])[..., None]         # (L, 3D, 1)
    return (
        jnp.transpose(pe, (1, 0)),                       # pe^T  (D, S)
        wqkv_k, bqkv_k,
        wout,                 bout[..., None],           # (L, D, D), (L, D, 1)
        ln1g[..., None],      ln1b[..., None],           # (L, D, 1)
        wff1.astype(jnp.bfloat16), bff1[..., None],      # (L, F, D) bf16, (L, F, 1)
        wff2.astype(jnp.bfloat16), bff2[..., None],      # (L, D, F) bf16, (L, D, 1)
        ln2g[..., None],      ln2b[..., None],           # (L, D, 1)
        jnp.transpose(wlin, (1, 0)),                     # W^T   (S, THETA)
        blin[None, :],                                   # (1, THETA)
    )


def transformer_nbeats_block(x, kparams):
    inputs = (x,) + tuple(kparams)

    def resident(a):
        zeros = (0,) * a.ndim
        return pl.BlockSpec(a.shape, lambda b, _z=zeros: _z)

    in_specs = ([pl.BlockSpec((1, INPUT_DIM, INPUT_SIZE), lambda b: (b, 0, 0))]
                + [resident(a) for a in inputs[1:]])

    theta = pl.pallas_call(
        transformer_nbeats_kernel,
        out_shape=jax.ShapeDtypeStruct((B, INPUT_DIM, THETA_SIZE), jnp.float32),
        grid=(B,),
        in_specs=in_specs,
        out_specs=pl.BlockSpec((1, INPUT_DIM, THETA_SIZE), lambda b: (b, 0, 0)),
        compiler_params=pltpu.CompilerParams(dimension_semantics=("parallel",)),
    )(*inputs)
    # GenericBasis split done in the wrapper: a free HBM slice of the theta output.
    return theta[..., :BACKCAST_SIZE], theta[..., BACKCAST_SIZE:]


# --- plain-JAX reference (fixed HIGHEST precision) for verification ----------
def reference_forward(x, pe, params):
    (wqkv, bqkv, wout, bout, ln1g, ln1b,
     wff1, bff1, wff2, bff2, ln2g, ln2b, wlin, blin) = params
    hp = jax.lax.Precision.HIGHEST

    def ln(h, g, b):
        mu = jnp.mean(h, axis=-1, keepdims=True)
        c = h - mu
        var = jnp.mean(c * c, axis=-1, keepdims=True)
        return c * jax.lax.rsqrt(var + LN_EPS) * g + b

    h = jnp.transpose(x, (0, 2, 1)).astype(jnp.float32) + pe[None]    # (B, S, D)
    scale = 1.0 / math.sqrt(HEAD_DIM)
    for l in range(ATTENTION_LAYERS):
        tok = h.reshape(B * INPUT_SIZE, INPUT_DIM)
        qkv = jnp.dot(tok, wqkv[l].T, precision=hp) + bqkv[l]
        q = qkv[:, :INPUT_DIM].reshape(B, INPUT_SIZE, INPUT_DIM)
        k = qkv[:, INPUT_DIM:2 * INPUT_DIM].reshape(B, INPUT_SIZE, INPUT_DIM)
        v = qkv[:, 2 * INPUT_DIM:].reshape(B, INPUT_SIZE, INPUT_DIM)
        outs = []
        for hh in range(NUM_HEADS):
            lo, hi = hh * HEAD_DIM, (hh + 1) * HEAD_DIM
            logits = jnp.einsum('bqd,bkd->bqk', q[..., lo:hi] * scale, k[..., lo:hi],
                                precision=hp)
            p = jax.nn.softmax(logits, axis=-1)
            outs.append(jnp.einsum('bqk,bkd->bqd', p, v[..., lo:hi], precision=hp))
        attn = outs[0] if NUM_HEADS == 1 else jnp.concatenate(outs, axis=-1)
        attn = jnp.dot(attn.reshape(B * INPUT_SIZE, INPUT_DIM), wout[l].T,
                       precision=hp) + bout[l]
        h = ln(h + attn.reshape(B, INPUT_SIZE, INPUT_DIM), ln1g[l], ln1b[l])
        ff = jnp.maximum(jnp.dot(h.reshape(B * INPUT_SIZE, INPUT_DIM), wff1[l].T,
                                 precision=hp) + bff1[l], 0.0)
        ff = jnp.dot(ff, wff2[l].T, precision=hp) + bff2[l]
        h = ln(h + ff.reshape(B, INPUT_SIZE, INPUT_DIM), ln2g[l], ln2b[l])
    h_bds = jnp.transpose(h, (0, 2, 1))                               # (B, D, S)
    theta = jnp.einsum('bds,ts->bdt', h_bds, wlin, precision=hp) + blin
    return theta[..., :BACKCAST_SIZE], theta[..., BACKCAST_SIZE:]


if __name__ == "__main__":
    key = jax.random.PRNGKey(0)
    (kx, kqkv, kbq, kwo, kbo, kg1, kb1,
     kw1, kf1, kw2, kf2, kg2, kb2, kwl, kbl) = jax.random.split(key, 15)

    D, F, L, S = INPUT_DIM, DIM_FEEDFORWARD, ATTENTION_LAYERS, INPUT_SIZE
    bd = 1.0 / math.sqrt(D)
    bf = 1.0 / math.sqrt(F)
    bs = 1.0 / math.sqrt(S)
    u = jax.random.uniform

    # Synthetic parameters in native PyTorch orientation ("x @ W^T + b").
    params = (
        u(kqkv, (L, 3 * D, D), jnp.float32, -bd, bd),               # in_proj weight
        u(kbq,  (L, 3 * D), jnp.float32, -bd, bd),                  # in_proj bias
        u(kwo,  (L, D, D), jnp.float32, -bd, bd),                   # out_proj weight
        u(kbo,  (L, D), jnp.float32, -bd, bd),                      # out_proj bias
        1.0 + 0.1 * u(kg1, (L, D), jnp.float32, -1.0, 1.0),         # norm1 gamma
        0.1 * u(kb1, (L, D), jnp.float32, -1.0, 1.0),               # norm1 beta
        u(kw1, (L, F, D), jnp.float32, -bd, bd),                    # linear1 weight
        u(kf1, (L, F), jnp.float32, -bd, bd),                       # linear1 bias
        u(kw2, (L, D, F), jnp.float32, -bf, bf),                    # linear2 weight
        u(kf2, (L, D), jnp.float32, -bf, bf),                       # linear2 bias
        1.0 + 0.1 * u(kg2, (L, D), jnp.float32, -1.0, 1.0),         # norm2 gamma
        0.1 * u(kb2, (L, D), jnp.float32, -1.0, 1.0),               # norm2 beta
        u(kwl, (THETA_SIZE, S), jnp.float32, -bs, bs),              # basis_parameters weight
        u(kbl, (THETA_SIZE,), jnp.float32, -bs, bs),                # basis_parameters bias
    )

    x = jax.random.normal(kx, (B, INPUT_DIM, INPUT_SIZE), jnp.float32)   # module layout (B, D, S)
    pe = make_positional_encoding(INPUT_SIZE, INPUT_DIM)

    kparams = prepare_kernel_params(pe, params)
    backcast, forecast = transformer_nbeats_block(x, kparams)
    jax.block_until_ready((backcast, forecast))

    ref_b, ref_f = reference_forward(x, pe, params)
    assert backcast.shape == (B, INPUT_DIM, BACKCAST_SIZE)
    assert forecast.shape == (B, INPUT_DIM, FORECAST_SIZE)
    # Kernel runs DEFAULT-precision (single bf16 MXU pass) matmuls with bf16 FFN
    # weights; reference is fixed f32 HIGHEST precision, so the tolerance covers
    # bf16 input rounding (~0.2% relative).
    assert jnp.allclose(backcast, ref_b, atol=2e-2, rtol=2e-2), \
        float(jnp.max(jnp.abs(backcast - ref_b)))
    assert jnp.allclose(forecast, ref_f, atol=2e-2, rtol=2e-2), \
        float(jnp.max(jnp.abs(forecast - ref_f)))

    print("KERNEL_OK")
</pallas_src>

<mosaic_0001>
module attributes {stable_mosaic.version = 11 : i64} {
  func.func @transformer_nbeats_kernel(%arg0: i32, %arg1: memref<1x4x48xf32, #tpu.memory_space<vmem>>, %arg2: memref<4x48xf32, #tpu.memory_space<vmem>>, %arg3: memref<1x12x4xf32, #tpu.memory_space<vmem>>, %arg4: memref<1x12x1xf32, #tpu.memory_space<vmem>>, %arg5: memref<1x4x4xf32, #tpu.memory_space<vmem>>, %arg6: memref<1x4x1xf32, #tpu.memory_space<vmem>>, %arg7: memref<1x4x1xf32, #tpu.memory_space<vmem>>, %arg8: memref<1x4x1xf32, #tpu.memory_space<vmem>>, %arg9: memref<1x2048x4xbf16, #tpu.memory_space<vmem>>, %arg10: memref<1x2048x1xf32, #tpu.memory_space<vmem>>, %arg11: memref<1x4x2048xbf16, #tpu.memory_space<vmem>>, %arg12: memref<1x4x1xf32, #tpu.memory_space<vmem>>, %arg13: memref<1x4x1xf32, #tpu.memory_space<vmem>>, %arg14: memref<1x4x1xf32, #tpu.memory_space<vmem>>, %arg15: memref<48x64xf32, #tpu.memory_space<vmem>>, %arg16: memref<1x64xf32, #tpu.memory_space<vmem>>, %arg17: memref<1x4x64xf32, #tpu.memory_space<vmem>>) attributes {dimension_semantics = [#tpu.dimension_semantics<parallel>], iteration_bounds = array<i64: 2>, scalar_prefetch = 0 : i64, scratch_operands = 0 : i64, tpu.core_type = #tpu.core_type<tc>, window_params = [{transform_indices = @transform_0, window_bounds = array<i64: 1, 4, 48>}, {pipeline_mode = #tpu.pipeline_mode<synchronous>, transform_indices = @transform_1, window_bounds = array<i64: 4, 48>}, {pipeline_mode = #tpu.pipeline_mode<synchronous>, transform_indices = @transform_2, window_bounds = array<i64: 1, 12, 4>}, {pipeline_mode = #tpu.pipeline_mode<synchronous>, transform_indices = @transform_3, window_bounds = array<i64: 1, 12, 1>}, {pipeline_mode = #tpu.pipeline_mode<synchronous>, transform_indices = @transform_4, window_bounds = array<i64: 1, 4, 4>}, {pipeline_mode = #tpu.pipeline_mode<synchronous>, transform_indices = @transform_5, window_bounds = array<i64: 1, 4, 1>}, {pipeline_mode = #tpu.pipeline_mode<synchronous>, transform_indices = @transform_6, window_bounds = array<i64: 1, 4, 1>}, {pipeline_mode = #tpu.pipeline_mode<synchronous>, transform_indices = @transform_7, window_bounds = array<i64: 1, 4, 1>}, {pipeline_mode = #tpu.pipeline_mode<synchronous>, transform_indices = @transform_8, window_bounds = array<i64: 1, 2048, 4>}, {pipeline_mode = #tpu.pipeline_mode<synchronous>, transform_indices = @transform_9, window_bounds = array<i64: 1, 2048, 1>}, {pipeline_mode = #tpu.pipeline_mode<synchronous>, transform_indices = @transform_10, window_bounds = array<i64: 1, 4, 2048>}, {pipeline_mode = #tpu.pipeline_mode<synchronous>, transform_indices = @transform_11, window_bounds = array<i64: 1, 4, 1>}, {pipeline_mode = #tpu.pipeline_mode<synchronous>, transform_indices = @transform_12, window_bounds = array<i64: 1, 4, 1>}, {pipeline_mode = #tpu.pipeline_mode<synchronous>, transform_indices = @transform_13, window_bounds = array<i64: 1, 4, 1>}, {pipeline_mode = #tpu.pipeline_mode<synchronous>, transform_indices = @transform_14, window_bounds = array<i64: 48, 64>}, {pipeline_mode = #tpu.pipeline_mode<synchronous>, transform_indices = @transform_15, window_bounds = array<i64: 1, 64>}, {transform_indices = @transform_16, window_bounds = array<i64: 1, 4, 64>}]} {
    %c0 = arith.constant 0 : index
    %c0_0 = arith.constant 0 : index
    %c0_1 = arith.constant 0 : index
    %0 = vector.load %arg1[%c0, %c0_0, %c0_1] : memref<1x4x48xf32, #tpu.memory_space<vmem>>, vector<1x4x48xf32>
    %1 = vector.shape_cast %0 : vector<1x4x48xf32> to vector<4x48xf32>
    %c0_2 = arith.constant 0 : index
    %c0_3 = arith.constant 0 : index
    %2 = vector.load %arg2[%c0_2, %c0_3] : memref<4x48xf32, #tpu.memory_space<vmem>>, vector<4x48xf32>
    %3 = arith.addf %1, %2 : vector<4x48xf32>
    %c0_4 = arith.constant 0 : index
    %c0_5 = arith.constant 0 : index
    %c0_6 = arith.constant 0 : index
    %4 = vector.load %arg3[%c0_4, %c0_5, %c0_6] : memref<1x12x4xf32, #tpu.memory_space<vmem>>, vector<1x12x4xf32>
    %5 = vector.shape_cast %4 : vector<1x12x4xf32> to vector<12x4xf32>
    %cst = arith.constant dense<0.000000e+00> : vector<12x48xf32>
    %6 = tpu.matmul %5, %3, %cst {dimension_numbers = #tpu.dot_dimension_numbers<[1], [0], [0], [1], [0, 0, 1, 1], [], []>} : vector<12x4xf32>, vector<4x48xf32>, vector<12x48xf32> -> vector<12x48xf32>
    %c0_7 = arith.constant 0 : index
    %c0_8 = arith.constant 0 : index
    %c0_9 = arith.constant 0 : index
    %7 = vector.load %arg4[%c0_7, %c0_8, %c0_9] : memref<1x12x1xf32, #tpu.memory_space<vmem>>, vector<1x12x1xf32>
    %8 = vector.shape_cast %7 : vector<1x12x1xf32> to vector<12x1xf32>
    %9 = vector.broadcast %8 : vector<12x1xf32> to vector<12x48xf32>
    %10 = arith.addf %6, %9 : vector<12x48xf32>
    %11 = vector.extract_strided_slice %10 {offsets = [0, 0], sizes = [4, 48], strides = [1, 1]} : vector<12x48xf32> to vector<4x48xf32>
    %12 = vector.extract_strided_slice %10 {offsets = [4, 0], sizes = [4, 48], strides = [1, 1]} : vector<12x48xf32> to vector<4x48xf32>
    %13 = vector.extract_strided_slice %10 {offsets = [8, 0], sizes = [4, 48], strides = [1, 1]} : vector<12x48xf32> to vector<4x48xf32>
    "tpu.trace_start"() <{level = 10 : i32, message = "dq,dk->qk"}> : () -> ()
    %cst_10 = arith.constant dense<0.000000e+00> : vector<48x48xf32>
    %14 = tpu.matmul %11, %12, %cst_10 {dimension_numbers = #tpu.dot_dimension_numbers<[0], [0], [1], [1], [0, 1, 1, 1], [], []>} : vector<4x48xf32>, vector<4x48xf32>, vector<48x48xf32> -> vector<48x48xf32>
    "tpu.trace_stop"() : () -> ()
    %cst_11 = arith.constant dense<0xFF800000> : vector<48xf32>
    %15 = vector.multi_reduction <maximumf>, %14, %cst_11 [1] : vector<48x48xf32> to vector<48xf32>
    %16 = vector.shape_cast %15 : vector<48xf32> to vector<48x1xf32>
    %17 = vector.broadcast %16 : vector<48x1xf32> to vector<48x48xf32>
    %18 = arith.subf %14, %17 : vector<48x48xf32>
    %19 = math.exp %18 : vector<48x48xf32>
    %cst_12 = arith.constant dense<0.000000e+00> : vector<48xf32>
    %20 = vector.multi_reduction <add>, %19, %cst_12 [1] : vector<48x48xf32> to vector<48xf32>
    %21 = vector.shape_cast %20 : vector<48xf32> to vector<48x1xf32>
    %22 = tpu.reciprocal %21 {approx = true} : vector<48x1xf32> -> vector<48x1xf32>
    %23 = vector.broadcast %22 : vector<48x1xf32> to vector<48x48xf32>
    %24 = arith.mulf %19, %23 : vector<48x48xf32>
    "tpu.trace_start"() <{level = 10 : i32, message = "dk,qk->dq"}> : () -> ()
    %cst_13 = arith.constant dense<0.000000e+00> : vector<4x48xf32>
    %25 = tpu.matmul %13, %24, %cst_13 {dimension_numbers = #tpu.dot_dimension_numbers<[1], [1], [0], [0], [0, 0, 1, 0], [], []>} : vector<4x48xf32>, vector<48x48xf32>, vector<4x48xf32> -> vector<4x48xf32>
    "tpu.trace_stop"() : () -> ()
    %c0_14 = arith.constant 0 : index
    %c0_15 = arith.constant 0 : index
    %c0_16 = arith.constant 0 : index
    %26 = vector.load %arg5[%c0_14, %c0_15, %c0_16] : memref<1x4x4xf32, #tpu.memory_space<vmem>>, vector<1x4x4xf32>
    %27 = vector.shape_cast %26 : vector<1x4x4xf32> to vector<4x4xf32>
    %cst_17 = arith.constant dense<0.000000e+00> : vector<4x48xf32>
    %28 = tpu.matmul %27, %25, %cst_17 {dimension_numbers = #tpu.dot_dimension_numbers<[1], [0], [0], [1], [0, 0, 1, 1], [], []>} : vector<4x4xf32>, vector<4x48xf32>, vector<4x48xf32> -> vector<4x48xf32>
    %c0_18 = arith.constant 0 : index
    %c0_19 = arith.constant 0 : index
    %c0_20 = arith.constant 0 : index
    %29 = vector.load %arg6[%c0_18, %c0_19, %c0_20] : memref<1x4x1xf32, #tpu.memory_space<vmem>>, vector<1x4x1xf32>
    %30 = vector.shape_cast %29 : vector<1x4x1xf32> to vector<4x1xf32>
    %31 = vector.broadcast %30 : vector<4x1xf32> to vector<4x48xf32>
    %32 = arith.addf %28, %31 : vector<4x48xf32>
    %33 = arith.addf %3, %32 : vector<4x48xf32>
    %c0_21 = arith.constant 0 : index
    %c0_22 = arith.constant 0 : index
    %c0_23 = arith.constant 0 : index
    %34 = vector.load %arg7[%c0_21, %c0_22, %c0_23] : memref<1x4x1xf32, #tpu.memory_space<vmem>>, vector<1x4x1xf32>
    %35 = vector.shape_cast %34 : vector<1x4x1xf32> to vector<4x1xf32>
    %c0_24 = arith.constant 0 : index
    %c0_25 = arith.constant 0 : index
    %c0_26 = arith.constant 0 : index
    %36 = vector.load %arg8[%c0_24, %c0_25, %c0_26] : memref<1x4x1xf32, #tpu.memory_space<vmem>>, vector<1x4x1xf32>
    %37 = vector.shape_cast %36 : vector<1x4x1xf32> to vector<4x1xf32>
    %cst_27 = arith.constant dense<0.000000e+00> : vector<48xf32>
    %38 = vector.multi_reduction <add>, %33, %cst_27 [0] : vector<4x48xf32> to vector<48xf32>
    %39 = vector.shape_cast %38 : vector<48xf32> to vector<1x48xf32>
    %cst_28 = arith.constant 4.000000e+00 : f32
    %40 = vector.broadcast %cst_28 : f32 to vector<1x48xf32>
    %41 = arith.divf %39, %40 : vector<1x48xf32>
    %42 = vector.broadcast %41 : vector<1x48xf32> to vector<4x48xf32>
    %43 = arith.subf %33, %42 : vector<4x48xf32>
    %44 = arith.mulf %43, %43 : vector<4x48xf32>
    %cst_29 = arith.constant dense<0.000000e+00> : vector<48xf32>
    %45 = vector.multi_reduction <add>, %44, %cst_29 [0] : vector<4x48xf32> to vector<48xf32>
    %46 = vector.shape_cast %45 : vector<48xf32> to vector<1x48xf32>
    %cst_30 = arith.constant 4.000000e+00 : f32
    %47 = vector.broadcast %cst_30 : f32 to vector<1x48xf32>
    %48 = arith.divf %46, %47 : vector<1x48xf32>
    %cst_31 = arith.constant 9.99999974E-6 : f32
    %49 = vector.broadcast %cst_31 : f32 to vector<1x48xf32>
    %50 = arith.addf %48, %49 : vector<1x48xf32>
    %51 = math.rsqrt %50 : vector<1x48xf32>
    %52 = vector.broadcast %51 : vector<1x48xf32> to vector<4x48xf32>
    %53 = arith.mulf %43, %52 : vector<4x48xf32>
    %54 = vector.broadcast %35 : vector<4x1xf32> to vector<4x48xf32>
    %55 = arith.mulf %53, %54 : vector<4x48xf32>
    %56 = vector.broadcast %37 : vector<4x1xf32> to vector<4x48xf32>
    %57 = arith.addf %55, %56 : vector<4x48xf32>
    %c0_32 = arith.constant 0 : index
    %c0_33 = arith.constant 0 : index
    %c0_34 = arith.constant 0 : index
    %58 = vector.load %arg9[%c0_32, %c0_33, %c0_34] : memref<1x2048x4xbf16, #tpu.memory_space<vmem>>, vector<1x2048x4xbf16>
    %59 = vector.shape_cast %58 : vector<1x2048x4xbf16> to vector<2048x4xbf16>
    %60 = arith.truncf %57 : vector<4x48xf32> to vector<4x48xbf16>
    %cst_35 = arith.constant dense<0.000000e+00> : vector<2048x48xf32>
    %61 = tpu.matmul %59, %60, %cst_35 {dimension_numbers = #tpu.dot_dimension_numbers<[1], [0], [0], [1], [0, 0, 1, 1], [], []>} : vector<2048x4xbf16>, vector<4x48xbf16>, vector<2048x48xf32> -> vector<2048x48xf32>
    %c0_36 = arith.constant 0 : index
    %c0_37 = arith.constant 0 : index
    %c0_38 = arith.constant 0 : index
    %62 = vector.load %arg10[%c0_36, %c0_37, %c0_38] : memref<1x2048x1xf32, #tpu.memory_space<vmem>>, vector<1x2048x1xf32>
    %63 = vector.shape_cast %62 : vector<1x2048x1xf32> to vector<2048x1xf32>
    %64 = vector.broadcast %63 : vector<2048x1xf32> to vector<2048x48xf32>
    %65 = arith.addf %61, %64 : vector<2048x48xf32>
    %cst_39 = arith.constant 0.000000e+00 : f32
    %66 = vector.broadcast %cst_39 : f32 to vector<2048x48xf32>
    %67 = arith.maximumf %65, %66 : vector<2048x48xf32>
    %c0_40 = arith.constant 0 : index
    %c0_41 = arith.constant 0 : index
    %c0_42 = arith.constant 0 : index
    %68 = vector.load %arg11[%c0_40, %c0_41, %c0_42] : memref<1x4x2048xbf16, #tpu.memory_space<vmem>>, vector<1x4x2048xbf16>
    %69 = vector.shape_cast %68 : vector<1x4x2048xbf16> to vector<4x2048xbf16>
    %70 = arith.truncf %67 : vector<2048x48xf32> to vector<2048x48xbf16>
    %cst_43 = arith.constant dense<0.000000e+00> : vector<4x48xf32>
    %71 = tpu.matmul %69, %70, %cst_43 {dimension_numbers = #tpu.dot_dimension_numbers<[1], [0], [0], [1], [0, 0, 1, 1], [], []>} : vector<4x2048xbf16>, vector<2048x48xbf16>, vector<4x48xf32> -> vector<4x48xf32>
    %c0_44 = arith.constant 0 : index
    %c0_45 = arith.constant 0 : index
    %c0_46 = arith.constant 0 : index
    %72 = vector.load %arg12[%c0_44, %c0_45, %c0_46] : memref<1x4x1xf32, #tpu.memory_space<vmem>>, vector<1x4x1xf32>
    %73 = vector.shape_cast %72 : vector<1x4x1xf32> to vector<4x1xf32>
    %74 = vector.broadcast %73 : vector<4x1xf32> to vector<4x48xf32>
    %75 = arith.addf %71, %74 : vector<4x48xf32>
    %76 = arith.addf %57, %75 : vector<4x48xf32>
    %c0_47 = arith.constant 0 : index
    %c0_48 = arith.constant 0 : index
    %c0_49 = arith.constant 0 : index
    %77 = vector.load %arg13[%c0_47, %c0_48, %c0_49] : memref<1x4x1xf32, #tpu.memory_space<vmem>>, vector<1x4x1xf32>
    %78 = vector.shape_cast %77 : vector<1x4x1xf32> to vector<4x1xf32>
    %c0_50 = arith.constant 0 : index
    %c0_51 = arith.constant 0 : index
    %c0_52 = arith.constant 0 : index
    %79 = vector.load %arg14[%c0_50, %c0_51, %c0_52] : memref<1x4x1xf32, #tpu.memory_space<vmem>>, vector<1x4x1xf32>
    %80 = vector.shape_cast %79 : vector<1x4x1xf32> to vector<4x1xf32>
    %cst_53 = arith.constant dense<0.000000e+00> : vector<48xf32>
    %81 = vector.multi_reduction <add>, %76, %cst_53 [0] : vector<4x48xf32> to vector<48xf32>
    %82 = vector.shape_cast %81 : vector<48xf32> to vector<1x48xf32>
    %cst_54 = arith.constant 4.000000e+00 : f32
    %83 = vector.broadcast %cst_54 : f32 to vector<1x48xf32>
    %84 = arith.divf %82, %83 : vector<1x48xf32>
    %85 = vector.broadcast %84 : vector<1x48xf32> to vector<4x48xf32>
    %86 = arith.subf %76, %85 : vector<4x48xf32>
    %87 = arith.mulf %86, %86 : vector<4x48xf32>
    %cst_55 = arith.constant dense<0.000000e+00> : vector<48xf32>
    %88 = vector.multi_reduction <add>, %87, %cst_55 [0] : vector<4x48xf32> to vector<48xf32>
    %89 = vector.shape_cast %88 : vector<48xf32> to vector<1x48xf32>
    %cst_56 = arith.constant 4.000000e+00 : f32
    %90 = vector.broadcast %cst_56 : f32 to vector<1x48xf32>
    %91 = arith.divf %89, %90 : vector<1x48xf32>
    %cst_57 = arith.constant 9.99999974E-6 : f32
    %92 = vector.broadcast %cst_57 : f32 to vector<1x48xf32>
    %93 = arith.addf %91, %92 : vector<1x48xf32>
    %94 = math.rsqrt %93 : vector<1x48xf32>
    %95 = vector.broadcast %94 : vector<1x48xf32> to vector<4x48xf32>
    %96 = arith.mulf %86, %95 : vector<4x48xf32>
    %97 = vector.broadcast %78 : vector<4x1xf32> to vector<4x48xf32>
    %98 = arith.mulf %96, %97 : vector<4x48xf32>
    %99 = vector.broadcast %80 : vector<4x1xf32> to vector<4x48xf32>
    %100 = arith.addf %98, %99 : vector<4x48xf32>
    %c0_58 = arith.constant 0 : index
    %c0_59 = arith.constant 0 : index
    %101 = vector.load %arg15[%c0_58, %c0_59] : memref<48x64xf32, #tpu.memory_space<vmem>>, vector<48x64xf32>
    %cst_60 = arith.constant dense<0.000000e+00> : vector<4x64xf32>
    %102 = tpu.matmul %100, %101, %cst_60 {dimension_numbers = #tpu.dot_dimension_numbers<[1], [0], [0], [1], [0, 0, 1, 1], [], []>} : vector<4x48xf32>, vector<48x64xf32>, vector<4x64xf32> -> vector<4x64xf32>
    %c0_61 = arith.constant 0 : index
    %c0_62 = arith.constant 0 : index
    %103 = vector.load %arg16[%c0_61, %c0_62] : memref<1x64xf32, #tpu.memory_space<vmem>>, vector<1x64xf32>
    %104 = vector.broadcast %103 : vector<1x64xf32> to vector<4x64xf32>
    %105 = arith.addf %102, %104 : vector<4x64xf32>
    %c0_63 = arith.constant 0 : index
    %c0_64 = arith.constant 0 : index
    %c0_65 = arith.constant 0 : index
    %106 = vector.load %arg17[%c0_63, %c0_64, %c0_65] : memref<1x4x64xf32, #tpu.memory_space<vmem>>, vector<1x4x64xf32>
    %107 = vector.shape_cast %106 : vector<1x4x64xf32> to vector<4x64xf32>
    %108 = vector.shape_cast %105 : vector<4x64xf32> to vector<1x4x64xf32>
    tpu.vector_store %arg17[%c0_63, %c0_64, %c0_65], %108 {strides = array<i32>} : memref<1x4x64xf32, #tpu.memory_space<vmem>>, vector<1x4x64xf32>,
    return
  }
  func.func @transform_0(%arg0: i32) -> (i32, i32, i32) {
    %c0_i32 = arith.constant 0 : i32
    %c0_i32_0 = arith.constant 0 : i32
    %c0_i32_1 = arith.constant 0 : i32
    return %arg0, %c0_i32, %c0_i32_0 : i32, i32, i32
  }
  func.func @transform_1(%arg0: i32) -> (i32, i32) {
    %c0_i32 = arith.constant 0 : i32
    %c0_i32_0 = arith.constant 0 : i32
    %c0_i32_1 = arith.constant 0 : i32
    return %c0_i32, %c0_i32_0 : i32, i32
  }
  func.func @transform_2(%arg0: i32) -> (i32, i32, i32) {
    %c0_i32 = arith.constant 0 : i32
    %c0_i32_0 = arith.constant 0 : i32
    %c0_i32_1 = arith.constant 0 : i32
    %c0_i32_2 = arith.constant 0 : i32
    return %c0_i32, %c0_i32_0, %c0_i32_1 : i32, i32, i32
  }
  func.func @transform_3(%arg0: i32) -> (i32, i32, i32) {
    %c0_i32 = arith.constant 0 : i32
    %c0_i32_0 = arith.constant 0 : i32
    %c0_i32_1 = arith.constant 0 : i32
    %c0_i32_2 = arith.constant 0 : i32
    return %c0_i32, %c0_i32_0, %c0_i32_1 : i32, i32, i32
  }
  func.func @transform_4(%arg0: i32) -> (i32, i32, i32) {
    %c0_i32 = arith.constant 0 : i32
    %c0_i32_0 = arith.constant 0 : i32
    %c0_i32_1 = arith.constant 0 : i32
    %c0_i32_2 = arith.constant 0 : i32
    return %c0_i32, %c0_i32_0, %c0_i32_1 : i32, i32, i32
  }
  func.func @transform_5(%arg0: i32) -> (i32, i32, i32) {
    %c0_i32 = arith.constant 0 : i32
    %c0_i32_0 = arith.constant 0 : i32
    %c0_i32_1 = arith.constant 0 : i32
    %c0_i32_2 = arith.constant 0 : i32
    return %c0_i32, %c0_i32_0, %c0_i32_1 : i32, i32, i32
  }
  func.func @transform_6(%arg0: i32) -> (i32, i32, i32) {
    %c0_i32 = arith.constant 0 : i32
    %c0_i32_0 = arith.constant 0 : i32
    %c0_i32_1 = arith.constant 0 : i32
    %c0_i32_2 = arith.constant 0 : i32
    return %c0_i32, %c0_i32_0, %c0_i32_1 : i32, i32, i32
  }
  func.func @transform_7(%arg0: i32) -> (i32, i32, i32) {
    %c0_i32 = arith.constant 0 : i32
    %c0_i32_0 = arith.constant 0 : i32
    %c0_i32_1 = arith.constant 0 : i32
    %c0_i32_2 = arith.constant 0 : i32
    return %c0_i32, %c0_i32_0, %c0_i32_1 : i32, i32, i32
  }
  func.func @transform_8(%arg0: i32) -> (i32, i32, i32) {
    %c0_i32 = arith.constant 0 : i32
    %c0_i32_0 = arith.constant 0 : i32
    %c0_i32_1 = arith.constant 0 : i32
    %c0_i32_2 = arith.constant 0 : i32
    return %c0_i32, %c0_i32_0, %c0_i32_1 : i32, i32, i32
  }
  func.func @transform_9(%arg0: i32) -> (i32, i32, i32) {
    %c0_i32 = arith.constant 0 : i32
    %c0_i32_0 = arith.constant 0 : i32
    %c0_i32_1 = arith.constant 0 : i32
    %c0_i32_2 = arith.constant 0 : i32
    return %c0_i32, %c0_i32_0, %c0_i32_1 : i32, i32, i32
  }
  func.func @transform_10(%arg0: i32) -> (i32, i32, i32) {
    %c0_i32 = arith.constant 0 : i32
    %c0_i32_0 = arith.constant 0 : i32
    %c0_i32_1 = arith.constant 0 : i32
    %c0_i32_2 = arith.constant 0 : i32
    return %c0_i32, %c0_i32_0, %c0_i32_1 : i32, i32, i32
  }
  func.func @transform_11(%arg0: i32) -> (i32, i32, i32) {
    %c0_i32 = arith.constant 0 : i32
    %c0_i32_0 = arith.constant 0 : i32
    %c0_i32_1 = arith.constant 0 : i32
    %c0_i32_2 = arith.constant 0 : i32
    return %c0_i32, %c0_i32_0, %c0_i32_1 : i32, i32, i32
  }
  func.func @transform_12(%arg0: i32) -> (i32, i32, i32) {
    %c0_i32 = arith.constant 0 : i32
    %c0_i32_0 = arith.constant 0 : i32
    %c0_i32_1 = arith.constant 0 : i32
    %c0_i32_2 = arith.constant 0 : i32
    return %c0_i32, %c0_i32_0, %c0_i32_1 : i32, i32, i32
  }
  func.func @transform_13(%arg0: i32) -> (i32, i32, i32) {
    %c0_i32 = arith.constant 0 : i32
    %c0_i32_0 = arith.constant 0 : i32
    %c0_i32_1 = arith.constant 0 : i32
    %c0_i32_2 = arith.constant 0 : i32
    return %c0_i32, %c0_i32_0, %c0_i32_1 : i32, i32, i32
  }
  func.func @transform_14(%arg0: i32) -> (i32, i32) {
    %c0_i32 = arith.constant 0 : i32
    %c0_i32_0 = arith.constant 0 : i32
    %c0_i32_1 = arith.constant 0 : i32
    return %c0_i32, %c0_i32_0 : i32, i32
  }
  func.func @transform_15(%arg0: i32) -> (i32, i32) {
    %c0_i32 = arith.constant 0 : i32
    %c0_i32_0 = arith.constant 0 : i32
    %c0_i32_1 = arith.constant 0 : i32
    return %c0_i32, %c0_i32_0 : i32, i32
  }
  func.func @transform_16(%arg0: i32) -> (i32, i32, i32) {
    %c0_i32 = arith.constant 0 : i32
    %c0_i32_0 = arith.constant 0 : i32
    %c0_i32_1 = arith.constant 0 : i32
    return %arg0, %c0_i32, %c0_i32_0 : i32, i32, i32
  }
}

</mosaic_0001>

<bundles_post_ra>
// kernel: tpu_custom_call.1
= control target key start
LH: loop header
LB: loop body
LE: loop exit
PB: predicated region body
PF: predicated region fallthrough
CT: control target
= control target key end

     0   :  { %s9881_s0 = inlined_call_operand.vmem [shape: f32[2,4,48], index: 0, kind: input, shape index: {}]   ;;  %s9882_s1 = inlined_call_operand.vmem [shape: f32[4,48], index: 1, kind: input, shape index: {}]   ;;  %s9883_s2 = inlined_call_operand.vmem [shape: f32[1,12,4], index: 2, kind: input, shape index: {}]   ;;  %s9884_s3 = inlined_call_operand.vmem [shape: f32[1,12,1], index: 3, kind: input, shape index: {}]   ;;  %s9885_s4 = inlined_call_operand.vmem [shape: f32[1,4,4], index: 4, kind: input, shape index: {}]   ;;  %s9886_s5 = inlined_call_operand.vmem [shape: f32[1,4,1], index: 5, kind: input, shape index: {}]   ;;  %s9887_s6 = inlined_call_operand.vmem [shape: f32[1,4,1], index: 6, kind: input, shape index: {}]   ;;  %s9888_s7 = inlined_call_operand.vmem [shape: f32[1,4,1], index: 7, kind: input, shape index: {}]   ;;  %s9889_s8 = inlined_call_operand.vmem [shape: bf16[1,2048,4], index: 8, kind: input, shape index: {}]   ;;  %s9890_s9 = inlined_call_operand.vmem [shape: f32[1,2048,1], index: 9, kind: input, shape index: {}]   ;;  %s9891_s10 = inlined_call_operand.vmem [shape: bf16[1,4,2048], index: 10, kind: input, shape index: {}]   ;;  %s9892_s11 = inlined_call_operand.vmem [shape: f32[1,4,1], index: 11, kind: input, shape index: {}]   ;;  %s9893_s12 = inlined_call_operand.vmem [shape: f32[1,4,1], index: 12, kind: input, shape index: {}]   ;;  %s9894_s13 = inlined_call_operand.vmem [shape: f32[1,4,1], index: 13, kind: input, shape index: {}]   ;;  %s9895_s14 = inlined_call_operand.vmem [shape: f32[48,64], index: 14, kind: input, shape index: {}]   ;;  %s9896_s15 = inlined_call_operand.vmem [shape: f32[1,64], index: 15, kind: input, shape index: {}]   ;;  %s9897_s16 = inlined_call_operand.hbm [shape: f32[2,4,64], index: 16, kind: output, shape index: {}]  }
   0x1   :  { %9908 = sst [smem:[#allocation132_spill]] %s9881_s0 }
   0x2   :  { %21 = vsyncpa [#allocation3], 0 }
   0x3   :  { %23 = vsyncpa [#allocation3 + $0x1], 0  ;;  %s7239_s21 = smov 0   ;;  %s7241_s22 = smov 0  }
   0x4   :  { %s7243_s23 = smov 0   ;;  %s7245_s24 = smov 0  }
   0x5 LB: > { %9909 = sst [smem:[#allocation5_spill]] %s7134_s21  ;;  %s7260_s25 = sadd.s32 4294967295, %s7146_s24   ;;  %s7146_s24 = sphi %s7245_s24, %s10201_s24   ;;  %s7142_s23 = sphi %s7243_s23, %s10203_s23   ;;  %s7138_s22 = sphi %s7241_s22, %s10205_s22   ;;  %s7134_s21 = sphi %s7239_s21, %s10204_s21  }
   0x6   : > { %9910 = sst [smem:[#allocation6_spill]] %s7142_s23  ;;  %s5926_s26 = sadd.s32 4294967294, %s7146_s24  }
   0x7   : > { %9911 = sst [smem:[#allocation7_spill]] %s7146_s24  ;;  %s7264_s27 = sadd.s32 1, %s7146_s24  }
   0x8   : > { %9912 = sst [smem:[#allocation8_spill]] %s7264_s27  ;;  %s377_s28 = sadd.s32 1, %s7142_s23 }
   0x9   : > { %s374_s29 = ssub.s32 %s7146_s24, %s7264_s27  ;;  %p387_p0 = scmp.ne.s32.totalorder %s7142_s23, %s7138_s22 }
   0xa   : > { %p375_p1 = scmp.eq.s32.totalorder %s374_s29, 0  ;;  %p388_p2 = scmp.eq.s32.totalorder %s7260_s25, 1 }
   0xb   : > { %p393_p3 = scmp.ne.s32.totalorder %s7138_s22, %s7134_s21  ;;  %p394_p4 = scmp.eq.s32.totalorder %s5926_s26, 1 }
   0xc   : > { %s7275_s30 = scalar_select %p375_p1, %s7142_s23, %s377_s28  }
   0xd   : > { %p7277_p5 = por %p388_p2, %p387_p0  ;;  %p7281_p6 = por %p394_p4, %p393_p3 }
   0xe   : > { %9913 = sst [smem:[#allocation9_spill]] %s7275_s30  ;;  %p5929_p7 = scmp.ge.s32.totalorder %s7146_s24, 1 }
   0xf   : > { %s9915_s17 = scalar_select %p7281_p6, 1, 0 }
  0x10   : > { %p464_p8 = scmp.lt.s32.totalorder %s7146_s24, 3 }
  0x11   : > { %9916 = sst [smem:[#allocation10_spill]] %s9915_s17 }
  0x12   : > { %p465_p9 = pnand %p5929_p7, %p464_p8 }
  0x14   : > { %468 = sbr.rel (%p465_p9) target bundleno = 2541 (0x9ed), region = 84 }
  0x1b   : > { %p513_p10 = scmp.lt.s32.totalorder %s7260_s25, 1  ;;  %v521_v0 = vld [vmem:[%s9883_s2] sm:$0xff]  ;;  %vm535_vm0 = vcmask 31744   ;;  %v7148_v3 = vmov 0   ;;  %vm542_vm1 = vcmask 1043456   ;;  %s9917_s27 = sld [smem:[#allocation132_spill]] }
  0x1c   : > { %6546 = vmatprep.mubr.msk.f32.mxu0 %vm535_vm0, %v521_v0  ;;  %v523_v1 = vld [vmem:[%s9884_s3] sm:$0xff]  ;;  %6922 = vset.pattern.permute.xlu0 %v7148_v3  ;;  %v522_v5 = vld [vmem:[%s9883_s2 + $0x8] sm:$0xf]  ;;  %vm770_vm2 = vcmask 392192   ;;  %v1313_v60 = vld [vmem:[%s9890_s9 + $0x38] sm:$0xff]  ;;  %v9905_v62 = vmov 0.0|0.0  }
  0x1d   : > { %s514_s28 = scalar_select %p513_p10, %s7260_s25, 1  ;;  %v519_v2 = vld [vmem:[%s9882_s1] sm:$0xf]  ;;  %6923 = vset.pattern.permute.xlu1 %v7148_v3  ;;  %527 = vperm.xlu0 %6922, %v523_v1   ;;  %v1319_v61 = vld [vmem:[%s9890_s9 + $0x68] sm:$0xff]  ;;  %v1321_v63 = vld [vmem:[%s9890_s9 + $0x78] sm:$0xff]  ;;  %vm7150_vm3 = vmmov 0  }
  0x1e   : > { %v1323_v0 = vld [vmem:[%s9890_s9 + $0x88] sm:$0xff]  ;;  %v929_v3 = vld [vmem:[%s9886_s5] sm:$0xf]  ;;  %vm7553_vm4 = vmpackc.low %vm770_vm2, %vm770_vm2  ;;  %vm1014_vm5 = vcmask 388096   ;;  %vm3866_vm6 = vcmask 1041408   ;;  %s510_s21 = sand.u32 1, %s7138_s22  }
  0x1f   : > { %s5931_s23 = sshll.u32 %s514_s28, 2  ;;  %v524_v1 = vld [vmem:[%s9884_s3 + $0x8] sm:$0xf]  ;;  %s6210_s30 = sshll.u32 %s7260_s25, 6  ;;  %vm5851_vm7 = vcmask 519168  }
  0x20   : > { %s9839_s29 = scalar_lea.hbm %s9897_s16, %s6210_s30  ;;  %s5854_s18 = scalar_lea.sflag [#allocation3], %s510_s21 }
  0x21   : > { %s516_s17 = scalar_lea.vmem %s9917_s27, %s5931_s23  ;;  %s5930_s23 = sshll.u32 %s510_s21, 2 }
  0x22   : > { %v518_v4 = vld [vmem:[%s516_s17] sm:$0xf]  ;;  %s512_s17 = scalar_lea.vmem [#allocation2], %s5930_s23  ;;  %s7153_s25 = smov [#allocation2]  }
  0x23   : > { %v7305_v6 = vadd.f32 %v519_v2, %v518_v4  ;;  %v1325_v2 = vld [vmem:[%s9890_s9 + $0x98] sm:$0xff]  ;;  %v1327_v4 = vld [vmem:[%s9890_s9 + $0xa8] sm:$0xff]  ;;  %s5867_s20 = sshll.u32 %s512_s17, 4  ;;  %s7088_s23 = sshll.u32 %s7153_s25, 4  ;;  %s9841_s20 = int_to_ptr.vmem [resolvable:$true] %s5867_s20  ;;  %s7089_s23 = int_to_ptr.vmem [resolvable:$false] %s7088_s23 }
  0x24   : > { %s7084_s19 = scalar_lea.vmem %s9841_s20, 64  ;;  %s7090_s24 = scalar_lea.vmem %s7089_s23, 128 }
  0x25   : > { %6544 = vmatprep.subr.msk.mxu0 %vm542_vm1, %v7305_v6  ;;  %p7085_p11 = scmp.ne.s32.totalorder %s9841_s20, %s7084_s19  ;;  %p7091_p0 = scmp.lt.s32.totalorder %s9841_s20, %s7089_s23 }
  0x26   : > { %6545 = vmatpush3.msk.msra.mxu0 %vm542_vm1, %v7305_v6  ;;  %p7092_p1 = scmp.lt.s32.totalorder %s7090_s24, %s7084_s19 }
  0x27   : > { %6547 = vmatmul.mubr.msk.f32.vlgmr.msra.gmra.mrb[0].mxu0 %vm535_vm0, %v522_v5  ;;  %6853 = vmatprep.subr.bf16.mxu0 %v9905_v62  ;;  %v1012_v5 = vld [vmem:[%s9887_s6] sm:$0xf]  ;;  %p7086_p12 = pnand %p7085_p11, %p7277_p5 }
  0x28   : > { %p7093_p2 = por %p7092_p1, %p7091_p0 }
  0x29   : > { %p7087_p13 = pneg %p7086_p12 }
  0x2b   : > { %p7094_p3 = pnand %p7093_p2, %p7087_p13 }
  0x9c   : > { %v528_v7 = vpop.permute.xlu0 %527 }
  0xfa   : > { %v7312_v8 = vpop.f32.mrb[0].mxu0 }
  0xfb   : > { %v612_v9 = vpop.f32.mrb[1].mxu0 }
  0xfc   : > { %v613_v10 = vadd.f32 %v612_v9, %v528_v7  ;;  %v1329_v7 = vld [vmem:[%s9890_s9 + $0xb8] sm:$0xff]  ;;  %v1013_v9 = vld [vmem:[%s9888_s7] sm:$0xf] }
  0xfe   : > { %621 = vxpose.xlu0.b32.start.end [1/1] (short) (narrow) %v613_v10, 48  ;;  %v654_v11 = vrot.slane %v613_v10, 4  ;;  %v1331_v10 = vld [vmem:[%s9890_s9 + $0xc8] sm:$0xff] }
 0x100   : > { %6549 = vmatprep.subr.msk.mxu1 %vm542_vm1, %v654_v11 }
 0x101   : > { %6550 = vmatpush3.msk.msra.mxu1 %vm542_vm1, %v654_v11  ;;  %v1306_v11 = vld [vmem:[%s9890_s9] sm:$0xff] }
 0x17e   : > { %v637_v12 = vpop.trf.xlu0 }
 0x17f   : > { %6551 = vmatprep.mubr.msk.f32.mxu1 %vm535_vm0, %v637_v12  ;;  %v1333_v12 = vld [vmem:[%s9890_s9 + $0xd8] sm:$0xff] }
 0x182   : > { %v638_v13 = vpop.trf.xlu0 }
 0x183   : > { %6552 = vmatmul.mubr.msk.f32.vlgmr.msra.gmra.mrb[0].mxu1 %vm535_vm0, %v638_v13  ;;  %v1307_v13 = vld [vmem:[%s9890_s9 + $0x8] sm:$0xff] }
 0x186   : > { %v639_v14 = vpop.trf.xlu0 }
 0x187   : > { %6554 = vmatprep.mubr.msk.f32.mxu1 %vm535_vm0, %v639_v14  ;;  %v9904_v14 = vmov 0.0  }
 0x188   : > { %6572 = vmatprep.mubr.msk.f32.mxu0 %vm7150_vm3, %v9904_v14  ;;  %6575 = vmatprep.subr.mxu1 %v9904_v14 }
 0x18a   : > { %v640_v15 = vpop.trf.xlu0 }
 0x18b   : > { %6555 = vmatmul.mubr.msk.f32.gmra.mrb[2].mxu1 %vm535_vm0, %v640_v15  ;;  %v1335_v15 = vld [vmem:[%s9890_s9 + $0xe8] sm:$0xff] }
 0x18e   : > { %v641_v16 = vpop.trf.xlu0 }
 0x18f   : > { %6557 = vmatprep.mubr.msk.f32.mxu1 %vm535_vm0, %v641_v16  ;;  %v1308_v16 = vld [vmem:[%s9890_s9 + $0x10] sm:$0xff] }
 0x192   : > { %v642_v17 = vpop.trf.xlu0 }
 0x193   : > { %6558 = vmatmul.mubr.msk.f32.gmra.mrb[4].mxu1 %vm535_vm0, %v642_v17  ;;  %v1337_v17 = vld [vmem:[%s9890_s9 + $0xf8] sm:$0xff] }
 0x194   : > { %6577 = vmatprep.mubr.msk.f32.mxu1 %vm7150_vm3, %v9904_v14 }
 0x256   : > { %v6553_v18 = vpop.f32.mrb[0].mxu1 }
 0x257   : > { %v741_v19 = vpop.f32.mrb[1].mxu1  ;;  %v774_v20 = vsel %vm770_vm2, %v6553_v18, -inf }
 0x258   : > { %775 = vmax.xlane.f32.xlu1 %v774_v20  ;;  %v771_v21 = vsel %vm770_vm2, %v741_v19, -inf  ;;  %v1310_v20 = vld [vmem:[%s9890_s9 + $0x20] sm:$0xff] }
 0x25c   : > { %772 = vmax.xlane.f32.xlu1 %v771_v21  ;;  %v1341_v21 = vld [vmem:[%s9890_s9 + $0x118] sm:$0xff] }
 0x25e   : > { %v6556_v22 = vpop.f32.mrb[2].mxu1 }
 0x25f   : > { %v751_v23 = vpop.f32.mrb[3].mxu1  ;;  %v780_v24 = vsel %vm770_vm2, %v6556_v22, -inf }
 0x260   : > { %781 = vmax.xlane.f32.xlu1 %v780_v24  ;;  %v777_v25 = vsel %vm770_vm2, %v751_v23, -inf  ;;  %v1312_v24 = vld [vmem:[%s9890_s9 + $0x30] sm:$0xff] }
 0x264   : > { %778 = vmax.xlane.f32.xlu1 %v777_v25  ;;  %v1345_v25 = vld [vmem:[%s9890_s9 + $0x138] sm:$0xff] }
 0x266   : > { %v6559_v26 = vpop.f32.mrb[4].mxu1 }
 0x267   : > { %v761_v27 = vpop.f32.mrb[5].mxu1  ;;  %v786_v29 = vsel %vm770_vm2, %v6559_v26, -inf }
 0x268   : > { %v783_v28 = vsel %vm770_vm2, %v761_v27, -inf }
 0x269   : > { %784 = vmax.xlane.f32.xlu1 %v783_v28  ;;  %v1315_v28 = vld [vmem:[%s9890_s9 + $0x48] sm:$0xff] }
 0x26d   : > { %787 = vmax.xlane.f32.xlu1 %v786_v29  ;;  %v1349_v29 = vld [vmem:[%s9890_s9 + $0x158] sm:$0xff] }
 0x2e5   : > { %v776_v30 = vpop.xlane.xlu1 %775 }
 0x2e6   : > { %v790_v31 = vsub.f32 %v6553_v18, %v776_v30  ;;  %v1309_v18 = vld [vmem:[%s9890_s9 + $0x18] sm:$0xff]  ;;  %v1316_v30 = vld [vmem:[%s9890_s9 + $0x50] sm:$0xff] }
 0x2e8   : > { %v797_v32 = vmul.f32 1.442695, %v790_v31  ;;  %v1351_v31 = vld [vmem:[%s9890_s9 + $0x168] sm:$0xff] }
 0x2e9   : > { %v773_v33 = vpop.xlane.xlu1 %772 }
 0x2ea   : > { %7056 = vpow2.f32 %v797_v32  ;;  %v789_v34 = vsub.f32 %v741_v19, %v773_v33  ;;  %v1339_v19 = vld [vmem:[%s9890_s9 + $0x108] sm:$0xff]  ;;  %v1317_v32 = vld [vmem:[%s9890_s9 + $0x58] sm:$0xff] }
 0x2eb   : > { %v1353_v33 = vld [vmem:[%s9890_s9 + $0x178] sm:$0xff] }
 0x2ec   : > { %v795_v35 = vmul.f32 1.442695, %v789_v34  ;;  %v1318_v34 = vld [vmem:[%s9890_s9 + $0x60] sm:$0xff] }
 0x2ed   : > { %v782_v36 = vpop.xlane.xlu1 %781 }
 0x2ee   : > { %7058 = vpow2.f32 %v795_v35  ;;  %v792_v37 = vsub.f32 %v6556_v22, %v782_v36  ;;  %v1311_v22 = vld [vmem:[%s9890_s9 + $0x28] sm:$0xff]  ;;  %v1320_v36 = vld [vmem:[%s9890_s9 + $0x70] sm:$0xff] }
 0x2ef   : > { %v1355_v35 = vld [vmem:[%s9890_s9 + $0x188] sm:$0xff] }
 0x2f0   : > { %v801_v38 = vmul.f32 1.442695, %v792_v37  ;;  %v1357_v37 = vld [vmem:[%s9890_s9 + $0x198] sm:$0xff] }
 0x2f1   : > { %v779_v39 = vpop.xlane.xlu1 %778 }
 0x2f2   : > { %7060 = vpow2.f32 %v801_v38  ;;  %v791_v40 = vsub.f32 %v751_v23, %v779_v39  ;;  %v1343_v23 = vld [vmem:[%s9890_s9 + $0x128] sm:$0xff]  ;;  %v1322_v38 = vld [vmem:[%s9890_s9 + $0x80] sm:$0xff] }
 0x2f3   : > { %v1359_v39 = vld [vmem:[%s9890_s9 + $0x1a8] sm:$0xff] }
 0x2f4   : > { %v7328_v41 = vpop.eup %7056  ;;  %v799_v42 = vmul.f32 1.442695, %v791_v40  ;;  %v1324_v40 = vld [vmem:[%s9890_s9 + $0x90] sm:$0xff] }
 0x2f5   : > { %v810_v43 = vsel %vm770_vm2, %v7328_v41, 0.0 }
 0x2f6   : > { %7062 = vpow2.f32 %v799_v42  ;;  %811 = vadd.xlane.f32.xlu1 %v810_v43  ;;  %v785_v44 = vpop.xlane.xlu1 %784  ;;  %v1361_v42 = vld [vmem:[%s9890_s9 + $0x1b8] sm:$0xff]  ;;  %v1326_v43 = vld [vmem:[%s9890_s9 + $0xa0] sm:$0xff] }
 0x2f7   : > { %v793_v46 = vsub.f32 %v761_v27, %v785_v44  ;;  %v1347_v27 = vld [vmem:[%s9890_s9 + $0x148] sm:$0xff] }
 0x2f8   : > { %v7332_v45 = vpop.eup %7058  ;;  %v1363_v44 = vld [vmem:[%s9890_s9 + $0x1c8] sm:$0xff] }
 0x2f9   : > { %v807_v47 = vsel %vm770_vm2, %v7332_v45, 0.0  ;;  %v803_v51 = vmul.f32 1.442695, %v793_v46  ;;  %v1328_v46 = vld [vmem:[%s9890_s9 + $0xb0] sm:$0xff] }
 0x2fa   : > { %808 = vadd.xlane.f32.xlu1 %v807_v47  ;;  %v788_v48 = vpop.xlane.xlu1 %787  ;;  %v1365_v47 = vld [vmem:[%s9890_s9 + $0x1d8] sm:$0xff] }
 0x2fb   : > { %v794_v49 = vsub.f32 %v6559_v26, %v788_v48  ;;  %v1314_v26 = vld [vmem:[%s9890_s9 + $0x40] sm:$0xff] }
 0x2fc   : > { %v7336_v50 = vpop.eup %7060  ;;  %v1330_v48 = vld [vmem:[%s9890_s9 + $0xc0] sm:$0xff] }
 0x2fd   : > { %v805_v52 = vmul.f32 1.442695, %v794_v49  ;;  %v816_v53 = vsel %vm770_vm2, %v7336_v50, 0.0  ;;  %v1367_v49 = vld [vmem:[%s9890_s9 + $0x1e8] sm:$0xff] }
 0x2fe   : > { %817 = vadd.xlane.f32.xlu0 %v816_v53  ;;  %v1334_v53 = vld [vmem:[%s9890_s9 + $0xe0] sm:$0xff] }
 0x2ff   : > { %7064 = vpow2.f32 %v805_v52  ;;  %v1369_v52 = vld [vmem:[%s9890_s9 + $0x1f8] sm:$0xff] }
 0x300   : > { %v7340_v54 = vpop.eup %7062  ;;  %7066 = vpow2.f32 %v803_v51  ;;  %v1332_v51 = vld [vmem:[%s9890_s9 + $0xd0] sm:$0xff] }
 0x301   : > { %v813_v55 = vsel %vm770_vm2, %v7340_v54, 0.0 }
 0x302   : > { %814 = vadd.xlane.f32.xlu1 %v813_v55  ;;  %v1371_v55 = vld [vmem:[%s9890_s9 + $0x208] sm:$0xff] }
 0x309   : > { %v7344_v56 = vpop.eup %7064 }
 0x30a   : > { %v822_v57 = vsel %vm770_vm2, %v7344_v56, 0.0  ;;  %v7348_v58 = vpop.eup %7066 }
 0x30b   : > { %823 = vadd.xlane.f32.xlu1 %v822_v57  ;;  %v819_v59 = vsel %vm770_vm2, %v7348_v58, 0.0  ;;  %v1336_v57 = vld [vmem:[%s9890_s9 + $0xf0] sm:$0xff] }
 0x30f   : > { %820 = vadd.xlane.f32.xlu1 %v819_v59  ;;  %v1373_v59 = vld [vmem:[%s9890_s9 + $0x218] sm:$0xff] }
 0x314   : > { %1599 = vperm.xlu0 %6922, %v1313_v60   ;;  %v1338_v60 = vld [vmem:[%s9890_s9 + $0x100] sm:$0xff] }
 0x318   : > { %1629 = vperm.xlu0 %6922, %v1319_v61  }
 0x31c   : > { %1639 = vperm.xlu0 %6922, %v1321_v63   ;;  %v1375_v63 = vld [vmem:[%s9890_s9 + $0x228] sm:$0xff] }
 0x320   : > { %1649 = vperm.xlu0 %6922, %v1323_v0   ;;  %532 = vperm.xlu1 %6923, %v524_v1   ;;  %v1340_v0 = vld [vmem:[%s9890_s9 + $0x110] sm:$0xff] }
 0x324   : > { %1659 = vperm.xlu0 %6922, %v1325_v2   ;;  %932 = vperm.xlu1 %6923, %v929_v3   ;;  %v1377_v2 = vld [vmem:[%s9890_s9 + $0x238] sm:$0xff]  ;;  %v1342_v3 = vld [vmem:[%s9890_s9 + $0x120] sm:$0xff] }
 0x328   : > { %1669 = vperm.xlu0 %6922, %v1327_v4   ;;  %1039 = vperm.xlu1 %6923, %v1012_v5   ;;  %v1387_v5 = vld [vmem:[%s9890_s9 + $0x288] sm:$0xff] }
 0x32c   : > { %1679 = vperm.xlu0 %6922, %v1329_v7   ;;  %1045 = vperm.xlu1 %6923, %v1013_v9   ;;  %v1344_v7 = vld [vmem:[%s9890_s9 + $0x130] sm:$0xff] }
 0x330   : > { %1689 = vperm.xlu0 %6922, %v1331_v10   ;;  %1564 = vperm.xlu1 %6923, %v1306_v11   ;;  %v1389_v11 = vld [vmem:[%s9890_s9 + $0x298] sm:$0xff] }
 0x334   : > { %1699 = vperm.xlu0 %6922, %v1333_v12   ;;  %1569 = vperm.xlu1 %6923, %v1307_v13   ;;  %v1346_v12 = vld [vmem:[%s9890_s9 + $0x140] sm:$0xff] }
 0x338   : > { %1709 = vperm.xlu0 %6922, %v1335_v15   ;;  %1574 = vperm.xlu1 %6923, %v1308_v16  }
 0x33c   : > { %1719 = vperm.xlu0 %6922, %v1337_v17   ;;  %1579 = vperm.xlu1 %6923, %v1309_v18  }
 0x340   : > { %1729 = vperm.xlu0 %6922, %v1339_v19   ;;  %1584 = vperm.xlu1 %6923, %v1310_v20   ;;  %v1391_v20 = vld [vmem:[%s9890_s9 + $0x2a8] sm:$0xff] }
 0x344   : > { %1739 = vperm.xlu0 %6922, %v1341_v21   ;;  %1589 = vperm.xlu1 %6923, %v1311_v22  }
 0x348   : > { %1749 = vperm.xlu0 %6922, %v1343_v23   ;;  %1594 = vperm.xlu1 %6923, %v1312_v24   ;;  %v1393_v23 = vld [vmem:[%s9890_s9 + $0x2b8] sm:$0xff]  ;;  %v1350_v24 = vld [vmem:[%s9890_s9 + $0x160] sm:$0xff] }
 0x34c   : > { %1759 = vperm.xlu0 %6922, %v1345_v25   ;;  %1604 = vperm.xlu1 %6923, %v1314_v26  }
 0x350   : > { %1769 = vperm.xlu0 %6922, %v1347_v27   ;;  %1609 = vperm.xlu1 %6923, %v1315_v28  }
 0x354   : > { %1779 = vperm.xlu0 %6922, %v1349_v29   ;;  %1614 = vperm.xlu1 %6923, %v1316_v30  }
 0x358   : > { %1789 = vperm.xlu0 %6922, %v1351_v31   ;;  %1619 = vperm.xlu1 %6923, %v1317_v32   ;;  %v1395_v31 = vld [vmem:[%s9890_s9 + $0x2c8] sm:$0xff]  ;;  %v1352_v32 = vld [vmem:[%s9890_s9 + $0x170] sm:$0xff] }
 0x35c   : > { %1799 = vperm.xlu0 %6922, %v1353_v33   ;;  %1624 = vperm.xlu1 %6923, %v1318_v34   ;;  %v1354_v34 = vld [vmem:[%s9890_s9 + $0x180] sm:$0xff] }
 0x360   : > { %1809 = vperm.xlu0 %6922, %v1355_v35   ;;  %1634 = vperm.xlu1 %6923, %v1320_v36  }
 0x364   : > { %1819 = vperm.xlu0 %6922, %v1357_v37   ;;  %1644 = vperm.xlu1 %6923, %v1322_v38   ;;  %v1397_v38 = vld [vmem:[%s9890_s9 + $0x2d8] sm:$0xff] }
 0x368   : > { %1829 = vperm.xlu0 %6922, %v1359_v39   ;;  %1654 = vperm.xlu1 %6923, %v1324_v40   ;;  %v1356_v39 = vld [vmem:[%s9890_s9 + $0x190] sm:$0xff] }
 0x36c   : > { %1839 = vperm.xlu0 %6922, %v1361_v42   ;;  %1664 = vperm.xlu1 %6923, %v1326_v43  }
 0x370   : > { %1849 = vperm.xlu0 %6922, %v1363_v44   ;;  %1674 = vperm.xlu1 %6923, %v1328_v46  }
 0x374   : > { %1859 = vperm.xlu0 %6922, %v1365_v47   ;;  %1684 = vperm.xlu1 %6923, %v1330_v48   ;;  %v1381_v47 = vld [vmem:[%s9890_s9 + $0x258] sm:$0xff]  ;;  %v1358_v48 = vld [vmem:[%s9890_s9 + $0x1a0] sm:$0xff] }
 0x378   : > { %1869 = vperm.xlu0 %6922, %v1367_v49   ;;  %1694 = vperm.xlu1 %6923, %v1332_v51  }
 0x37c   : > { %1879 = vperm.xlu0 %6922, %v1369_v52   ;;  %1704 = vperm.xlu1 %6923, %v1334_v53   ;;  %v1360_v52 = vld [vmem:[%s9890_s9 + $0x1b0] sm:$0xff] }
 0x380   : > { %1889 = vperm.xlu0 %6922, %v1371_v55   ;;  %1714 = vperm.xlu1 %6923, %v1336_v57   ;;  %v1383_v57 = vld [vmem:[%s9890_s9 + $0x268] sm:$0xff] }
 0x383   : > { %v812_v61 = vpop.xlane.xlu1 %811 }
 0x384   : > { %1899 = vperm.xlu0 %6922, %v1373_v59   ;;  %1724 = vperm.xlu1 %6923, %v1338_v60   ;;  %7068 = vrcp.f32 %v812_v61  ;;  %v1362_v60 = vld [vmem:[%s9890_s9 + $0x1c0] sm:$0xff] }
 0x387   : > { %v809_v1 = vpop.xlane.xlu1 %808 }
 0x388   : > { %7070 = vrcp.f32 %v809_v1  ;;  %1909 = vperm.xlu0 %6922, %v1375_v63   ;;  %1734 = vperm.xlu1 %6923, %v1340_v0   ;;  %v1401_v0 = vld [vmem:[%s9890_s9 + $0x2f8] sm:$0xff] }
 0x38b   : > { %v818_v4 = vpop.xlane.xlu0 %817 }
 0x38c   : > { %1919 = vperm.xlu0 %6922, %v1377_v2   ;;  %1744 = vperm.xlu1 %6923, %v1342_v3   ;;  %7072 = vrcp.f32 %v818_v4  ;;  %v1385_v3 = vld [vmem:[%s9890_s9 + $0x278] sm:$0xff]  ;;  %v1366_v4 = vld [vmem:[%s9890_s9 + $0x1e0] sm:$0xff] }
 0x38e   : > { %v7069_v10 = vpop.eup %7068 }
 0x38f   : > { %v815_v9 = vpop.xlane.xlu1 %814  ;;  %v832_v15 = vmul.f32 %v7069_v10, %v7328_v41  ;;  %v1348_v41 = vld [vmem:[%s9890_s9 + $0x150] sm:$0xff] }
 0x390   : > { %7074 = vrcp.f32 %v815_v9  ;;  %1969 = vperm.xlu0 %6922, %v1387_v5   ;;  %1754 = vperm.xlu1 %6923, %v1344_v7   ;;  %v1419_v9 = vld [vmem:[%s9890_s9 + $0x388] sm:$0xff]  ;;  %v1368_v10 = vld [vmem:[%s9890_s9 + $0x1f0] sm:$0xff] }
 0x392   : > { %v7071_v13 = vpop.eup %7070 }
 0x393   : > { %v831_v16 = vmul.f32 %v7071_v13, %v7332_v45  ;;  %v7549_v17 = vpop.permute.xlu0 %1599  ;;  %v1403_v13 = vld [vmem:[%s9890_s9 + $0x308] sm:$0xff] }
 0x394   : > { %1979 = vperm.xlu0 %6922, %v1389_v11   ;;  %1764 = vperm.xlu1 %6923, %v1346_v12  }
 0x395   : > { %v6854_v19 = vpack.c.bf16 %v832_v15, %v831_v16  ;;  %v1370_v15 = vld [vmem:[%s9890_s9 + $0x200] sm:$0xff] }
 0x396   : > { %v7073_v21 = vpop.eup %7072 }
 0x397   : > { %v7563_v45 = vpop.permute.xlu0 %1629  ;;  %6856 = vmatpush3.bf16.xpose.msk.msra.mxu0 %vm7553_vm4, %v6854_v19  ;;  %v834_v26 = vmul.f32 %v7073_v21, %v7336_v50  ;;  %v1421_v19 = vld [vmem:[%s9890_s9 + $0x398] sm:$0xff] }
 0x398   : > { %1989 = vperm.xlu0 %6922, %v1391_v20   ;;  %1774 = vperm.xlu1 %6923, %v1348_v41   ;;  %v824_v22 = vpop.xlane.xlu1 %823  ;;  %v1372_v20 = vld [vmem:[%s9890_s9 + $0x210] sm:$0xff] }
 0x399   : > { %6857 = vmatprep.subr.bf16.mxu0 %v9905_v62  ;;  %7076 = vrcp.f32 %v824_v22  ;;  %v1405_v22 = vld [vmem:[%s9890_s9 + $0x318] sm:$0xff] }
 0x39a   : > { %v7075_v25 = vpop.eup %7074 }
 0x39b   : > { %v833_v27 = vmul.f32 %v7075_v25, %v7340_v54  ;;  %v7576_v28 = vpop.permute.xlu0 %1639  ;;  %v1379_v54 = vld [vmem:[%s9890_s9 + $0x248] sm:$0xff] }
 0x39c   : > { %1999 = vperm.xlu0 %6922, %v1393_v23   ;;  %1784 = vperm.xlu1 %6923, %v1350_v24   ;;  %v821_v29 = vpop.xlane.xlu1 %820  ;;  %v1374_v23 = vld [vmem:[%s9890_s9 + $0x220] sm:$0xff] }
 0x39d   : > { %7078 = vrcp.f32 %v821_v29  ;;  %v6858_v30 = vpack.c.bf16 %v834_v26, %v833_v27  ;;  %v1423_v26 = vld [vmem:[%s9890_s9 + $0x3a8] sm:$0xff]  ;;  %v1376_v27 = vld [vmem:[%s9890_s9 + $0x230] sm:$0xff] }
 0x39f   : > { %v7584_v33 = vpop.permute.xlu0 %1649  ;;  %6860 = vmatpush3.bf16.xpose.msk.msra.mxu0 %vm7553_vm4, %v6858_v30 }
 0x3a0   : > { %2009 = vperm.xlu0 %6922, %v1395_v31   ;;  %1794 = vperm.xlu1 %6923, %v1352_v32   ;;  %v533_v50 = vpop.permute.xlu1 %532  ;;  %v1407_v31 = vld [vmem:[%s9890_s9 + $0x328] sm:$0xff]  ;;  %v1386_v32 = vld [vmem:[%s9890_s9 + $0x280] sm:$0xff] }
 0x3a1   : > { %6861 = vmatprep.subr.bf16.mxu0 %v9905_v62  ;;  %v618_v59 = vadd.f32 %v7312_v8, %v533_v50  ;;  %v1364_v8 = vld [vmem:[%s9890_s9 + $0x1d0] sm:$0xff] }
 0x3a3   : > { %v7595_v35 = vpop.permute.xlu0 %1659  ;;  %v7077_v37 = vpop.eup %7076 }
 0x3a4   : > { %1929 = vperm.xlu0 %6922, %v1379_v54   ;;  %1804 = vperm.xlu1 %6923, %v1354_v34   ;;  %v7597_v36 = vpop.permute.xlu1 %932  ;;  %v836_v43 = vmul.f32 %v7077_v37, %v7344_v56  ;;  %v1425_v34 = vld [vmem:[%s9890_s9 + $0x3b8] sm:$0xff]  ;;  %v1388_v37 = vld [vmem:[%s9890_s9 + $0x290] sm:$0xff] }
 0x3a7   : > { %v7079_v40 = vpop.eup %7078  ;;  %v7605_v42 = vpop.permute.xlu0 %1669 }
 0x3a8   : > { %9920 = vst [vmem:[#allocation11_spill] sm:$0xff] %v7605_v42  ;;  %v835_v44 = vmul.f32 %v7079_v40, %v7348_v58  ;;  %2019 = vperm.xlu0 %6922, %v1397_v38   ;;  %1814 = vperm.xlu1 %6923, %v1356_v39   ;;  %v7609_v46 = vpop.permute.xlu1 %1039  ;;  %v1399_v58 = vld [vmem:[%s9890_s9 + $0x2e8] sm:$0xff]  ;;  %v1409_v40 = vld [vmem:[%s9890_s9 + $0x338] sm:$0xff] }
 0x3aa   : > { %v6862_v49 = vpack.c.bf16 %v836_v43, %v835_v44  ;;  %v1390_v43 = vld [vmem:[%s9890_s9 + $0x2a0] sm:$0xff] }
 0x3ab   : > { %v7617_v51 = vpop.permute.xlu0 %1679 }
 0x3ac   : > { %9921 = vst [vmem:[#allocation12_spill] sm:$0xff] %v7617_v51  ;;  %1939 = vperm.xlu0 %6922, %v1381_v47   ;;  %1824 = vperm.xlu1 %6923, %v1358_v48   ;;  %v7619_v56 = vpop.permute.xlu1 %1045  ;;  %v1427_v48 = vld [vmem:[%s9890_s9 + $0x3c8] sm:$0xff] }
 0x3ad   : > { %6864 = vmatpush3.bf16.xpose.msk.msra.mxu0 %vm7553_vm4, %v6862_v49  ;;  %v1392_v49 = vld [vmem:[%s9890_s9 + $0x2b0] sm:$0xff] }
 0x3af   : > { %v7629_v53 = vpop.permute.xlu0 %1689 }
 0x3b0   : > { %9922 = vst [vmem:[#allocation13_spill] sm:$0xff] %v7629_v53  ;;  %2029 = vperm.xlu0 %6922, %v1399_v58   ;;  %1834 = vperm.xlu1 %6923, %v1360_v52   ;;  %v7631_v55 = vpop.permute.xlu1 %1564  ;;  %v1499_v53 = vld [vmem:[%s9890_s9 + $0x608] sm:$0xff] }
 0x3b3   : > { %v7640_v61 = vpop.permute.xlu0 %1699 }
 0x3b4   : > { %9923 = vst [vmem:[#allocation14_spill] sm:$0xff] %v7640_v61  ;;  %6573 = vmatmul.mubr.msk.f32.vlgmr.msra.gmra.mrb[2].mxu0 %vm770_vm2, %v618_v59  ;;  %1949 = vperm.xlu0 %6922, %v1383_v57   ;;  %v7643_v63 = vpop.permute.xlu1 %1569  ;;  %v1411_v57 = vld [vmem:[%s9890_s9 + $0x348] sm:$0xff]  ;;  %v1394_v59 = vld [vmem:[%s9890_s9 + $0x2c0] sm:$0xff] }
 0x3b5   : > { %1844 = vperm.xlu1 %6923, %v1362_v60  }
 0x3b7   : > { %v7651_v1 = vpop.permute.xlu0 %1709 }
 0x3b8   : > { %9924 = vst [vmem:[#allocation15_spill] sm:$0xff] %v7651_v1  ;;  %2039 = vperm.xlu0 %6922, %v1401_v0   ;;  %v7653_v2 = vpop.permute.xlu1 %1574 }
 0x3b9   : > { %1854 = vperm.xlu1 %6923, %v1364_v8   ;;  %v1429_v8 = vld [vmem:[%s9890_s9 + $0x3d8] sm:$0xff] }
 0x3bb   : > { %v7661_v5 = vpop.permute.xlu0 %1719 }
 0x3bc   : > { %9925 = vst [vmem:[#allocation16_spill] sm:$0xff] %v7661_v5  ;;  %1959 = vperm.xlu0 %6922, %v1385_v3   ;;  %v7663_v7 = vpop.permute.xlu1 %1579  ;;  %v1378_v3 = vld [vmem:[%s9890_s9 + $0x240] sm:$0xff] }
 0x3bd   : > { %1864 = vperm.xlu1 %6923, %v1366_v4  }
 0x3bf   : > { %v7671_v11 = vpop.permute.xlu0 %1729 }
 0x3c0   : > { %9926 = vst [vmem:[#allocation17_spill] sm:$0xff] %v7671_v11  ;;  %2129 = vperm.xlu0 %6922, %v1419_v9   ;;  %v7673_v12 = vpop.permute.xlu1 %1584 }
 0x3c1   : > { %1874 = vperm.xlu1 %6923, %v1368_v10   ;;  %v1413_v10 = vld [vmem:[%s9890_s9 + $0x358] sm:$0xff] }
 0x3c3   : > { %v7681_v16 = vpop.permute.xlu0 %1739 }
 0x3c4   : > { %9927 = vst [vmem:[#allocation18_spill] sm:$0xff] %v7681_v16  ;;  %2049 = vperm.xlu0 %6922, %v1403_v13   ;;  %v7683_v18 = vpop.permute.xlu1 %1589  ;;  %v1396_v13 = vld [vmem:[%s9890_s9 + $0x2d0] sm:$0xff] }
 0x3c5   : > { %1884 = vperm.xlu1 %6923, %v1370_v15  }
 0x3c7   : > { %v7691_v41 = vpop.permute.xlu0 %1749 }
 0x3c8   : > { %9928 = vst [vmem:[#allocation19_spill] sm:$0xff] %v7691_v41  ;;  %2139 = vperm.xlu0 %6922, %v1421_v19   ;;  %v7693_v21 = vpop.permute.xlu1 %1594  ;;  %v1449_v41 = vld [vmem:[%s9890_s9 + $0x478] sm:$0xff] }
 0x3c9   : > { %1894 = vperm.xlu1 %6923, %v1372_v20   ;;  %v1431_v20 = vld [vmem:[%s9890_s9 + $0x3e8] sm:$0xff] }
 0x3cb   : > { %v7701_v24 = vpop.permute.xlu0 %1759 }
 0x3cc   : > { %9929 = vst [vmem:[#allocation20_spill] sm:$0xff] %v7701_v24  ;;  %2059 = vperm.xlu0 %6922, %v1405_v22   ;;  %v7703_v25 = vpop.permute.xlu1 %1604  ;;  %v1380_v22 = vld [vmem:[%s9890_s9 + $0x250] sm:$0xff] }
 0x3cd   : > { %1904 = vperm.xlu1 %6923, %v1374_v23  }
 0x3cf   : > { %v7711_v29 = vpop.permute.xlu0 %1769 }
 0x3d0   : > { %9930 = vst [vmem:[#allocation21_spill] sm:$0xff] %v7711_v29  ;;  %2149 = vperm.xlu0 %6922, %v1423_v26   ;;  %v7713_v30 = vpop.permute.xlu1 %1609 }
 0x3d1   : > { %1914 = vperm.xlu1 %6923, %v1376_v27   ;;  %v1415_v27 = vld [vmem:[%s9890_s9 + $0x368] sm:$0xff] }
 0x3d3   : > { %v7721_v50 = vpop.permute.xlu0 %1779 }
 0x3d4   : > { %9931 = vst [vmem:[#allocation22_spill] sm:$0xff] %v7721_v50  ;;  %2069 = vperm.xlu0 %6922, %v1407_v31   ;;  %v7723_v54 = vpop.permute.xlu1 %1614  ;;  %v1398_v31 = vld [vmem:[%s9890_s9 + $0x2e0] sm:$0xff] }
 0x3d5   : > { %1964 = vperm.xlu1 %6923, %v1386_v32  }
 0x3d7   : > { %v7731_v38 = vpop.permute.xlu0 %1789 }
 0x3d8   : > { %9932 = vst [vmem:[#allocation23_spill] sm:$0xff] %v7731_v38  ;;  %2159 = vperm.xlu0 %6922, %v1425_v34   ;;  %v7733_v39 = vpop.permute.xlu1 %1619 }
 0x3d9   : > { %1974 = vperm.xlu1 %6923, %v1388_v37   ;;  %v1433_v37 = vld [vmem:[%s9890_s9 + $0x3f8] sm:$0xff] }
 0x3db   : > { %v7741_v44 = vpop.permute.xlu0 %1799 }
 0x3dc   : > { %9933 = vst [vmem:[#allocation24_spill] sm:$0xff] %v7741_v44  ;;  %2079 = vperm.xlu0 %6922, %v1409_v40   ;;  %v7743_v47 = vpop.permute.xlu1 %1624  ;;  %v1382_v40 = vld [vmem:[%s9890_s9 + $0x260] sm:$0xff] }
 0x3dd   : > { %1984 = vperm.xlu1 %6923, %v1390_v43  }
 0x3df   : > { %v7751_v58 = vpop.permute.xlu0 %1809 }
 0x3e0   : > { %9934 = vst [vmem:[#allocation25_spill] sm:$0xff] %v7751_v58  ;;  %2169 = vperm.xlu0 %6922, %v1427_v48   ;;  %v7753_v52 = vpop.permute.xlu1 %1634 }
 0x3e1   : > { %1994 = vperm.xlu1 %6923, %v1392_v49   ;;  %v1417_v49 = vld [vmem:[%s9890_s9 + $0x378] sm:$0xff] }
 0x3e3   : > { %v7761_v60 = vpop.permute.xlu0 %1819 }
 0x3e4   : > { %9935 = vst [vmem:[#allocation26_spill] sm:$0xff] %v7761_v60  ;;  %2089 = vperm.xlu0 %6922, %v1411_v57   ;;  %v7763_v0 = vpop.permute.xlu1 %1644  ;;  %v1400_v57 = vld [vmem:[%s9890_s9 + $0x2f0] sm:$0xff] }
 0x3e5   : > { %2004 = vperm.xlu1 %6923, %v1394_v59  }
 0x3e7   : > { %v7771_v4 = vpop.permute.xlu0 %1829 }
 0x3e8   : > { %9936 = vst [vmem:[#allocation27_spill] sm:$0xff] %v7771_v4  ;;  %2179 = vperm.xlu0 %6922, %v1429_v8   ;;  %v7773_v9 = vpop.permute.xlu1 %1654 }
 0x3e9   : > { %1924 = vperm.xlu1 %6923, %v1378_v3   ;;  %v1451_v3 = vld [vmem:[%s9890_s9 + $0x488] sm:$0xff] }
 0x3eb   : > { %v7781_v15 = vpop.permute.xlu0 %1839 }
 0x3ec   : > { %9937 = vst [vmem:[#allocation28_spill] sm:$0xff] %v7781_v15  ;;  %2099 = vperm.xlu0 %6922, %v1413_v10   ;;  %v7783_v19 = vpop.permute.xlu1 %1664  ;;  %v1384_v10 = vld [vmem:[%s9890_s9 + $0x270] sm:$0xff] }
 0x3ed   : > { %9938 = vst [vmem:[#allocation29_spill] sm:$0xff] %v7783_v19  ;;  %2014 = vperm.xlu1 %6923, %v1396_v13  }
 0x3ef   : > { %v7791_v23 = vpop.permute.xlu0 %1849 }
 0x3f0   : > { %9939 = vst [vmem:[#allocation30_spill] sm:$0xff] %v7791_v23  ;;  %2189 = vperm.xlu0 %6922, %v1431_v20   ;;  %v7793_v26 = vpop.permute.xlu1 %1674 }
 0x3f1   : > { %1934 = vperm.xlu1 %6923, %v1380_v22   ;;  %v1435_v22 = vld [vmem:[%s9890_s9 + $0x408] sm:$0xff] }
 0x3f3   : > { %v7801_v32 = vpop.permute.xlu0 %1859 }
 0x3f4   : > { %9940 = vst [vmem:[#allocation31_spill] sm:$0xff] %v7801_v32  ;;  %2109 = vperm.xlu0 %6922, %v1415_v27   ;;  %v7803_v34 = vpop.permute.xlu1 %1684  ;;  %v1418_v27 = vld [vmem:[%s9890_s9 + $0x380] sm:$0xff] }
 0x3f5   : > { %9941 = vst [vmem:[#allocation32_spill] sm:$0xff] %v7803_v34  ;;  %2024 = vperm.xlu1 %6923, %v1398_v31  }
 0x3f7   : > { %v7811_v43 = vpop.permute.xlu0 %1869 }
 0x3f8   : > { %9942 = vst [vmem:[#allocation33_spill] sm:$0xff] %v7811_v43  ;;  %2199 = vperm.xlu0 %6922, %v1433_v37   ;;  %v7813_v48 = vpop.permute.xlu1 %1694 }
 0x3f9   : > { %9943 = vst [vmem:[#allocation34_spill] sm:$0xff] %v7813_v48  ;;  %1944 = vperm.xlu1 %6923, %v1382_v40   ;;  %v1453_v40 = vld [vmem:[%s9890_s9 + $0x498] sm:$0xff] }
 0x3fb   : > { %v7821_v59 = vpop.permute.xlu0 %1879 }
 0x3fc   : > { %9944 = vst [vmem:[#allocation35_spill] sm:$0xff] %v7821_v59  ;;  %2119 = vperm.xlu0 %6922, %v1417_v49   ;;  %v7823_v8 = vpop.permute.xlu1 %1704  ;;  %v1402_v49 = vld [vmem:[%s9890_s9 + $0x300] sm:$0xff] }
 0x3fd   : > { %9945 = vst [vmem:[#allocation36_spill] sm:$0xff] %v7823_v8  ;;  %2034 = vperm.xlu1 %6923, %v1400_v57  }
 0x3ff   : > { %v7831_v13 = vpop.permute.xlu0 %1889 }
 0x400   : > { %2289 = vperm.xlu0 %6922, %v1451_v3   ;;  %v7833_v20 = vpop.permute.xlu1 %1714 }
 0x401   : > { %9946 = vst [vmem:[#allocation37_spill] sm:$0xff] %v7833_v20  ;;  %1954 = vperm.xlu1 %6923, %v1384_v10   ;;  %v1437_v10 = vld [vmem:[%s9890_s9 + $0x418] sm:$0xff] }
 0x403   : > { %v7841_v31 = vpop.permute.xlu0 %1899 }
 0x404   : > { %2209 = vperm.xlu0 %6922, %v1435_v22   ;;  %v7843_v37 = vpop.permute.xlu1 %1724  ;;  %v1420_v22 = vld [vmem:[%s9890_s9 + $0x390] sm:$0xff] }
 0x405   : > { %9947 = vst [vmem:[#allocation38_spill] sm:$0xff] %v7843_v37  ;;  %2124 = vperm.xlu1 %6923, %v1418_v27  }
 0x407   : > { %v7851_v57 = vpop.permute.xlu0 %1909 }
 0x408   : > { %2299 = vperm.xlu0 %6922, %v1453_v40   ;;  %v7853_v3 = vpop.permute.xlu1 %1734  ;;  %v1455_v40 = vld [vmem:[%s9890_s9 + $0x4a8] sm:$0xff] }
 0x409   : > { %9948 = vst [vmem:[#allocation39_spill] sm:$0xff] %v7853_v3  ;;  %2044 = vperm.xlu1 %6923, %v1402_v49   ;;  %v1404_v49 = vld [vmem:[%s9890_s9 + $0x310] sm:$0xff] }
 0x40b   : > { %v7861_v27 = vpop.permute.xlu0 %1919 }
 0x40c   : > { %2219 = vperm.xlu0 %6922, %v1437_v10   ;;  %v7863_v14 = vpop.permute.xlu1 %1744  ;;  %v1439_v10 = vld [vmem:[%s9890_s9 + $0x428] sm:$0xff] }
 0x40d   : > { %9949 = vst [vmem:[#allocation40_spill] sm:$0xff] %v7863_v14  ;;  %2134 = vperm.xlu1 %6923, %v1420_v22   ;;  %v1422_v22 = vld [vmem:[%s9890_s9 + $0x3a0] sm:$0xff]  ;;  %v1485_v14 = vld [vmem:[%s9890_s9 + $0x598] sm:$0xff] }
 0x40f   : > { %v7871_v62 = vpop.permute.xlu0 %1969 }
 0x410   : > { %2309 = vperm.xlu0 %6922, %v1455_v40   ;;  %v7873_v43 = vpop.permute.xlu1 %1754  ;;  %v1457_v40 = vld [vmem:[%s9890_s9 + $0x4b8] sm:$0xff] }
 0x411   : > { %9950 = vst [vmem:[#allocation41_spill] sm:$0xff] %v7873_v43  ;;  %2054 = vperm.xlu1 %6923, %v1404_v49   ;;  %v1406_v49 = vld [vmem:[%s9890_s9 + $0x320] sm:$0xff] }
 0x413   : > { %v7881_v59 = vpop.permute.xlu0 %1979 }
 0x414   : > { %2229 = vperm.xlu0 %6922, %v1439_v10   ;;  %v7883_v23 = vpop.permute.xlu1 %1764  ;;  %v1441_v10 = vld [vmem:[%s9890_s9 + $0x438] sm:$0xff] }
 0x415   : > { %9951 = vst [vmem:[#allocation42_spill] sm:$0xff] %v7883_v23  ;;  %2144 = vperm.xlu1 %6923, %v1422_v22   ;;  %v1424_v22 = vld [vmem:[%s9890_s9 + $0x3b0] sm:$0xff] }
 0x417   : > { %v7891_v32 = vpop.permute.xlu0 %1989 }
 0x418   : > { %9952 = vst [vmem:[#allocation43_spill] sm:$0xff] %v7891_v32  ;;  %2319 = vperm.xlu0 %6922, %v1457_v40   ;;  %v7893_v4 = vpop.permute.xlu1 %1774  ;;  %v1459_v40 = vld [vmem:[%s9890_s9 + $0x4c8] sm:$0xff] }
 0x419   : > { %9953 = vst [vmem:[#allocation44_spill] sm:$0xff] %v7893_v4  ;;  %2064 = vperm.xlu1 %6923, %v1406_v49   ;;  %v1408_v49 = vld [vmem:[%s9890_s9 + $0x330] sm:$0xff] }
 0x41b   : > { %v7901_v15 = vpop.permute.xlu0 %1999 }
 0x41c   : > { %9954 = vst [vmem:[#allocation45_spill] sm:$0xff] %v7901_v15  ;;  %2239 = vperm.xlu0 %6922, %v1441_v10   ;;  %v7903_v58 = vpop.permute.xlu1 %1784  ;;  %v1443_v10 = vld [vmem:[%s9890_s9 + $0x448] sm:$0xff] }
 0x41d   : > { %9955 = vst [vmem:[#allocation46_spill] sm:$0xff] %v7903_v58  ;;  %2154 = vperm.xlu1 %6923, %v1424_v22   ;;  %v1426_v22 = vld [vmem:[%s9890_s9 + $0x3c0] sm:$0xff] }
 0x41f   : > { %v7911_v60 = vpop.permute.xlu0 %2009 }
 0x420   : > { %9956 = vst [vmem:[#allocation47_spill] sm:$0xff] %v7911_v60  ;;  %2329 = vperm.xlu0 %6922, %v1459_v40   ;;  %v7913_v38 = vpop.permute.xlu1 %1794  ;;  %v1461_v40 = vld [vmem:[%s9890_s9 + $0x4d8] sm:$0xff] }
 0x421   : > { %9957 = vst [vmem:[#allocation48_spill] sm:$0xff] %v7913_v38  ;;  %2074 = vperm.xlu1 %6923, %v1408_v49   ;;  %v1410_v49 = vld [vmem:[%s9890_s9 + $0x340] sm:$0xff] }
 0x423   : > { %v7921_v44 = vpop.permute.xlu0 %1929 }
 0x424   : > { %2249 = vperm.xlu0 %6922, %v1443_v10   ;;  %v7923_v58 = vpop.permute.xlu1 %1804  ;;  %v1445_v10 = vld [vmem:[%s9890_s9 + $0x458] sm:$0xff] }
 0x425   : > { %9958 = vst [vmem:[#allocation49_spill] sm:$0xff] %v7923_v58  ;;  %2164 = vperm.xlu1 %6923, %v1426_v22   ;;  %v1428_v22 = vld [vmem:[%s9890_s9 + $0x3d0] sm:$0xff] }
 0x427   : > { %v7931_v38 = vpop.permute.xlu0 %2019 }
 0x428   : > { %9959 = vst [vmem:[#allocation50_spill] sm:$0xff] %v7931_v38  ;;  %2339 = vperm.xlu0 %6922, %v1461_v40   ;;  %v7933_v29 = vpop.permute.xlu1 %1814  ;;  %v1463_v40 = vld [vmem:[%s9890_s9 + $0x4e8] sm:$0xff] }
 0x429   : > { %9960 = vst [vmem:[#allocation51_spill] sm:$0xff] %v7933_v29  ;;  %2084 = vperm.xlu1 %6923, %v1410_v49   ;;  %v1412_v49 = vld [vmem:[%s9890_s9 + $0x350] sm:$0xff] }
 0x42b   : > { %v7941_v58 = vpop.permute.xlu0 %1939 }
 0x42c   : > { %2259 = vperm.xlu0 %6922, %v1445_v10   ;;  %v7943_v50 = vpop.permute.xlu1 %1824  ;;  %v1447_v10 = vld [vmem:[%s9890_s9 + $0x468] sm:$0xff] }
 0x42d   : > { %9961 = vst [vmem:[#allocation52_spill] sm:$0xff] %v7943_v50  ;;  %2174 = vperm.xlu1 %6923, %v1428_v22   ;;  %v1430_v22 = vld [vmem:[%s9890_s9 + $0x3e0] sm:$0xff] }
 0x42f   : > { %v7951_v29 = vpop.permute.xlu0 %2029 }
 0x430   : > { %9962 = vst [vmem:[#allocation53_spill] sm:$0xff] %v7951_v29  ;;  %2349 = vperm.xlu0 %6922, %v1463_v40   ;;  %v7953_v23 = vpop.permute.xlu1 %1834  ;;  %v1465_v40 = vld [vmem:[%s9890_s9 + $0x4f8] sm:$0xff] }
 0x431   : > { %9963 = vst [vmem:[#allocation54_spill] sm:$0xff] %v7953_v23  ;;  %2094 = vperm.xlu1 %6923, %v1412_v49   ;;  %v1414_v49 = vld [vmem:[%s9890_s9 + $0x360] sm:$0xff] }
 0x433   : > { %v7961_v50 = vpop.permute.xlu0 %1949 }
 0x434   : > { %2269 = vperm.xlu0 %6922, %v1447_v10   ;;  %v7963_v4 = vpop.permute.xlu1 %1844 }
 0x435   : > { %9964 = vst [vmem:[#allocation55_spill] sm:$0xff] %v7963_v4  ;;  %2184 = vperm.xlu1 %6923, %v1430_v22   ;;  %v1432_v22 = vld [vmem:[%s9890_s9 + $0x3f0] sm:$0xff] }
 0x437   : > { %v7976_v10 = vpop.permute.xlu0 %2039 }
 0x438   : > { %2359 = vperm.xlu0 %6922, %v1465_v40   ;;  %v7971_v23 = vpop.permute.xlu1 %1854  ;;  %9966 = vst [vmem:[#allocation57_spill] sm:$0xff] %v7976_v10  ;;  %v1483_v40 = vld [vmem:[%s9890_s9 + $0x588] sm:$0xff] }
 0x439   : > { %9965 = vst [vmem:[#allocation56_spill] sm:$0xff] %v7971_v23  ;;  %2104 = vperm.xlu1 %6923, %v1414_v49   ;;  %v1416_v49 = vld [vmem:[%s9890_s9 + $0x370] sm:$0xff] }
 0x43b   : > { %v7989_v23 = vpop.permute.xlu0 %1959 }
 0x43c   : > { %2279 = vperm.xlu0 %6922, %v1449_v41   ;;  %v7981_v4 = vpop.permute.xlu1 %1864  ;;  %v1467_v41 = vld [vmem:[%s9890_s9 + $0x508] sm:$0xff] }
 0x43d   : > { %9967 = vst [vmem:[#allocation58_spill] sm:$0xff] %v7981_v4  ;;  %2194 = vperm.xlu1 %6923, %v1432_v22   ;;  %v1450_v22 = vld [vmem:[%s9890_s9 + $0x480] sm:$0xff] }
 0x440   : > { %2449 = vperm.xlu0 %6922, %v1483_v40   ;;  %v7991_v24 = vpop.permute.xlu1 %1874  ;;  %v8004_v40 = vpop.permute.xlu0 %2129 }
 0x441   : > { %9968 = vst [vmem:[#allocation59_spill] sm:$0xff] %v7991_v24  ;;  %2114 = vperm.xlu1 %6923, %v1416_v49   ;;  %9969 = vst [vmem:[#allocation60_spill] sm:$0xff] %v8004_v40  ;;  %v1434_v49 = vld [vmem:[%s9890_s9 + $0x400] sm:$0xff] }
 0x444   : > { %2369 = vperm.xlu0 %6922, %v1467_v41   ;;  %v7999_v4 = vpop.permute.xlu1 %1884  ;;  %v1469_v41 = vld [vmem:[%s9890_s9 + $0x518] sm:$0xff]  ;;  %v8017_v43 = vpop.permute.xlu0 %2049 }
 0x445   : > { %2284 = vperm.xlu1 %6923, %v1450_v22   ;;  %v1452_v22 = vld [vmem:[%s9890_s9 + $0x490] sm:$0xff]  ;;  %9970 = vst [vmem:[#allocation61_spill] sm:$0xff] %v8017_v43  ;;  %v1471_v43 = vld [vmem:[%s9890_s9 + $0x528] sm:$0xff] }
 0x448   : > { %2459 = vperm.xlu0 %6922, %v1485_v14   ;;  %v8009_v24 = vpop.permute.xlu1 %1894  ;;  %v1487_v14 = vld [vmem:[%s9890_s9 + $0x5a8] sm:$0xff] }
 0x449   : > { %2204 = vperm.xlu1 %6923, %v1434_v49   ;;  %v1436_v49 = vld [vmem:[%s9890_s9 + $0x410] sm:$0xff] }
 0x44c   : > { %2379 = vperm.xlu0 %6922, %v1469_v41   ;;  %v8019_v40 = vpop.permute.xlu1 %1904  ;;  %v8032_v41 = vpop.permute.xlu0 %2139 }
 0x44d   : > { %2294 = vperm.xlu1 %6923, %v1452_v22   ;;  %9971 = vst [vmem:[#allocation62_spill] sm:$0xff] %v8032_v41  ;;  %v1454_v22 = vld [vmem:[%s9890_s9 + $0x4a0] sm:$0xff] }
 0x450   : > { %2469 = vperm.xlu0 %6922, %v1487_v14   ;;  %v8027_v11 = vpop.permute.xlu1 %1914  ;;  %v1489_v14 = vld [vmem:[%s9890_s9 + $0x5b8] sm:$0xff]  ;;  %v8045_v37 = vpop.permute.xlu0 %2059 }
 0x451   : > { %2214 = vperm.xlu1 %6923, %v1436_v49   ;;  %v1438_v49 = vld [vmem:[%s9890_s9 + $0x420] sm:$0xff]  ;;  %9972 = vst [vmem:[#allocation63_spill] sm:$0xff] %v8045_v37  ;;  %v1491_v37 = vld [vmem:[%s9890_s9 + $0x5c8] sm:$0xff] }
 0x454   : > { %2389 = vperm.xlu0 %6922, %v1471_v43   ;;  %v8037_v16 = vpop.permute.xlu1 %1964  ;;  %v1473_v43 = vld [vmem:[%s9890_s9 + $0x538] sm:$0xff] }
 0x455   : > { %2304 = vperm.xlu1 %6923, %v1454_v22   ;;  %v1456_v22 = vld [vmem:[%s9890_s9 + $0x4b0] sm:$0xff] }
 0x458   : > { %2479 = vperm.xlu0 %6922, %v1489_v14   ;;  %v8047_v41 = vpop.permute.xlu1 %1974  ;;  %v8060_v14 = vpop.permute.xlu0 %2149 }
 0x459   : > { %2224 = vperm.xlu1 %6923, %v1438_v49   ;;  %9974 = vst [vmem:[#allocation65_spill] sm:$0xff] %v8060_v14  ;;  %v1440_v49 = vld [vmem:[%s9890_s9 + $0x430] sm:$0xff] }
 0x45c   : > { %2399 = vperm.xlu0 %6922, %v1473_v43   ;;  %v8055_v3 = vpop.permute.xlu1 %1984  ;;  %v1475_v43 = vld [vmem:[%s9890_s9 + $0x548] sm:$0xff]  ;;  %v8073_v1 = vpop.permute.xlu0 %2069 }
 0x45d   : > { %9973 = vst [vmem:[#allocation64_spill] sm:$0xff] %v8055_v3  ;;  %2314 = vperm.xlu1 %6923, %v1456_v22   ;;  %v1458_v22 = vld [vmem:[%s9890_s9 + $0x4c0] sm:$0xff]  ;;  %9976 = vst [vmem:[#allocation67_spill] sm:$0xff] %v8073_v1  ;;  %v1477_v1 = vld [vmem:[%s9890_s9 + $0x558] sm:$0xff] }
 0x460   : > { %2489 = vperm.xlu0 %6922, %v1491_v37   ;;  %v8065_v29 = vpop.permute.xlu1 %1994  ;;  %v1493_v37 = vld [vmem:[%s9890_s9 + $0x5d8] sm:$0xff] }
 0x461   : > { %9975 = vst [vmem:[#allocation66_spill] sm:$0xff] %v8065_v29  ;;  %2234 = vperm.xlu1 %6923, %v1440_v49   ;;  %v1442_v49 = vld [vmem:[%s9890_s9 + $0x440] sm:$0xff] }
 0x464   : > { %2409 = vperm.xlu0 %6922, %v1475_v43   ;;  %v8075_v14 = vpop.permute.xlu1 %2004  ;;  %v8088_v43 = vpop.permute.xlu0 %2159 }
 0x465   : > { %9977 = vst [vmem:[#allocation68_spill] sm:$0xff] %v8075_v14  ;;  %2324 = vperm.xlu1 %6923, %v1458_v22   ;;  %9978 = vst [vmem:[#allocation69_spill] sm:$0xff] %v8088_v43  ;;  %v1460_v22 = vld [vmem:[%s9890_s9 + $0x4d0] sm:$0xff] }
 0x466   : > { %v1484_v14 = vld [vmem:[%s9890_s9 + $0x590] sm:$0xff] }
 0x468   : > { %2499 = vperm.xlu0 %6922, %v1493_v37   ;;  %v8083_v10 = vpop.permute.xlu1 %1924  ;;  %v1495_v37 = vld [vmem:[%s9890_s9 + $0x5e8] sm:$0xff]  ;;  %v8101_v8 = vpop.permute.xlu0 %2079 }
 0x469   : > { %2244 = vperm.xlu1 %6923, %v1442_v49   ;;  %v1444_v49 = vld [vmem:[%s9890_s9 + $0x450] sm:$0xff]  ;;  %9980 = vst [vmem:[#allocation71_spill] sm:$0xff] %v8101_v8  ;;  %v1497_v8 = vld [vmem:[%s9890_s9 + $0x5f8] sm:$0xff] }
 0x46c   : > { %2419 = vperm.xlu0 %6922, %v1477_v1   ;;  %v8093_v5 = vpop.permute.xlu1 %2014  ;;  %v1479_v1 = vld [vmem:[%s9890_s9 + $0x568] sm:$0xff] }
 0x46d   : > { %9979 = vst [vmem:[#allocation70_spill] sm:$0xff] %v8093_v5  ;;  %2334 = vperm.xlu1 %6923, %v1460_v22   ;;  %v1462_v22 = vld [vmem:[%s9890_s9 + $0x4e0] sm:$0xff] }
 0x470   : > { %2509 = vperm.xlu0 %6922, %v1495_v37   ;;  %v8103_v43 = vpop.permute.xlu1 %1934  ;;  %v8116_v37 = vpop.permute.xlu0 %2169 }
 0x471   : > { %2254 = vperm.xlu1 %6923, %v1444_v49   ;;  %9982 = vst [vmem:[#allocation73_spill] sm:$0xff] %v8116_v37  ;;  %v1446_v49 = vld [vmem:[%s9890_s9 + $0x460] sm:$0xff] }
 0x474   : > { %2429 = vperm.xlu0 %6922, %v1479_v1   ;;  %v8111_v20 = vpop.permute.xlu1 %2024  ;;  %v1481_v1 = vld [vmem:[%s9890_s9 + $0x578] sm:$0xff] }
 0x475   : > { %9981 = vst [vmem:[#allocation72_spill] sm:$0xff] %v8111_v20  ;;  %2344 = vperm.xlu1 %6923, %v1462_v22   ;;  %v1464_v22 = vld [vmem:[%s9890_s9 + $0x4f0] sm:$0xff]  ;;  %v8129_v20 = vpop.permute.xlu0 %2089 }
 0x476   : > { %9983 = vst [vmem:[#allocation74_spill] sm:$0xff] %v8129_v20  ;;  %v1517_v20 = vld [vmem:[%s9890_s9 + $0x698] sm:$0xff] }
 0x478   : > { %2519 = vperm.xlu0 %6922, %v1497_v8   ;;  %v8121_v60 = vpop.permute.xlu1 %1944  ;;  %v1515_v8 = vld [vmem:[%s9890_s9 + $0x688] sm:$0xff] }
 0x479   : > { %2264 = vperm.xlu1 %6923, %v1446_v49   ;;  %v1448_v49 = vld [vmem:[%s9890_s9 + $0x470] sm:$0xff]  ;;  %v8142_v38 = vpop.permute.xlu0 %2179 }
 0x47a   : > { %9985 = vst [vmem:[#allocation76_spill] sm:$0xff] %v8142_v38 }
 0x47c   : > { %2439 = vperm.xlu0 %6922, %v1481_v1   ;;  %v8131_v37 = vpop.permute.xlu1 %2034  ;;  %v1482_v1 = vld [vmem:[%s9890_s9 + $0x580] sm:$0xff] }
 0x47d   : > { %2354 = vperm.xlu1 %6923, %v1464_v22   ;;  %9984 = vst [vmem:[#allocation75_spill] sm:$0xff] %v8131_v37  ;;  %v8158_v37 = vpop.permute.xlu0 %2099 }
 0x47e   : > { %9986 = vst [vmem:[#allocation77_spill] sm:$0xff] %v8158_v37 }
 0x480   : > { %2609 = vperm.xlu0 %6922, %v1515_v8   ;;  %v8147_v22 = vpop.permute.xlu1 %1954  ;;  %v928_v8 = vld [vmem:[%s9885_s4] sm:$0xf] }
 0x481   : > { %2274 = vperm.xlu1 %6923, %v1448_v49   ;;  %v1466_v49 = vld [vmem:[%s9890_s9 + $0x500] sm:$0xff] }
 0x484   : > { %2529 = vperm.xlu0 %6922, %v1499_v53   ;;  %v8161_v53 = vpop.permute.xlu1 %2124 }
 0x485   : > { %2444 = vperm.xlu1 %6923, %v1482_v1   ;;  %9987 = vst [vmem:[#allocation78_spill] sm:$0xff] %v8161_v53  ;;  %v1501_v1 = vld [vmem:[%s9890_s9 + $0x618] sm:$0xff] }
 0x486   : > { %v1521_v53 = vld [vmem:[%s9890_s9 + $0x6b8] sm:$0xff] }
 0x487   : > { %v924_v38 = vpop.f32.mrb[2].mxu0 }
 0x488   : > { %v6574_v61 = vpop.f32.mrb[3].mxu0  ;;  %6576 = vmatpush3.msk.msra.mxu1 %vm542_vm1, %v924_v38  ;;  %2619 = vperm.xlu0 %6922, %v1517_v20   ;;  %v8173_v38 = vpop.permute.xlu0 %2189  ;;  %v1468_v20 = vld [vmem:[%s9890_s9 + $0x510] sm:$0xff] }
 0x489   : > { %6578 = vmatmul.mubr.msk.f32.vlgmr.msra.gmra.mrb[6].mxu1 %vm535_vm0, %v928_v8  ;;  %2364 = vperm.xlu1 %6923, %v1466_v49   ;;  %v1519_v61 = vld [vmem:[%s9890_s9 + $0x6a8] sm:$0xff]  ;;  %9988 = vst [vmem:[#allocation79_spill] sm:$0xff] %v8173_v38  ;;  %v8178_v8 = vpop.permute.xlu1 %2044 }
 0x48a   : > { %9989 = vst [vmem:[#allocation80_spill] sm:$0xff] %v8178_v8  ;;  %v1503_v49 = vld [vmem:[%s9890_s9 + $0x628] sm:$0xff] }
 0x48c   : > { %2539 = vperm.xlu0 %6922, %v1501_v1   ;;  %v8186_v1 = vpop.permute.xlu0 %2109 }
 0x48d   : > { %2454 = vperm.xlu1 %6923, %v1484_v14   ;;  %v1486_v14 = vld [vmem:[%s9890_s9 + $0x5a0] sm:$0xff]  ;;  %9990 = vst [vmem:[#allocation81_spill] sm:$0xff] %v8186_v1  ;;  %v8188_v38 = vpop.permute.xlu1 %2134  ;;  %v1507_v1 = vld [vmem:[%s9890_s9 + $0x648] sm:$0xff] }
 0x48e   : > { %9991 = vst [vmem:[#allocation82_spill] sm:$0xff] %v8188_v38  ;;  %v1523_v38 = vld [vmem:[%s9890_s9 + $0x6c8] sm:$0xff] }
 0x490   : > { %2629 = vperm.xlu0 %6922, %v1519_v61   ;;  %v1470_v61 = vld [vmem:[%s9890_s9 + $0x520] sm:$0xff]  ;;  %v8199_v37 = vpop.permute.xlu0 %2199 }
 0x491   : > { %2374 = vperm.xlu1 %6923, %v1468_v20   ;;  %v1505_v20 = vld [vmem:[%s9890_s9 + $0x638] sm:$0xff]  ;;  %9992 = vst [vmem:[#allocation83_spill] sm:$0xff] %v8199_v37 }
 0x494   : > { %2549 = vperm.xlu0 %6922, %v1503_v49   ;;  %v1488_v49 = vld [vmem:[%s9890_s9 + $0x5b0] sm:$0xff] }
 0x495   : > { %2464 = vperm.xlu1 %6923, %v1486_v14   ;;  %v8204_v14 = vpop.permute.xlu1 %2054 }
 0x496   : > { %9993 = vst [vmem:[#allocation84_spill] sm:$0xff] %v8204_v14 }
 0x498   : > { %2639 = vperm.xlu0 %6922, %v1521_v53   ;;  %v1472_v53 = vld [vmem:[%s9890_s9 + $0x530] sm:$0xff] }
 0x499   : > { %2384 = vperm.xlu1 %6923, %v1470_v61   ;;  %v8212_v61 = vpop.permute.xlu0 %2119  ;;  %v8214_v37 = vpop.permute.xlu1 %2144 }
 0x49a   : > { %9994 = vst [vmem:[#allocation85_spill] sm:$0xff] %v8212_v61  ;;  %9995 = vst [vmem:[#allocation86_spill] sm:$0xff] %v8214_v37  ;;  %v1509_v37 = vld [vmem:[%s9890_s9 + $0x658] sm:$0xff]  ;;  %v1527_v61 = vld [vmem:[%s9890_s9 + $0x6e8] sm:$0xff] }
 0x49c   : > { %2559 = vperm.xlu0 %6922, %v1505_v20   ;;  %v1490_v20 = vld [vmem:[%s9890_s9 + $0x5c0] sm:$0xff] }
 0x49d   : > { %2474 = vperm.xlu1 %6923, %v1488_v49   ;;  %v1525_v49 = vld [vmem:[%s9890_s9 + $0x6d8] sm:$0xff]  ;;  %v8225_v8 = vpop.permute.xlu0 %2289 }
 0x49e   : > { %9996 = vst [vmem:[#allocation87_spill] sm:$0xff] %v8225_v8 }
 0x4a0   : > { %2649 = vperm.xlu0 %6922, %v1523_v38   ;;  %v1474_v38 = vld [vmem:[%s9890_s9 + $0x540] sm:$0xff] }
 0x4a1   : > { %2394 = vperm.xlu1 %6923, %v1472_v53   ;;  %v8230_v53 = vpop.permute.xlu1 %2064 }
 0x4a2   : > { %9997 = vst [vmem:[#allocation88_spill] sm:$0xff] %v8230_v53 }
 0x4a4   : > { %2569 = vperm.xlu0 %6922, %v1507_v1   ;;  %v1492_v1 = vld [vmem:[%s9890_s9 + $0x5d0] sm:$0xff] }
 0x4a5   : > { %2484 = vperm.xlu1 %6923, %v1490_v20   ;;  %v8238_v20 = vpop.permute.xlu0 %2209  ;;  %v8240_v8 = vpop.permute.xlu1 %2154 }
 0x4a6   : > { %9998 = vst [vmem:[#allocation89_spill] sm:$0xff] %v8238_v20  ;;  %9999 = vst [vmem:[#allocation90_spill] sm:$0xff] %v8240_v8  ;;  %v1529_v20 = vld [vmem:[%s9890_s9 + $0x6f8] sm:$0xff] }
 0x4a7   : > { %v1513_v8 = vld [vmem:[%s9890_s9 + $0x678] sm:$0xff] }
 0x4a8   : > { %2659 = vperm.xlu0 %6922, %v1525_v49   ;;  %v1476_v49 = vld [vmem:[%s9890_s9 + $0x550] sm:$0xff] }
 0x4a9   : > { %2404 = vperm.xlu1 %6923, %v1474_v38   ;;  %v1511_v38 = vld [vmem:[%s9890_s9 + $0x668] sm:$0xff]  ;;  %v8251_v53 = vpop.permute.xlu0 %2299 }
 0x4aa   : > { %10000 = vst [vmem:[#allocation91_spill] sm:$0xff] %v8251_v53 }
 0x4ac   : > { %2579 = vperm.xlu0 %6922, %v1509_v37   ;;  %v1494_v37 = vld [vmem:[%s9890_s9 + $0x5e0] sm:$0xff] }
 0x4ad   : > { %2494 = vperm.xlu1 %6923, %v1492_v1   ;;  %v8256_v1 = vpop.permute.xlu1 %2074 }
 0x4ae   : > { %10001 = vst [vmem:[#allocation92_spill] sm:$0xff] %v8256_v1 }
 0x4b0   : > { %2669 = vperm.xlu0 %6922, %v1527_v61   ;;  %v1478_v61 = vld [vmem:[%s9890_s9 + $0x560] sm:$0xff] }
 0x4b1   : > { %2414 = vperm.xlu1 %6923, %v1476_v49   ;;  %v8264_v49 = vpop.permute.xlu0 %2219  ;;  %v8266_v53 = vpop.permute.xlu1 %2164 }
 0x4b2   : > { %10002 = vst [vmem:[#allocation93_spill] sm:$0xff] %v8264_v49  ;;  %10003 = vst [vmem:[#allocation94_spill] sm:$0xff] %v8266_v53  ;;  %v1531_v49 = vld [vmem:[%s9890_s9 + $0x708] sm:$0xff]  ;;  %v1549_v53 = vld [vmem:[%s9890_s9 + $0x798] sm:$0xff] }
 0x4b4   : > { %2589 = vperm.xlu0 %6922, %v1511_v38   ;;  %v1496_v38 = vld [vmem:[%s9890_s9 + $0x5f0] sm:$0xff] }
 0x4b5   : > { %2504 = vperm.xlu1 %6923, %v1494_v37   ;;  %v1547_v37 = vld [vmem:[%s9890_s9 + $0x788] sm:$0xff]  ;;  %v8277_v1 = vpop.permute.xlu0 %2309 }
 0x4b6   : > { %10004 = vst [vmem:[#allocation95_spill] sm:$0xff] %v8277_v1 }
 0x4b8   : > { %2679 = vperm.xlu0 %6922, %v1529_v20   ;;  %v1480_v20 = vld [vmem:[%s9890_s9 + $0x570] sm:$0xff] }
 0x4b9   : > { %2424 = vperm.xlu1 %6923, %v1478_v61   ;;  %v8282_v61 = vpop.permute.xlu1 %2084 }
 0x4ba   : > { %10005 = vst [vmem:[#allocation96_spill] sm:$0xff] %v8282_v61 }
 0x4bc   : > { %2599 = vperm.xlu0 %6922, %v1513_v8   ;;  %v1514_v8 = vld [vmem:[%s9890_s9 + $0x680] sm:$0xff] }
 0x4bd   : > { %2514 = vperm.xlu1 %6923, %v1496_v38   ;;  %v8290_v38 = vpop.permute.xlu0 %2229  ;;  %v8292_v1 = vpop.permute.xlu1 %2174 }
 0x4be   : > { %10006 = vst [vmem:[#allocation97_spill] sm:$0xff] %v8290_v38  ;;  %10007 = vst [vmem:[#allocation98_spill] sm:$0xff] %v8292_v1  ;;  %v1551_v38 = vld [vmem:[%s9890_s9 + $0x7a8] sm:$0xff] }
 0x4bf   : > { %v1535_v1 = vld [vmem:[%s9890_s9 + $0x728] sm:$0xff] }
 0x4c0   : > { %2769 = vperm.xlu0 %6922, %v1547_v37   ;;  %v1498_v37 = vld [vmem:[%s9890_s9 + $0x600] sm:$0xff] }
 0x4c1   : > { %2434 = vperm.xlu1 %6923, %v1480_v20   ;;  %v1533_v20 = vld [vmem:[%s9890_s9 + $0x718] sm:$0xff]  ;;  %v8303_v61 = vpop.permute.xlu0 %2319 }
 0x4c2   : > { %10008 = vst [vmem:[#allocation99_spill] sm:$0xff] %v8303_v61 }
 0x4c4   : > { %2689 = vperm.xlu0 %6922, %v1531_v49   ;;  %v1516_v49 = vld [vmem:[%s9890_s9 + $0x690] sm:$0xff] }
 0x4c5   : > { %2604 = vperm.xlu1 %6923, %v1514_v8   ;;  %v8308_v8 = vpop.permute.xlu1 %2094 }
 0x4c6   : > { %10009 = vst [vmem:[#allocation100_spill] sm:$0xff] %v8308_v8 }
 0x4c8   : > { %2779 = vperm.xlu0 %6922, %v1549_v53   ;;  %v1500_v53 = vld [vmem:[%s9890_s9 + $0x610] sm:$0xff] }
 0x4c9   : > { %2524 = vperm.xlu1 %6923, %v1498_v37   ;;  %v8316_v37 = vpop.permute.xlu0 %2239  ;;  %v8318_v61 = vpop.permute.xlu1 %2184 }
 0x4ca   : > { %10010 = vst [vmem:[#allocation101_spill] sm:$0xff] %v8316_v37  ;;  %10011 = vst [vmem:[#allocation102_spill] sm:$0xff] %v8318_v61  ;;  %v1537_v37 = vld [vmem:[%s9890_s9 + $0x738] sm:$0xff]  ;;  %v1555_v61 = vld [vmem:[%s9890_s9 + $0x7c8] sm:$0xff] }
 0x4cc   : > { %2699 = vperm.xlu0 %6922, %v1533_v20   ;;  %v1518_v20 = vld [vmem:[%s9890_s9 + $0x6a0] sm:$0xff] }
 0x4cd   : > { %2614 = vperm.xlu1 %6923, %v1516_v49   ;;  %v1553_v49 = vld [vmem:[%s9890_s9 + $0x7b8] sm:$0xff]  ;;  %v8329_v8 = vpop.permute.xlu0 %2329 }
 0x4ce   : > { %10012 = vst [vmem:[#allocation103_spill] sm:$0xff] %v8329_v8 }
 0x4d0   : > { %2789 = vperm.xlu0 %6922, %v1551_v38   ;;  %v1502_v38 = vld [vmem:[%s9890_s9 + $0x620] sm:$0xff] }
 0x4d1   : > { %2534 = vperm.xlu1 %6923, %v1500_v53   ;;  %v8334_v53 = vpop.permute.xlu1 %2104 }
 0x4d2   : > { %10013 = vst [vmem:[#allocation104_spill] sm:$0xff] %v8334_v53 }
 0x4d4   : > { %2709 = vperm.xlu0 %6922, %v1535_v1   ;;  %v1520_v1 = vld [vmem:[%s9890_s9 + $0x6b0] sm:$0xff] }
 0x4d5   : > { %2624 = vperm.xlu1 %6923, %v1518_v20   ;;  %v8342_v20 = vpop.permute.xlu0 %2249  ;;  %v8344_v8 = vpop.permute.xlu1 %2194 }
 0x4d6   : > { %10014 = vst [vmem:[#allocation105_spill] sm:$0xff] %v8342_v20  ;;  %10015 = vst [vmem:[#allocation106_spill] sm:$0xff] %v8344_v8  ;;  %v1557_v20 = vld [vmem:[%s9890_s9 + $0x7d8] sm:$0xff] }
 0x4d7   : > { %v1541_v8 = vld [vmem:[%s9890_s9 + $0x758] sm:$0xff] }
 0x4d8   : > { %2799 = vperm.xlu0 %6922, %v1553_v49   ;;  %v1504_v49 = vld [vmem:[%s9890_s9 + $0x630] sm:$0xff] }
 0x4d9   : > { %2544 = vperm.xlu1 %6923, %v1502_v38   ;;  %v1539_v38 = vld [vmem:[%s9890_s9 + $0x748] sm:$0xff]  ;;  %v8355_v53 = vpop.permute.xlu0 %2339 }
 0x4da   : > { %10016 = vst [vmem:[#allocation107_spill] sm:$0xff] %v8355_v53 }
 0x4dc   : > { %2719 = vperm.xlu0 %6922, %v1537_v37   ;;  %v1522_v37 = vld [vmem:[%s9890_s9 + $0x6c0] sm:$0xff] }
 0x4dd   : > { %2634 = vperm.xlu1 %6923, %v1520_v1   ;;  %v8360_v1 = vpop.permute.xlu1 %2114 }
 0x4de   : > { %10017 = vst [vmem:[#allocation108_spill] sm:$0xff] %v8360_v1 }
 0x4e0   : > { %2809 = vperm.xlu0 %6922, %v1555_v61   ;;  %v1506_v61 = vld [vmem:[%s9890_s9 + $0x640] sm:$0xff] }
 0x4e1   : > { %2554 = vperm.xlu1 %6923, %v1504_v49   ;;  %v8368_v49 = vpop.permute.xlu0 %2259  ;;  %v8370_v53 = vpop.permute.xlu1 %2284 }
 0x4e2   : > { %10018 = vst [vmem:[#allocation109_spill] sm:$0xff] %v8368_v49  ;;  %10019 = vst [vmem:[#allocation110_spill] sm:$0xff] %v8370_v53  ;;  %v1543_v53 = vld [vmem:[%s9890_s9 + $0x768] sm:$0xff]  ;;  %v1561_v49 = vld [vmem:[%s9890_s9 + $0x7f8] sm:$0xff] }
 0x4e4   : > { %2729 = vperm.xlu0 %6922, %v1539_v38   ;;  %v1524_v38 = vld [vmem:[%s9890_s9 + $0x6d0] sm:$0xff] }
 0x4e5   : > { %2644 = vperm.xlu1 %6923, %v1522_v37   ;;  %v1559_v37 = vld [vmem:[%s9890_s9 + $0x7e8] sm:$0xff]  ;;  %v8381_v1 = vpop.permute.xlu0 %2349 }
 0x4e6   : > { %10020 = vst [vmem:[#allocation111_spill] sm:$0xff] %v8381_v1 }
 0x4e8   : > { %2819 = vperm.xlu0 %6922, %v1557_v20   ;;  %v1508_v20 = vld [vmem:[%s9890_s9 + $0x650] sm:$0xff] }
 0x4e9   : > { %2564 = vperm.xlu1 %6923, %v1506_v61   ;;  %v8386_v61 = vpop.permute.xlu1 %2204 }
 0x4ea   : > { %10021 = vst [vmem:[#allocation112_spill] sm:$0xff] %v8386_v61 }
 0x4ec   : > { %2739 = vperm.xlu0 %6922, %v1541_v8   ;;  %v1526_v8 = vld [vmem:[%s9890_s9 + $0x6e0] sm:$0xff] }
 0x4ed   : > { %2654 = vperm.xlu1 %6923, %v1524_v38   ;;  %v8394_v38 = vpop.permute.xlu0 %2269  ;;  %v8396_v1 = vpop.permute.xlu1 %2294 }
 0x4ee   : > { %10022 = vst [vmem:[#allocation113_spill] sm:$0xff] %v8394_v38  ;;  %10023 = vst [vmem:[#allocation114_spill] sm:$0xff] %v8396_v1  ;;  %v5730_v1 = vld [vmem:[%s9893_s12] sm:$0xf] }
 0x4ef   : > { %v1546_v38 = vld [vmem:[%s9890_s9 + $0x780] sm:$0xff] }
 0x4f0   : > { %2829 = vperm.xlu0 %6922, %v1559_v37   ;;  %v1510_v37 = vld [vmem:[%s9890_s9 + $0x660] sm:$0xff] }
 0x4f1   : > { %2574 = vperm.xlu1 %6923, %v1508_v20   ;;  %v1545_v20 = vld [vmem:[%s9890_s9 + $0x778] sm:$0xff]  ;;  %v8407_v61 = vpop.permute.xlu0 %2359 }
 0x4f2   : > { %10024 = vst [vmem:[#allocation115_spill] sm:$0xff] %v8407_v61 }
 0x4f4   : > { %2749 = vperm.xlu0 %6922, %v1543_v53   ;;  %v1528_v53 = vld [vmem:[%s9890_s9 + $0x6f0] sm:$0xff] }
 0x4f5   : > { %2664 = vperm.xlu1 %6923, %v1526_v8   ;;  %v8412_v8 = vpop.permute.xlu1 %2214 }
 0x4f6   : > { %10025 = vst [vmem:[#allocation116_spill] sm:$0xff] %v8412_v8 }
 0x4f8   : > { %2839 = vperm.xlu0 %6922, %v1561_v49   ;;  %v1512_v49 = vld [vmem:[%s9890_s9 + $0x670] sm:$0xff] }
 0x4f9   : > { %2584 = vperm.xlu1 %6923, %v1510_v37   ;;  %v8420_v37 = vpop.permute.xlu0 %2279  ;;  %v8422_v61 = vpop.permute.xlu1 %2304 }
 0x4fa   : > { %10026 = vst [vmem:[#allocation117_spill] sm:$0xff] %v8420_v37  ;;  %10027 = vst [vmem:[#allocation118_spill] sm:$0xff] %v8422_v61  ;;  %v1548_v37 = vld [vmem:[%s9890_s9 + $0x790] sm:$0xff] }
 0x4fc   : > { %2759 = vperm.xlu0 %6922, %v1545_v20   ;;  %v1530_v20 = vld [vmem:[%s9890_s9 + $0x700] sm:$0xff] }
 0x4fd   : > { %2674 = vperm.xlu1 %6923, %v1528_v53   ;;  %v8430_v53 = vpop.permute.xlu1 %2224 }
 0x4fe   : > { %10028 = vst [vmem:[#allocation119_spill] sm:$0xff] %v8430_v53 }
 0x500   : > { %5755 = vperm.xlu0 %6922, %v5730_v1  }
 0x501   : > { %2594 = vperm.xlu1 %6923, %v1512_v49   ;;  %v8435_v1 = vpop.permute.xlu1 %2314  ;;  %v1532_v49 = vld [vmem:[%s9890_s9 + $0x710] sm:$0xff] }
 0x502   : > { %10029 = vst [vmem:[#allocation120_spill] sm:$0xff] %v8435_v1  ;;  %v1552_v1 = vld [vmem:[%s9890_s9 + $0x7b0] sm:$0xff] }
 0x505   : > { %2764 = vperm.xlu1 %6923, %v1546_v38   ;;  %v1550_v38 = vld [vmem:[%s9890_s9 + $0x7a0] sm:$0xff]  ;;  %v8443_v61 = vpop.permute.xlu1 %2234 }
 0x506   : > { %10030 = vst [vmem:[#allocation121_spill] sm:$0xff] %v8443_v61 }
 0x509   : > { %2684 = vperm.xlu1 %6923, %v1530_v20   ;;  %v1534_v20 = vld [vmem:[%s9890_s9 + $0x720] sm:$0xff]  ;;  %v8448_v53 = vpop.permute.xlu1 %2324 }
 0x50a   : > { %10031 = vst [vmem:[#allocation122_spill] sm:$0xff] %v8448_v53  ;;  %v1554_v53 = vld [vmem:[%s9890_s9 + $0x7c0] sm:$0xff] }
 0x50d   : > { %2774 = vperm.xlu1 %6923, %v1548_v37   ;;  %v6924_v37 = vld [vmem:[%s9889_s8] sm:$0xff]  }
 0x50e   : > { %6582 = vmatprep.mubr.msk.bf16.mxu0 %vm535_vm0, %v6924_v37  ;;  %v1538_v37 = vld [vmem:[%s9890_s9 + $0x740] sm:$0xff] }
 0x511   : > { %2694 = vperm.xlu1 %6923, %v1532_v49   ;;  %v6925_v49 = vld [vmem:[%s9889_s8 + $0x100] sm:$0xff]  }
 0x512   : > { %6646 = vmatprep.mubr.msk.bf16.mxu1 %vm535_vm0, %v6925_v49 }
 0x515   : > { %2784 = vperm.xlu1 %6923, %v1550_v38   ;;  %v1536_v38 = vld [vmem:[%s9890_s9 + $0x730] sm:$0xff] }
 0x519   : > { %2704 = vperm.xlu1 %6923, %v1534_v20   ;;  %v8464_v20 = vpop.permute.xlu1 %2244 }
 0x51a   : > { %10032 = vst [vmem:[#allocation123_spill] sm:$0xff] %v8464_v20 }
 0x51d   : > { %2794 = vperm.xlu1 %6923, %v1552_v1   ;;  %v8469_v61 = vpop.permute.xlu1 %2334  ;;  %v1556_v1 = vld [vmem:[%s9890_s9 + $0x7d0] sm:$0xff] }
 0x51e   : > { %10033 = vst [vmem:[#allocation124_spill] sm:$0xff] %v8469_v61 }
 0x521   : > { %2714 = vperm.xlu1 %6923, %v1536_v38   ;;  %v8477_v49 = vpop.permute.xlu1 %2254  ;;  %v1540_v38 = vld [vmem:[%s9890_s9 + $0x750] sm:$0xff] }
 0x522   : > { %10034 = vst [vmem:[#allocation125_spill] sm:$0xff] %v8477_v49 }
 0x525   : > { %2804 = vperm.xlu1 %6923, %v1554_v53   ;;  %v8482_v20 = vpop.permute.xlu1 %2344  ;;  %v1558_v53 = vld [vmem:[%s9890_s9 + $0x7e0] sm:$0xff] }
 0x526   : > { %10035 = vst [vmem:[#allocation126_spill] sm:$0xff] %v8482_v20 }
 0x529   : > { %2724 = vperm.xlu1 %6923, %v1538_v37   ;;  %v1542_v37 = vld [vmem:[%s9890_s9 + $0x760] sm:$0xff]  ;;  %v8490_v61 = vpop.permute.xlu1 %2264 }
 0x52a   : > { %10036 = vst [vmem:[#allocation127_spill] sm:$0xff] %v8490_v61 }
 0x52d   : > { %2814 = vperm.xlu1 %6923, %v1556_v1   ;;  %v1560_v1 = vld [vmem:[%s9890_s9 + $0x7f0] sm:$0xff]  ;;  %v8495_v49 = vpop.permute.xlu1 %2354 }
 0x52e   : > { %10037 = vst [vmem:[#allocation128_spill] sm:$0xff] %v8495_v49 }
 0x531   : > { %2734 = vperm.xlu1 %6923, %v1540_v38   ;;  %v1544_v38 = vld [vmem:[%s9890_s9 + $0x770] sm:$0xff]  ;;  %v8503_v20 = vpop.permute.xlu1 %2274 }
 0x532   : > { %10038 = vst [vmem:[#allocation129_spill] sm:$0xff] %v8503_v20 }
 0x535   : > { %2824 = vperm.xlu1 %6923, %v1558_v53   ;;  %v5315_v53 = vld [vmem:[%s9892_s11] sm:$0xf]  ;;  %v8508_v61 = vpop.permute.xlu1 %2444 }
 0x536   : > { %10039 = vst [vmem:[#allocation130_spill] sm:$0xff] %v8508_v61 }
 0x539   : > { %2744 = vperm.xlu1 %6923, %v1542_v37   ;;  %v5731_v37 = vld [vmem:[%s9894_s13] sm:$0xf] }
 0x53d   : > { %2834 = vperm.xlu1 %6923, %v1560_v1  }
 0x541   : > { %2754 = vperm.xlu1 %6923, %v1544_v38  }
 0x545   : > { %5318 = vperm.xlu1 %6923, %v5315_v53  }
 0x549   : > { %5761 = vperm.xlu1 %6923, %v5731_v37  }
 0x55c   : > { %v1007_v1 = vpop.f32.mrb[6].mxu1 }
 0x55d   : > { %v1008_v49 = vadd.f32 %v1007_v1, %v7597_v36  ;;  %v6579_v8 = vpop.f32.mrb[7].mxu1 }
 0x55f   : > { %v1011_v38 = vadd.f32 %v1008_v49, %v7305_v6 }
 0x561   : > { %v1015_v14 = vsel %vm1014_vm5, %v1011_v38, 0.0 }
 0x562   : > { %v1016_v34 = vrot.slane %v1015_v14, 4 }
 0x564   : > { %v1017_v5 = vadd.f32 %v1016_v34, %v1015_v14  ;;  %v6933_v14 = vld [vmem:[%s9889_s8 + $0x120] sm:$0xff]  }
 0x566   : > { %v1018_v20 = vrot.slane %v1017_v5, 2 }
 0x568   : > { %v1019_v53 = vadd.f32 %v1018_v20, %v1017_v5  ;;  %v6935_v20 = vld [vmem:[%s9889_s8 + $0x128] sm:$0xff]  }
 0x56a   : > { %v1020_v48 = vrot.slane %v1019_v53, 1 }
 0x56c   : > { %v1021_v32 = vadd.f32 %v1020_v48, %v1019_v53  ;;  %v6937_v53 = vld [vmem:[%s9889_s8 + $0x130] sm:$0xff]  }
 0x56e   : > { %v1023_v42 = vmul.f32 0.25, %v1021_v32  ;;  %v6931_v32 = vld [vmem:[%s9889_s8 + $0x118] sm:$0xff]  }
 0x570   : > { %v1024_v15 = vsub.f32 %v1011_v38, %v1023_v42  ;;  %v6936_v38 = vld [vmem:[%s9889_s8 + $0x30] sm:$0xff]  }
 0x572   : > { %v1025_v51 = vmul.f32 %v1024_v15, %v1024_v15 }
 0x574   : > { %v1026_v37 = vsel %vm1014_vm5, %v1025_v51, 0.0 }
 0x575   : > { %v1027_v61 = vrot.slane %v1026_v37, 4 }
 0x577   : > { %v1028_v3 = vadd.f32 %v1027_v61, %v1026_v37  ;;  %v6934_v61 = vld [vmem:[%s9889_s8 + $0x28] sm:$0xff]   ;;  %v6938_v37 = vld [vmem:[%s9889_s8 + $0x38] sm:$0xff]  }
 0x579   : > { %v1029_v36 = vrot.slane %v1028_v3, 2 }
 0x57b   : > { %v1030_v8 = vadd.f32 %v1029_v36, %v1028_v3  ;;  %v6932_v3 = vld [vmem:[%s9889_s8 + $0x20] sm:$0xff]   ;;  %v6939_v36 = vld [vmem:[%s9889_s8 + $0x138] sm:$0xff]  }
 0x57d   : > { %v1031_v1 = vrot.slane %v1030_v8, 1 }
 0x57f   : > { %v1032_v19 = vadd.f32 %v1031_v1, %v1030_v8  ;;  %v6940_v8 = vld [vmem:[%s9889_s8 + $0x40] sm:$0xff]  }
 0x580   : > { %v6941_v1 = vld [vmem:[%s9889_s8 + $0x140] sm:$0xff]  }
 0x581   : > { %v1033_v6 = vmul.f32 0.25, %v1032_v19  ;;  %v6926_v19 = vld [vmem:[%s9889_s8 + $0x8] sm:$0xff]  }
 0x583   : > { %v1034_v49 = vadd.f32 1e-05, %v1033_v6  ;;  %v6942_v6 = vld [vmem:[%s9889_s8 + $0x48] sm:$0xff]  }
 0x585   : > { %7080 = vrsqrt.f32 %v1034_v49  ;;  %v6943_v49 = vld [vmem:[%s9889_s8 + $0x148] sm:$0xff]  }
 0x58f   : > { %v7081_v29 = vpop.eup %7080 }
 0x590   : > { %v1036_v34 = vmul.f32 %v7081_v29, %v1024_v15  ;;  %v6927_v29 = vld [vmem:[%s9889_s8 + $0x108] sm:$0xff]   ;;  %v6930_v15 = vld [vmem:[%s9889_s8 + $0x18] sm:$0xff]  }
 0x592   : > { %v1042_v5 = vmul.f32 %v7609_v46, %v1036_v34  ;;  %v6928_v46 = vld [vmem:[%s9889_s8 + $0x10] sm:$0xff]  }
 0x593   : > { %v6944_v34 = vld [vmem:[%s9889_s8 + $0x50] sm:$0xff]  }
 0x594   : > { %v8516_v48 = vadd.f32 %v7619_v56, %v1042_v5  ;;  %v6929_v56 = vld [vmem:[%s9889_s8 + $0x110] sm:$0xff]  }
 0x595   : > { %v6945_v5 = vld [vmem:[%s9889_s8 + $0x150] sm:$0xff]  }
 0x596   : > { %10040 = vst [vmem:[#allocation131_spill] sm:$0xff] %v8516_v48  ;;  %v1305_v42 = vpack.c.bf16 %v8516_v48, %v8516_v48 }
 0x598   : > { %6876 = vmatprep.subr.msk.bf16.mxu0 %vm3866_vm6, %v1305_v42  ;;  %6877 = vmatprep.subr.msk.bf16.mxu1 %vm3866_vm6, %v1305_v42  ;;  %v3868_v51 = vsel %vm3866_vm6, %v1305_v42, 0  ;;  %v6946_v42 = vld [vmem:[%s9889_s8 + $0x58] sm:$0xff]  }
 0x599   : > { %6581 = vmatpush3.bf16.msra.mxu0 %v3868_v51  ;;  %6875 = vmatpush3.bf16.msra.mxu1 %v3868_v51  ;;  %v6947_v51 = vld [vmem:[%s9889_s8 + $0x158] sm:$0xff]  }
 0x59c   : > { %6583 = vmatmul.mubr.msk.bf16.vlgmr.msra.gmra.mrb[4].mxu0 %vm535_vm0, %v6926_v19  ;;  %6647 = vmatmul.mubr.msk.bf16.vlgmr.msra.gmra.mrb[8].mxu1 %vm535_vm0, %v6927_v29  ;;  %v6948_v19 = vld [vmem:[%s9889_s8 + $0x60] sm:$0xff]  }
 0x59d   : > { %6586 = vmatprep.mubr.msk.bf16.mxu0 %vm535_vm0, %v6928_v46  ;;  %6650 = vmatprep.mubr.msk.bf16.mxu1 %vm535_vm0, %v6929_v56  ;;  %v6949_v29 = vld [vmem:[%s9889_s8 + $0x160] sm:$0xff]   ;;  %v6950_v46 = vld [vmem:[%s9889_s8 + $0x68] sm:$0xff]  }
 0x59e   : > { %v6951_v56 = vld [vmem:[%s9889_s8 + $0x168] sm:$0xff]  }
 0x5a4   : > { %6587 = vmatmul.mubr.msk.bf16.gmra.mrb[8].mxu0 %vm535_vm0, %v6930_v15  ;;  %6651 = vmatmul.mubr.msk.bf16.gmra.mrb[12].mxu1 %vm535_vm0, %v6931_v32  ;;  %v6952_v15 = vld [vmem:[%s9889_s8 + $0x70] sm:$0xff]  }
 0x5a5   : > { %6590 = vmatprep.mubr.msk.bf16.mxu0 %vm535_vm0, %v6932_v3  ;;  %6654 = vmatprep.mubr.msk.bf16.mxu1 %vm535_vm0, %v6933_v14  ;;  %v6953_v32 = vld [vmem:[%s9889_s8 + $0x170] sm:$0xff]   ;;  %v6954_v3 = vld [vmem:[%s9889_s8 + $0x78] sm:$0xff]  }
 0x5a6   : > { %v6955_v14 = vld [vmem:[%s9889_s8 + $0x178] sm:$0xff]  }
 0x5ac   : > { %6591 = vmatmul.mubr.msk.bf16.gmra.mrb[12].mxu0 %vm535_vm0, %v6934_v61  ;;  %6655 = vmatmul.mubr.msk.bf16.gmra.mrb[16].mxu1 %vm535_vm0, %v6935_v20  ;;  %v6956_v61 = vld [vmem:[%s9889_s8 + $0x80] sm:$0xff]  }
 0x5ad   : > { %6594 = vmatprep.mubr.msk.bf16.mxu0 %vm535_vm0, %v6936_v38  ;;  %6658 = vmatprep.mubr.msk.bf16.mxu1 %vm535_vm0, %v6937_v53  ;;  %v6957_v20 = vld [vmem:[%s9889_s8 + $0x180] sm:$0xff]   ;;  %v6958_v38 = vld [vmem:[%s9889_s8 + $0x88] sm:$0xff]  }
 0x5ae   : > { %v6959_v53 = vld [vmem:[%s9889_s8 + $0x188] sm:$0xff]  }
 0x5b4   : > { %6595 = vmatmul.mubr.msk.bf16.gmra.mrb[16].mxu0 %vm535_vm0, %v6938_v37  ;;  %6659 = vmatmul.mubr.msk.bf16.gmra.mrb[20].mxu1 %vm535_vm0, %v6939_v36  ;;  %v6960_v37 = vld [vmem:[%s9889_s8 + $0x90] sm:$0xff]  }
 0x5b5   : > { %6598 = vmatprep.mubr.msk.bf16.mxu0 %vm535_vm0, %v6940_v8  ;;  %6662 = vmatprep.mubr.msk.bf16.mxu1 %vm535_vm0, %v6941_v1  ;;  %v6961_v36 = vld [vmem:[%s9889_s8 + $0x190] sm:$0xff]   ;;  %v6962_v8 = vld [vmem:[%s9889_s8 + $0x98] sm:$0xff]  }
 0x5b6   : > { %v6963_v1 = vld [vmem:[%s9889_s8 + $0x198] sm:$0xff]  }
 0x5bc   : > { %6599 = vmatmul.mubr.msk.bf16.gmra.mrb[20].mxu0 %vm535_vm0, %v6942_v6  ;;  %6663 = vmatmul.mubr.msk.bf16.gmra.mrb[24].mxu1 %vm535_vm0, %v6943_v49  ;;  %v6964_v6 = vld [vmem:[%s9889_s8 + $0xa0] sm:$0xff]  }
 0x5bd   : > { %6602 = vmatprep.mubr.msk.bf16.mxu0 %vm535_vm0, %v6944_v34  ;;  %6666 = vmatprep.mubr.msk.bf16.mxu1 %vm535_vm0, %v6945_v5  ;;  %v6965_v49 = vld [vmem:[%s9889_s8 + $0x1a0] sm:$0xff]   ;;  %v6966_v34 = vld [vmem:[%s9889_s8 + $0xa8] sm:$0xff]  }
 0x5be   : > { %v6967_v5 = vld [vmem:[%s9889_s8 + $0x1a8] sm:$0xff]  }
 0x5c4   : > { %6603 = vmatmul.mubr.msk.bf16.gmra.mrb[24].mxu0 %vm535_vm0, %v6946_v42  ;;  %6667 = vmatmul.mubr.msk.bf16.gmra.mrb[28].mxu1 %vm535_vm0, %v6947_v51  ;;  %v6968_v42 = vld [vmem:[%s9889_s8 + $0xb0] sm:$0xff]  }
 0x5c5   : > { %6606 = vmatprep.mubr.msk.bf16.mxu0 %vm535_vm0, %v6948_v19  ;;  %6670 = vmatprep.mubr.msk.bf16.mxu1 %vm535_vm0, %v6949_v29  ;;  %v6969_v51 = vld [vmem:[%s9889_s8 + $0x1b0] sm:$0xff]   ;;  %v6970_v19 = vld [vmem:[%s9889_s8 + $0xb8] sm:$0xff]  }
 0x5c6   : > { %v6971_v29 = vld [vmem:[%s9889_s8 + $0x1b8] sm:$0xff]  }
 0x5cc   : > { %6607 = vmatmul.mubr.msk.bf16.gmra.mrb[28].mxu0 %vm535_vm0, %v6950_v46  ;;  %6671 = vmatmul.mubr.msk.bf16.gmra.mrb[32].mxu1 %vm535_vm0, %v6951_v56  ;;  %v6972_v46 = vld [vmem:[%s9889_s8 + $0xc0] sm:$0xff]  }
 0x5cd   : > { %6610 = vmatprep.mubr.msk.bf16.mxu0 %vm535_vm0, %v6952_v15  ;;  %6674 = vmatprep.mubr.msk.bf16.mxu1 %vm535_vm0, %v6953_v32  ;;  %v6973_v56 = vld [vmem:[%s9889_s8 + $0x1c0] sm:$0xff]   ;;  %v6974_v15 = vld [vmem:[%s9889_s8 + $0xc8] sm:$0xff]  }
 0x5ce   : > { %v6975_v32 = vld [vmem:[%s9889_s8 + $0x1c8] sm:$0xff]  }
 0x5d4   : > { %6611 = vmatmul.mubr.msk.bf16.gmra.mrb[32].mxu0 %vm535_vm0, %v6954_v3  ;;  %6675 = vmatmul.mubr.msk.bf16.gmra.mrb[36].mxu1 %vm535_vm0, %v6955_v14  ;;  %v6976_v3 = vld [vmem:[%s9889_s8 + $0xd0] sm:$0xff]  }
 0x5d5   : > { %6614 = vmatprep.mubr.msk.bf16.mxu0 %vm535_vm0, %v6956_v61  ;;  %6678 = vmatprep.mubr.msk.bf16.mxu1 %vm535_vm0, %v6957_v20  ;;  %v6977_v14 = vld [vmem:[%s9889_s8 + $0x1d0] sm:$0xff]   ;;  %v6978_v61 = vld [vmem:[%s9889_s8 + $0xd8] sm:$0xff]  }
 0x5d6   : > { %v6979_v20 = vld [vmem:[%s9889_s8 + $0x1d8] sm:$0xff]  }
 0x5dc   : > { %6615 = vmatmul.mubr.msk.bf16.gmra.mrb[36].mxu0 %vm535_vm0, %v6958_v38  ;;  %6679 = vmatmul.mubr.msk.bf16.gmra.mrb[40].mxu1 %vm535_vm0, %v6959_v53  ;;  %v6980_v38 = vld [vmem:[%s9889_s8 + $0xe0] sm:$0xff]  }
 0x5dd   : > { %6618 = vmatprep.mubr.msk.bf16.mxu0 %vm535_vm0, %v6960_v37  ;;  %6682 = vmatprep.mubr.msk.bf16.mxu1 %vm535_vm0, %v6961_v36  ;;  %v6981_v53 = vld [vmem:[%s9889_s8 + $0x1e0] sm:$0xff]   ;;  %v6982_v37 = vld [vmem:[%s9889_s8 + $0xe8] sm:$0xff]  }
 0x5de   : > { %v6983_v36 = vld [vmem:[%s9889_s8 + $0x1e8] sm:$0xff]  }
 0x5e4   : > { %6619 = vmatmul.mubr.msk.bf16.gmra.mrb[40].mxu0 %vm535_vm0, %v6962_v8  ;;  %6683 = vmatmul.mubr.msk.bf16.gmra.mrb[44].mxu1 %vm535_vm0, %v6963_v1  ;;  %v6984_v8 = vld [vmem:[%s9889_s8 + $0xf0] sm:$0xff]  }
 0x5e5   : > { %6622 = vmatprep.mubr.msk.bf16.mxu0 %vm535_vm0, %v6964_v6  ;;  %6686 = vmatprep.mubr.msk.bf16.mxu1 %vm535_vm0, %v6965_v49  ;;  %v6985_v1 = vld [vmem:[%s9889_s8 + $0x1f0] sm:$0xff]   ;;  %v6986_v6 = vld [vmem:[%s9889_s8 + $0xf8] sm:$0xff]  }
 0x5e6   : > { %v6987_v49 = vld [vmem:[%s9889_s8 + $0x1f8] sm:$0xff]  }
 0x5ec   : > { %6623 = vmatmul.mubr.msk.bf16.gmra.mrb[44].mxu0 %vm535_vm0, %v6966_v34  ;;  %6687 = vmatmul.mubr.msk.bf16.gmra.mrb[48].mxu1 %vm535_vm0, %v6967_v5  ;;  %v6988_v34 = vld [vmem:[%s9889_s8 + $0x200] sm:$0xff]   ;;  %v6989_v5 = vld [vmem:[%s9889_s8 + $0x208] sm:$0xff]  }
 0x5ed   : > { %6626 = vmatprep.mubr.msk.bf16.mxu0 %vm535_vm0, %v6968_v42  ;;  %6690 = vmatprep.mubr.msk.bf16.mxu1 %vm535_vm0, %v6969_v51  ;;  %v6990_v42 = vld [vmem:[%s9889_s8 + $0x210] sm:$0xff]   ;;  %v6991_v51 = vld [vmem:[%s9889_s8 + $0x218] sm:$0xff]  }
 0x5f4   : > { %6627 = vmatmul.mubr.msk.bf16.gmra.mrb[48].mxu0 %vm535_vm0, %v6970_v19  ;;  %6691 = vmatmul.mubr.msk.bf16.gmra.mrb[52].mxu1 %vm535_vm0, %v6971_v29  ;;  %v6992_v19 = vld [vmem:[%s9889_s8 + $0x220] sm:$0xff]   ;;  %v6993_v29 = vld [vmem:[%s9889_s8 + $0x228] sm:$0xff]  }
 0x5f5   : > { %6630 = vmatprep.mubr.msk.bf16.mxu0 %vm535_vm0, %v6972_v46  ;;  %6694 = vmatprep.mubr.msk.bf16.mxu1 %vm535_vm0, %v6973_v56  ;;  %v6994_v46 = vld [vmem:[%s9889_s8 + $0x230] sm:$0xff]   ;;  %v7152_v56 = vmov 1983009808  }
 0x5fc   : > { %6631 = vmatmul.mubr.msk.bf16.gmra.mrb[52].mxu0 %vm535_vm0, %v6974_v15  ;;  %6695 = vmatmul.mubr.msk.bf16.gmra.mrb[56].mxu1 %vm535_vm0, %v6975_v32  ;;  %v5327_v15 = vunpack.c.l.s4 %v7152_v56  ;;  %v5329_v32 = vlaneseq  ;;  %v7008_v56 = vld [vmem:[%s9889_s8 + $0x2a0] sm:$0xff]  }
 0x5fd   : > { %6634 = vmatprep.mubr.msk.bf16.mxu0 %vm535_vm0, %v6976_v3  ;;  %6698 = vmatprep.mubr.msk.bf16.mxu1 %vm535_vm0, %v6977_v14  ;;  %v6995_v3 = vld [vmem:[%s9889_s8 + $0x238] sm:$0xff]  }
 0x5fe   : > { %v5328_v14 = vunpack.c.0.s8 %v5327_v15  ;;  %v7009_v15 = vld [vmem:[%s9889_s8 + $0x2a8] sm:$0xff]  }
 0x604   : > { %6635 = vmatmul.mubr.msk.bf16.gmra.mrb[56].mxu0 %vm535_vm0, %v6978_v61  ;;  %6699 = vmatmul.mubr.msk.bf16.gmra.mrb[60].mxu1 %vm535_vm0, %v6979_v20  ;;  %v5330_v61 = vshrl.u32 %v5329_v32, 7  ;;  %v6996_v20 = vld [vmem:[%s9889_s8 + $0x240] sm:$0xff]   ;;  %v7010_v32 = vld [vmem:[%s9889_s8 + $0x2b0] sm:$0xff]  }
 0x605   : > { %6638 = vmatprep.mubr.msk.bf16.mxu0 %vm535_vm0, %v6980_v38  ;;  %6702 = vmatprep.mubr.msk.bf16.mxu1 %vm535_vm0, %v6981_v53  ;;  %v8807_v53 = vld [vmem:[%s9891_s10] sm:$0xff] }
 0x606   : > { %v8802_v38 = vsub.s32 %v5328_v14, %v5330_v61 }
 0x60c   : > { %6639 = vmatmul.mubr.msk.bf16.gmra.mrb[60].mxu0 %vm535_vm0, %v6982_v37  ;;  %6703 = vmatmul.mubr.msk.bf16.gmra.mrb[64].mxu1 %vm535_vm0, %v6983_v36  ;;  %v8812_v37 = vrot.slane %v8807_v53, %v8802_v38 }
 0x60d   : > { %6642 = vmatprep.mubr.msk.bf16.mxu0 %vm535_vm0, %v6984_v8  ;;  %6706 = vmatprep.mubr.msk.bf16.mxu1 %vm535_vm0, %v6985_v1  ;;  %v6997_v8 = vld [vmem:[%s9889_s8 + $0x248] sm:$0xff]   ;;  %v6998_v1 = vld [vmem:[%s9889_s8 + $0x250] sm:$0xff]  }
 0x60e   : > { %v5340_v36 = vcombine.high %v8812_v37, %v8812_v37 }
 0x614   : > { %6643 = vmatmul.mubr.msk.bf16.gmra.mrb[64].mxu0 %vm535_vm0, %v6986_v6  ;;  %6707 = vmatmul.mubr.msk.bf16.gmra.mrb[68].mxu1 %vm535_vm0, %v6987_v49  ;;  %v6999_v6 = vld [vmem:[%s9889_s8 + $0x258] sm:$0xff]   ;;  %v7000_v49 = vld [vmem:[%s9889_s8 + $0x260] sm:$0xff]  }
 0x615   : > { %6710 = vmatprep.mubr.msk.bf16.mxu1 %vm535_vm0, %v6988_v34  ;;  %5441 = vmatprep.mubr.bf16.mxu0 %v5340_v36  ;;  %v7001_v34 = vld [vmem:[%s9889_s8 + $0x268] sm:$0xff]  }
 0x61c   : > { %6711 = vmatmul.mubr.msk.bf16.gmra.mrb[72].mxu1 %vm535_vm0, %v6989_v5  ;;  %v7002_v5 = vld [vmem:[%s9889_s8 + $0x270] sm:$0xff]  }
 0x61d   : > { %6714 = vmatprep.mubr.msk.bf16.mxu1 %vm535_vm0, %v6990_v42  ;;  %v7003_v42 = vld [vmem:[%s9889_s8 + $0x278] sm:$0xff]  }
 0x624   : > { %6715 = vmatmul.mubr.msk.bf16.gmra.mrb[76].mxu1 %vm535_vm0, %v6991_v51  ;;  %v7004_v51 = vld [vmem:[%s9889_s8 + $0x280] sm:$0xff]  }
 0x625   : > { %6718 = vmatprep.mubr.msk.bf16.mxu1 %vm535_vm0, %v6992_v19  ;;  %v7005_v19 = vld [vmem:[%s9889_s8 + $0x288] sm:$0xff]  }
 0x62c   : > { %6719 = vmatmul.mubr.msk.bf16.gmra.mrb[80].mxu1 %vm535_vm0, %v6993_v29  ;;  %v7006_v29 = vld [vmem:[%s9889_s8 + $0x290] sm:$0xff]  }
 0x62d   : > { %6722 = vmatprep.mubr.msk.bf16.mxu1 %vm535_vm0, %v6994_v46  ;;  %v7007_v46 = vld [vmem:[%s9889_s8 + $0x298] sm:$0xff]  }
 0x634   : > { %6723 = vmatmul.mubr.msk.bf16.gmra.mrb[84].mxu1 %vm535_vm0, %v6995_v3 }
 0x635   : > { %6726 = vmatprep.mubr.msk.bf16.mxu1 %vm535_vm0, %v6996_v20 }
 0x63c   : > { %6727 = vmatmul.mubr.msk.bf16.gmra.mrb[88].mxu1 %vm535_vm0, %v6997_v8 }
 0x63d   : > { %6730 = vmatprep.mubr.msk.bf16.mxu1 %vm535_vm0, %v6998_v1  ;;  %v7011_v1 = vld [vmem:[%s9889_s8 + $0x2b8] sm:$0xff]  }
 0x644   : > { %6731 = vmatmul.mubr.msk.bf16.gmra.mrb[92].mxu1 %vm535_vm0, %v6999_v6 }
 0x645   : > { %6734 = vmatprep.mubr.msk.bf16.mxu1 %vm535_vm0, %v7000_v49 }
 0x64c   : > { %6735 = vmatmul.mubr.msk.bf16.gmra.mrb[96].mxu1 %vm535_vm0, %v7001_v34 }
 0x64d   : > { %6738 = vmatprep.mubr.msk.bf16.mxu1 %vm535_vm0, %v7002_v5 }
 0x654   : > { %6739 = vmatmul.mubr.msk.bf16.gmra.mrb[100].mxu1 %vm535_vm0, %v7003_v42  ;;  %v7012_v42 = vld [vmem:[%s9889_s8 + $0x2c0] sm:$0xff]  }
 0x655   : > { %6742 = vmatprep.mubr.msk.bf16.mxu1 %vm535_vm0, %v7004_v51 }
 0x65c   : > { %6743 = vmatmul.mubr.msk.bf16.gmra.mrb[104].mxu1 %vm535_vm0, %v7005_v19 }
 0x65d   : > { %6746 = vmatprep.mubr.msk.bf16.mxu1 %vm535_vm0, %v7006_v29 }
 0x664   : > { %6747 = vmatmul.mubr.msk.bf16.gmra.mrb[108].mxu1 %vm535_vm0, %v7007_v46 }
 0x665   : > { %6750 = vmatprep.mubr.msk.bf16.mxu1 %vm535_vm0, %v7008_v56 }
 0x66c   : > { %6751 = vmatmul.mubr.msk.bf16.gmra.mrb[112].mxu1 %vm535_vm0, %v7009_v15 }
 0x66d   : > { %6754 = vmatprep.mubr.msk.bf16.mxu1 %vm535_vm0, %v7010_v32 }
 0x66f   : > { %v6584_v3 = vpop.f32.mrb[4].mxu0  ;;  %v6648_v14 = vpop.f32.mrb[8].mxu1 }
 0x670   : > { %v3913_v61 = vadd.f32 %v6584_v3, %v7653_v2  ;;  %v4169_v20 = vadd.f32 %v6648_v14, %v8009_v24  ;;  %v3904_v36 = vpop.f32.mrb[5].mxu0  ;;  %v4160_v8 = vpop.f32.mrb[9].mxu1 }
 0x671   : > { %v3905_v6 = vadd.f32 %v3904_v36, %v7631_v55  ;;  %v4161_v49 = vadd.f32 %v4160_v8, %v7999_v4  ;;  %v6585_v34 = vpop.f32.mrb[6].mxu0  ;;  %v6649_v5 = vpop.f32.mrb[10].mxu1 }
 0x672   : > { %v3916_v2 = vadd.f32 %v6585_v34, %v7663_v7  ;;  %v4172_v24 = vadd.f32 %v6649_v5, %v7841_v31  ;;  %v3907_v51 = vpop.f32.mrb[7].mxu0  ;;  %v4163_v19 = vpop.f32.mrb[11].mxu1  ;;  %v4929_v56 = vmax.f32 %v3913_v61, 0.0  ;;  %v4993_v55 = vmax.f32 %v4169_v20, 0.0  ;;  %v7013_v34 = vld [vmem:[%s9889_s8 + $0x2c8] sm:$0xff]  }
 0x673   : > { %v3908_v29 = vadd.f32 %v3907_v51, %v7643_v63  ;;  %v4164_v46 = vadd.f32 %v4163_v19, %v7831_v13  ;;  %v4927_v32 = vmax.f32 %v3905_v6, 0.0  ;;  %v4991_v3 = vmax.f32 %v4161_v49, 0.0  ;;  %v7014_v51 = vld [vmem:[%s9889_s8 + $0x2d0] sm:$0xff]  }
 0x674   : > { %v4930_v15 = vmax.f32 %v3916_v2, 0.0  ;;  %v4994_v4 = vmax.f32 %v4172_v24, 0.0  ;;  %6755 = vmatmul.mubr.msk.bf16.gmra.mrb[116].mxu1 %vm535_vm0, %v7011_v1 }
 0x675   : > { %v4928_v14 = vmax.f32 %v3908_v29, 0.0  ;;  %v4992_v36 = vmax.f32 %v4164_v46, 0.0  ;;  %6758 = vmatprep.mubr.msk.bf16.mxu1 %vm535_vm0, %v7012_v42 }
 0x676   : > { %v8889_v7 = vpack.c.bf16 %v4930_v15, %v4929_v56  ;;  %v8891_v31 = vpack.c.bf16 %v4994_v4, %v4993_v55 }
 0x677   : > { %v8893_v8 = vpack.c.bf16 %v4928_v14, %v4927_v32  ;;  %v8895_v63 = vpack.c.bf16 %v4992_v36, %v4991_v3  ;;  %v6588_v13 = vpop.f32.mrb[8].mxu0  ;;  %v6652_v61 = vpop.f32.mrb[12].mxu1 }
 0x678   : > { %v3929_v20 = vadd.f32 %v6588_v13, %v7693_v21  ;;  %v4185_v1 = vadd.f32 %v6652_v61, %v8027_v11  ;;  %v3920_v6 = vpop.f32.mrb[9].mxu0  ;;  %v4176_v49 = vpop.f32.mrb[13].mxu1 }
 0x679   : > { %v3921_v5 = vadd.f32 %v3920_v6, %v7673_v12  ;;  %v4177_v42 = vadd.f32 %v4176_v49, %v8019_v40  ;;  %v6589_v2 = vpop.f32.mrb[10].mxu0  ;;  %v6653_v24 = vpop.f32.mrb[14].mxu1  ;;  %v7015_v49 = vld [vmem:[%s9889_s8 + $0x2d8] sm:$0xff]  }
 0x67a   : > { %v3932_v21 = vadd.f32 %v6589_v2, %v7549_v17  ;;  %v4188_v11 = vadd.f32 %v6653_v24, %v7861_v27  ;;  %v3923_v19 = vpop.f32.mrb[11].mxu0  ;;  %v4179_v29 = vpop.f32.mrb[15].mxu1  ;;  %v4933_v55 = vmax.f32 %v3929_v20, 0.0  ;;  %v4997_v12 = vmax.f32 %v4185_v1, 0.0  ;;  %v7016_v24 = vld [vmem:[%s9889_s8 + $0x2e0] sm:$0xff]  }
 0x67b   : > { %v3924_v46 = vadd.f32 %v3923_v19, %v7683_v18  ;;  %v4180_v56 = vadd.f32 %v4179_v29, %v7851_v57  ;;  %v4931_v4 = vmax.f32 %v3921_v5, 0.0  ;;  %v4995_v32 = vmax.f32 %v4177_v42, 0.0 }
 0x67c   : > { %v4934_v15 = vmax.f32 %v3932_v21, 0.0  ;;  %v4998_v40 = vmax.f32 %v4188_v11, 0.0  ;;  %6759 = vmatmul.mubr.msk.bf16.gmra.mrb[120].mxu1 %vm535_vm0, %v7013_v34 }
 0x67d   : > { %v4932_v3 = vmax.f32 %v3924_v46, 0.0  ;;  %v4996_v14 = vmax.f32 %v4180_v56, 0.0  ;;  %6762 = vmatprep.mubr.msk.bf16.mxu1 %vm535_vm0, %v7014_v51 }
 0x67e   : > { %v8913_v17 = vpack.c.bf16 %v4934_v15, %v4933_v55  ;;  %v8915_v27 = vpack.c.bf16 %v4998_v40, %v4997_v12 }
 0x67f   : > { %v8917_v36 = vpack.c.bf16 %v4932_v3, %v4931_v4  ;;  %v8919_v18 = vpack.c.bf16 %v4996_v14, %v4995_v32  ;;  %v6592_v57 = vpop.f32.mrb[12].mxu0  ;;  %v6656_v13 = vpop.f32.mrb[16].mxu1 }
 0x680   : > { %v3945_v61 = vadd.f32 %v6592_v57, %v7723_v54  ;;  %v4201_v20 = vadd.f32 %v6656_v13, %v8103_v43  ;;  %v3936_v1 = vpop.f32.mrb[13].mxu0  ;;  %v4192_v6 = vpop.f32.mrb[17].mxu1  ;;  %v7017_v13 = vld [vmem:[%s9889_s8 + $0x2e8] sm:$0xff]  }
 0x681   : > { %v3937_v34 = vadd.f32 %v3936_v1, %v7703_v25  ;;  %v4193_v5 = vadd.f32 %v4192_v6, %v8083_v10  ;;  %v6593_v42 = vpop.f32.mrb[14].mxu0  ;;  %v6657_v2 = vpop.f32.mrb[18].mxu1 }
 0x682   : > { %v3948_v54 = vadd.f32 %v6593_v42, %v7733_v39  ;;  %v4204_v43 = vadd.f32 %v6657_v2, %v7941_v58  ;;  %v3939_v51 = vpop.f32.mrb[15].mxu0  ;;  %v4195_v21 = vpop.f32.mrb[19].mxu1  ;;  %v4937_v29 = vmax.f32 %v3945_v61, 0.0  ;;  %v5001_v25 = vmax.f32 %v4201_v20, 0.0 }
 0x683   : > { %v3940_v11 = vadd.f32 %v3939_v51, %v7713_v30  ;;  %v4196_v19 = vadd.f32 %v4195_v21, %v7921_v44  ;;  %v4935_v56 = vmax.f32 %v3937_v34, 0.0  ;;  %v4999_v55 = vmax.f32 %v4193_v5, 0.0 }
 0x684   : > { %v4938_v46 = vmax.f32 %v3948_v54, 0.0  ;;  %v5002_v10 = vmax.f32 %v4204_v43, 0.0  ;;  %6763 = vmatmul.mubr.msk.bf16.gmra.mrb[124].mxu1 %vm535_vm0, %v7015_v49  ;;  %v7018_v49 = vld [vmem:[%s9889_s8 + $0x2f0] sm:$0xff]  }
 0x685   : > { %v4936_v12 = vmax.f32 %v3940_v11, 0.0  ;;  %v5000_v15 = vmax.f32 %v4196_v19, 0.0  ;;  %6766 = vmatprep.mubr.msk.bf16.mxu1 %vm535_vm0, %v7016_v24 }
 0x686   : > { %v8937_v39 = vpack.c.bf16 %v4938_v46, %v4937_v29  ;;  %v8939_v58 = vpack.c.bf16 %v5002_v10, %v5001_v25 }
 0x687   : > { %v8941_v40 = vpack.c.bf16 %v4936_v12, %v4935_v56  ;;  %v8943_v30 = vpack.c.bf16 %v5000_v15, %v4999_v55  ;;  %v6596_v44 = vpop.f32.mrb[16].mxu0  ;;  %v6660_v4 = vpop.f32.mrb[20].mxu1  ;;  %v7019_v55 = vld [vmem:[%s9889_s8 + $0x2f8] sm:$0xff]  }
 0x688   : > { %v3961_v32 = vadd.f32 %v6596_v44, %v7753_v52  ;;  %v4217_v3 = vadd.f32 %v6660_v4, %v8147_v22  ;;  %v3952_v14 = vpop.f32.mrb[17].mxu0  ;;  %v4208_v57 = vpop.f32.mrb[21].mxu1 }
 0x689   : > { %v3953_v61 = vadd.f32 %v3952_v14, %v7743_v47  ;;  %v4209_v20 = vadd.f32 %v4208_v57, %v8121_v60  ;;  %v6597_v1 = vpop.f32.mrb[18].mxu0  ;;  %v6661_v6 = vpop.f32.mrb[22].mxu1 }
 0x68a   : > { %v3964_v52 = vadd.f32 %v6597_v1, %v7576_v28  ;;  %v4220_v22 = vadd.f32 %v6661_v6, %v7989_v23  ;;  %v3955_v34 = vpop.f32.mrb[19].mxu0  ;;  %v4211_v5 = vpop.f32.mrb[23].mxu1  ;;  %v4941_v24 = vmax.f32 %v3961_v32, 0.0  ;;  %v5005_v47 = vmax.f32 %v4217_v3, 0.0  ;;  %v7020_v32 = vld [vmem:[%s9889_s8 + $0x300] sm:$0xff]  }
 0x68b   : > { %v3956_v42 = vadd.f32 %v3955_v34, %v7563_v45  ;;  %v4212_v2 = vadd.f32 %v4211_v5, %v7961_v50  ;;  %v4939_v43 = vmax.f32 %v3953_v61, 0.0  ;;  %v5003_v51 = vmax.f32 %v4209_v20, 0.0 }
 0x68c   : > { %v4942_v54 = vmax.f32 %v3964_v52, 0.0  ;;  %v5006_v60 = vmax.f32 %v4220_v22, 0.0  ;;  %6767 = vmatmul.mubr.msk.bf16.gmra.mrb[128].mxu1 %vm535_vm0, %v7017_v13 }
 0x68d   : > { %v4940_v21 = vmax.f32 %v3956_v42, 0.0  ;;  %v5004_v11 = vmax.f32 %v4212_v2, 0.0  ;;  %6770 = vmatprep.mubr.msk.bf16.mxu1 %vm535_vm0, %v7018_v49  ;;  %v10041_v42 = vld [vmem:[#allocation66_spill] sm:$0xff] }
 0x68e   : > { %v8961_v28 = vpack.c.bf16 %v4942_v54, %v4941_v24  ;;  %v8963_v23 = vpack.c.bf16 %v5006_v60, %v5005_v47  ;;  %v7021_v54 = vld [vmem:[%s9889_s8 + $0x308] sm:$0xff]   ;;  %v10042_v60 = vld [vmem:[#allocation29_spill] sm:$0xff] }
 0x68f   : > { %v8965_v19 = vpack.c.bf16 %v4940_v21, %v4939_v43  ;;  %v8967_v45 = vpack.c.bf16 %v5004_v11, %v5003_v51  ;;  %v6600_v50 = vpop.f32.mrb[20].mxu0  ;;  %v6664_v29 = vpop.f32.mrb[24].mxu1  ;;  %v10043_v51 = vld [vmem:[#allocation64_spill] sm:$0xff] }
 0x690   : > { %v3977_v25 = vadd.f32 %v6600_v50, %v7773_v9  ;;  %v4233_v46 = vadd.f32 %v6664_v29, %v8047_v41  ;;  %v3968_v10 = vpop.f32.mrb[21].mxu0  ;;  %v4224_v56 = vpop.f32.mrb[25].mxu1  ;;  %v7022_v29 = vld [vmem:[%s9889_s8 + $0x310] sm:$0xff]  }
 0x691   : > { %v3969_v12 = vadd.f32 %v3968_v10, %v7763_v0  ;;  %v4225_v15 = vadd.f32 %v4224_v56, %v8037_v16  ;;  %v6601_v44 = vpop.f32.mrb[22].mxu0  ;;  %v6665_v4 = vpop.f32.mrb[26].mxu1 }
 0x692   : > { %v3980_v9 = vadd.f32 %v6601_v44, %v7595_v35  ;;  %v4236_v41 = vadd.f32 %v6665_v4, %v7881_v59  ;;  %v3971_v3 = vpop.f32.mrb[23].mxu0  ;;  %v4227_v14 = vpop.f32.mrb[27].mxu1  ;;  %v4945_v61 = vmax.f32 %v3977_v25, 0.0  ;;  %v5009_v0 = vmax.f32 %v4233_v46, 0.0  ;;  %v10045_v46 = vld [vmem:[#allocation45_spill] sm:$0xff]  ;;  %v10047_v44 = vld [vmem:[#allocation43_spill] sm:$0xff] }
 0x693   : > { %v3972_v57 = vadd.f32 %v3971_v3, %v7584_v33  ;;  %v4228_v13 = vadd.f32 %v4227_v14, %v7871_v62  ;;  %v4943_v1 = vmax.f32 %v3969_v12, 0.0  ;;  %v5007_v6 = vmax.f32 %v4225_v15, 0.0  ;;  %v10046_v12 = vld [vmem:[#allocation11_spill] sm:$0xff] }
 0x694   : > { %v4946_v20 = vmax.f32 %v3980_v9, 0.0  ;;  %v5010_v16 = vmax.f32 %v4236_v41, 0.0  ;;  %6771 = vmatmul.mubr.msk.bf16.gmra.mrb[132].mxu1 %vm535_vm0, %v7019_v55 }
 0x695   : > { %v4944_v49 = vmax.f32 %v3972_v57, 0.0  ;;  %v5008_v52 = vmax.f32 %v4228_v13, 0.0  ;;  %6774 = vmatprep.mubr.msk.bf16.mxu1 %vm535_vm0, %v7020_v32 }
 0x696   : > { %v5196_v35 = vpack.c.bf16 %v4946_v20, %v4945_v61  ;;  %v8985_v59 = vpack.c.bf16 %v5010_v16, %v5009_v0  ;;  %v9006_v0 = vpop.permute.xlu0 %2449 }
 0x697   : > { %v5195_v22 = vpack.c.bf16 %v4944_v49, %v4943_v1  ;;  %v8987_v34 = vpack.c.bf16 %v5008_v52, %v5007_v6  ;;  %v6604_v33 = vpop.f32.mrb[24].mxu0  ;;  %v6668_v62 = vpop.f32.mrb[28].mxu1  ;;  %10048 = vst [vmem:[#allocation66_spill] sm:$0xff] %v9006_v0 }
 0x698   : > { %v3993_v5 = vadd.f32 %v6604_v33, %v7793_v26  ;;  %v4249_v2 = vadd.f32 %v6668_v62, %v10041_v42  ;;  %v3984_v24 = vpop.f32.mrb[25].mxu0  ;;  %v4240_v47 = vpop.f32.mrb[29].mxu1  ;;  %v10044_v26 = vld [vmem:[#allocation12_spill] sm:$0xff]  ;;  %v10050_v33 = vld [vmem:[#allocation70_spill] sm:$0xff] }
 0x699   : > { %v3985_v43 = vadd.f32 %v3984_v24, %v10042_v60  ;;  %v4241_v21 = vadd.f32 %v4240_v47, %v10043_v51  ;;  %v6605_v11 = vpop.f32.mrb[26].mxu0  ;;  %v6669_v50 = vpop.f32.mrb[30].mxu1  ;;  %6361 = vmatprep.subr.bf16.mxu0 %v5195_v22  ;;  %v10051_v24 = vld [vmem:[#allocation32_spill] sm:$0xff]  ;;  %v7024_v51 = vld [vmem:[%s9889_s8 + $0x320] sm:$0xff]  }
 0x69a   : > { %v3996_v25 = vadd.f32 %v6605_v11, %v10044_v26  ;;  %v4252_v10 = vadd.f32 %v6669_v50, %v10045_v46  ;;  %v3987_v56 = vpop.f32.mrb[27].mxu0  ;;  %v4243_v55 = vpop.f32.mrb[31].mxu1  ;;  %6362 = vmatpush3.bf16.msra.mxu0 %v8893_v8  ;;  %v4949_v32 = vmax.f32 %v3993_v5, 0.0  ;;  %v5013_v9 = vmax.f32 %v4249_v2, 0.0  ;;  %v7023_v2 = vld [vmem:[%s9889_s8 + $0x318] sm:$0xff]   ;;  %v10054_v50 = vld [vmem:[#allocation50_spill] sm:$0xff] }
 0x69b   : > { %v3988_v15 = vadd.f32 %v3987_v56, %v10046_v12  ;;  %v4244_v4 = vadd.f32 %v4243_v55, %v10047_v44  ;;  %6363 = vmatprep.subr.bf16.mxu0 %v5196_v35  ;;  %v4947_v14 = vmax.f32 %v3985_v43, 0.0  ;;  %v5011_v57 = vmax.f32 %v4241_v21, 0.0  ;;  %v9008_v8 = vpop.permute.xlu1 %2364  ;;  %v10049_v35 = vld [vmem:[#allocation34_spill] sm:$0xff]  ;;  %v10055_v46 = vld [vmem:[#allocation13_spill] sm:$0xff]  ;;  %v10056_v56 = vld [vmem:[#allocation47_spill] sm:$0xff] }
 0x69c   : > { %v4950_v41 = vmax.f32 %v3996_v25, 0.0  ;;  %v5014_v3 = vmax.f32 %v4252_v10, 0.0  ;;  %6775 = vmatmul.mubr.msk.bf16.gmra.mrb[136].mxu1 %vm535_vm0, %v7021_v54  ;;  %v10052_v54 = vld [vmem:[#allocation68_spill] sm:$0xff]  ;;  %v10053_v21 = vld [vmem:[#allocation14_spill] sm:$0xff] }
 0x69d   : > { %v4948_v13 = vmax.f32 %v3988_v15, 0.0  ;;  %v5012_v61 = vmax.f32 %v4244_v4, 0.0  ;;  %6778 = vmatprep.mubr.msk.bf16.mxu1 %vm535_vm0, %v7022_v29 }
 0x69e   : > { %v5198_v20 = vpack.c.bf16 %v4950_v41, %v4949_v32  ;;  %v9010_v16 = vpack.c.bf16 %v5014_v3, %v5013_v9  ;;  %6364 = vmatpush3.bf16.msra.mxu0 %v8889_v7 }
 0x69f   : > { %v5197_v1 = vpack.c.bf16 %v4948_v13, %v4947_v14  ;;  %v9013_v6 = vpack.c.bf16 %v5012_v61, %v5011_v57  ;;  %v6608_v49 = vpop.f32.mrb[28].mxu0  ;;  %v6672_v52 = vpop.f32.mrb[32].mxu1 }
 0x6a0   : > { %v4009_v22 = vadd.f32 %v6608_v49, %v10049_v35  ;;  %v4265_v62 = vadd.f32 %v6672_v52, %v10050_v33  ;;  %v4000_v5 = vpop.f32.mrb[29].mxu0  ;;  %v4256_v42 = vpop.f32.mrb[33].mxu1  ;;  %v10058_v52 = vld [vmem:[#allocation37_spill] sm:$0xff] }
 0x6a1   : > { %v4001_v47 = vadd.f32 %v4000_v5, %v10051_v24  ;;  %v4257_v60 = vadd.f32 %v4256_v42, %v10052_v54  ;;  %v6609_v7 = vpop.f32.mrb[30].mxu0  ;;  %v6673_v43 = vpop.f32.mrb[34].mxu1  ;;  %6365 = vmatprep.subr.bf16.mxu0 %v5197_v1  ;;  %v7025_v42 = vld [vmem:[%s9889_s8 + $0x328] sm:$0xff]  }
 0x6a2   : > { %v4012_v11 = vadd.f32 %v6609_v7, %v10053_v21  ;;  %v4268_v29 = vadd.f32 %v6673_v43, %v10054_v50  ;;  %v4003_v26 = vpop.f32.mrb[31].mxu0  ;;  %v4259_v25 = vpop.f32.mrb[35].mxu1  ;;  %6366 = vmatpush3.bf16.msra.mxu0 %v8917_v36  ;;  %v4953_v12 = vmax.f32 %v4009_v22, 0.0  ;;  %v5017_v15 = vmax.f32 %v4265_v62, 0.0  ;;  %v10059_v22 = vld [vmem:[#allocation75_spill] sm:$0xff]  ;;  %v7026_v7 = vld [vmem:[%s9889_s8 + $0x330] sm:$0xff]  }
 0x6a3   : > { %v4004_v10 = vadd.f32 %v4003_v26, %v10055_v46  ;;  %v4260_v55 = vadd.f32 %v4259_v25, %v10056_v56  ;;  %6367 = vmatprep.subr.bf16.mxu0 %v5198_v20  ;;  %v4951_v32 = vmax.f32 %v4001_v47, 0.0  ;;  %v5015_v9 = vmax.f32 %v4257_v60, 0.0  ;;  %v9032_v14 = vpop.permute.xlu0 %2369  ;;  %v9034_v36 = vpop.permute.xlu1 %2454  ;;  %v10061_v47 = vld [vmem:[#allocation72_spill] sm:$0xff]  ;;  %v10063_v21 = vld [vmem:[#allocation57_spill] sm:$0xff]  ;;  %v10064_v26 = vld [vmem:[#allocation15_spill] sm:$0xff] }
 0x6a4   : > { %v4954_v44 = vmax.f32 %v4012_v11, 0.0  ;;  %v5018_v4 = vmax.f32 %v4268_v29, 0.0  ;;  %6779 = vmatmul.mubr.msk.bf16.gmra.mrb[140].mxu1 %vm535_vm0, %v7023_v2  ;;  %10057 = vst [vmem:[#allocation29_spill] sm:$0xff] %v9034_v36  ;;  %v10060_v2 = vld [vmem:[#allocation36_spill] sm:$0xff]  ;;  %v10065_v46 = vld [vmem:[#allocation53_spill] sm:$0xff] }
 0x6a5   : > { %v4952_v41 = vmax.f32 %v4004_v10, 0.0  ;;  %v5016_v3 = vmax.f32 %v4260_v55, 0.0  ;;  %6782 = vmatprep.mubr.msk.bf16.mxu1 %vm535_vm0, %v7024_v51  ;;  %v10062_v43 = vld [vmem:[#allocation16_spill] sm:$0xff] }
 0x6a6   : > { %v5200_v57 = vpack.c.bf16 %v4954_v44, %v4953_v12  ;;  %v9036_v13 = vpack.c.bf16 %v5018_v4, %v5017_v15  ;;  %6368 = vmatpush3.bf16.msra.mxu0 %v8913_v17 }
 0x6a7   : > { %v5199_v61 = vpack.c.bf16 %v4952_v41, %v4951_v32  ;;  %v9039_v20 = vpack.c.bf16 %v5016_v3, %v5015_v9  ;;  %v6612_v1 = vpop.f32.mrb[32].mxu0  ;;  %v6676_v49 = vpop.f32.mrb[36].mxu1 }
 0x6a8   : > { %v4025_v35 = vadd.f32 %v6612_v1, %v10058_v52  ;;  %v4281_v33 = vadd.f32 %v6676_v49, %v10059_v22  ;;  %v4016_v62 = vpop.f32.mrb[33].mxu0  ;;  %v4272_v5 = vpop.f32.mrb[37].mxu1  ;;  %v10067_v22 = vld [vmem:[#allocation39_spill] sm:$0xff] }
 0x6a9   : > { %v4017_v24 = vadd.f32 %v4016_v62, %v10060_v2  ;;  %v4273_v54 = vadd.f32 %v4272_v5, %v10061_v47  ;;  %v6613_v17 = vpop.f32.mrb[34].mxu0  ;;  %v6677_v60 = vpop.f32.mrb[38].mxu1  ;;  %6369 = vmatprep.subr.bf16.mxu0 %v5199_v61  ;;  %v10068_v62 = vld [vmem:[#allocation84_spill] sm:$0xff]  ;;  %v10069_v47 = vld [vmem:[#allocation38_spill] sm:$0xff] }
 0x6aa   : > { %v4028_v51 = vadd.f32 %v6613_v17, %v10062_v43  ;;  %v4284_v11 = vadd.f32 %v6677_v60, %v10063_v21  ;;  %v4019_v50 = vpop.f32.mrb[35].mxu0  ;;  %v4275_v29 = vpop.f32.mrb[39].mxu1  ;;  %6370 = vmatpush3.bf16.msra.mxu0 %v8941_v40  ;;  %v4957_v56 = vmax.f32 %v4025_v35, 0.0  ;;  %v5021_v55 = vmax.f32 %v4281_v33, 0.0  ;;  %v10071_v43 = vld [vmem:[#allocation18_spill] sm:$0xff]  ;;  %v10072_v21 = vld [vmem:[#allocation63_spill] sm:$0xff] }
 0x6ab   : > { %v4020_v25 = vadd.f32 %v4019_v50, %v10064_v26  ;;  %v4276_v10 = vadd.f32 %v4275_v29, %v10065_v46  ;;  %6371 = vmatprep.subr.bf16.mxu0 %v5200_v57  ;;  %v4955_v44 = vmax.f32 %v4017_v24, 0.0  ;;  %v5019_v4 = vmax.f32 %v4273_v54, 0.0  ;;  %v9058_v41 = vpop.permute.xlu0 %2459  ;;  %v9060_v40 = vpop.permute.xlu1 %2374  ;;  %v7027_v24 = vld [vmem:[%s9889_s8 + $0x338] sm:$0xff]   ;;  %v10070_v54 = vld [vmem:[#allocation80_spill] sm:$0xff] }
 0x6ac   : > { %v4958_v12 = vmax.f32 %v4028_v51, 0.0  ;;  %v5022_v15 = vmax.f32 %v4284_v11, 0.0  ;;  %6783 = vmatmul.mubr.msk.bf16.gmra.mrb[144].mxu1 %vm535_vm0, %v7025_v42  ;;  %10066 = vst [vmem:[#allocation64_spill] sm:$0xff] %v9058_v41  ;;  %v5325_v57 = vcombine.high %v8807_v53, %v8807_v53 }
 0x6ad   : > { %v4956_v32 = vmax.f32 %v4020_v25, 0.0  ;;  %v5020_v9 = vmax.f32 %v4276_v10, 0.0  ;;  %6786 = vmatprep.mubr.msk.bf16.mxu1 %vm535_vm0, %v7026_v7  ;;  %v7028_v7 = vld [vmem:[%s9889_s8 + $0x340] sm:$0xff]   ;;  %v10073_v25 = vld [vmem:[#allocation17_spill] sm:$0xff] }
 0x6ae   : > { %v5202_v3 = vpack.c.bf16 %v4958_v12, %v4957_v56  ;;  %v9062_v61 = vpack.c.bf16 %v5022_v15, %v5021_v55  ;;  %6372 = vmatpush3.bf16.msra.mxu0 %v8937_v39  ;;  %v9083_v26 = vrot.slane %v5325_v57, %v8802_v38  ;;  %v10074_v10 = vld [vmem:[#allocation61_spill] sm:$0xff] }
 0x6af   : > { %v5201_v1 = vpack.c.bf16 %v4956_v32, %v4955_v44  ;;  %v9067_v49 = vpack.c.bf16 %v5020_v9, %v5019_v4  ;;  %v6616_v52 = vpop.f32.mrb[36].mxu0  ;;  %v6680_v35 = vpop.f32.mrb[40].mxu1 }
 0x6b0   : > { %v4041_v33 = vadd.f32 %v6616_v52, %v10067_v22  ;;  %v4297_v5 = vadd.f32 %v6680_v35, %v10068_v62  ;;  %v4032_v42 = vpop.f32.mrb[37].mxu0  ;;  %v4288_v2 = vpop.f32.mrb[41].mxu1 }
 0x6b1   : > { %v4033_v39 = vadd.f32 %v4032_v42, %v10069_v47  ;;  %v4289_v17 = vadd.f32 %v4288_v2, %v10070_v54  ;;  %v6617_v53 = vpop.f32.mrb[38].mxu0  ;;  %v6681_v60 = vpop.f32.mrb[42].mxu1  ;;  %6373 = vmatprep.subr.bf16.mxu0 %v5201_v1  ;;  %v10076_v42 = vld [vmem:[#allocation41_spill] sm:$0xff] }
 0x6b2   : > { %v4044_v51 = vadd.f32 %v6617_v53, %v10071_v43  ;;  %v4300_v11 = vadd.f32 %v6681_v60, %v10072_v21  ;;  %v4035_v50 = vpop.f32.mrb[39].mxu0  ;;  %v4291_v29 = vpop.f32.mrb[43].mxu1  ;;  %6374 = vmatpush3.bf16.msra.mxu0 %v8965_v19  ;;  %v4961_v55 = vmax.f32 %v4041_v33, 0.0  ;;  %v5025_v12 = vmax.f32 %v4297_v5, 0.0  ;;  %v10079_v60 = vld [vmem:[#allocation88_spill] sm:$0xff] }
 0x6b3   : > { %v4036_v46 = vadd.f32 %v4035_v50, %v10073_v25  ;;  %v4292_v56 = vadd.f32 %v4291_v29, %v10074_v10  ;;  %6375 = vmatprep.subr.bf16.mxu0 %v5202_v3  ;;  %v4959_v4 = vmax.f32 %v4033_v39, 0.0  ;;  %v5023_v32 = vmax.f32 %v4289_v17, 0.0  ;;  %v9089_v19 = vpop.permute.xlu0 %2379  ;;  %v9091_v57 = vpop.permute.xlu1 %2464  ;;  %v7029_v17 = vld [vmem:[%s9889_s8 + $0x348] sm:$0xff]   ;;  %v7030_v21 = vld [vmem:[%s9889_s8 + $0x350] sm:$0xff]  }
 0x6b4   : > { %v4962_v15 = vmax.f32 %v4044_v51, 0.0  ;;  %v5026_v44 = vmax.f32 %v4300_v11, 0.0  ;;  %6787 = vmatmul.mubr.msk.bf16.gmra.mrb[148].mxu1 %vm535_vm0, %v7027_v24  ;;  %10075 = vst [vmem:[#allocation12_spill] sm:$0xff] %v9091_v57  ;;  %v5341_v3 = vcombine.high %v9083_v26, %v9083_v26  ;;  %v10077_v24 = vld [vmem:[#allocation92_spill] sm:$0xff]  ;;  %v10081_v29 = vld [vmem:[#allocation71_spill] sm:$0xff] }
 0x6b5   : > { %v4960_v9 = vmax.f32 %v4036_v46, 0.0  ;;  %v5024_v1 = vmax.f32 %v4292_v56, 0.0  ;;  %6790 = vmatprep.mubr.msk.bf16.mxu1 %vm535_vm0, %v7028_v7  ;;  %v10080_v11 = vld [vmem:[#allocation20_spill] sm:$0xff]  ;;  %v10082_v56 = vld [vmem:[#allocation19_spill] sm:$0xff] }
 0x6b6   : > { %v9093_v52 = vpack.c.bf16 %v4962_v15, %v4961_v55  ;;  %v9095_v35 = vpack.c.bf16 %v5026_v44, %v5025_v12  ;;  %6376 = vmatpush3.bf16.msra.mxu0 %v8961_v28  ;;  %v10078_v28 = vld [vmem:[#allocation40_spill] sm:$0xff]  ;;  %v10083_v12 = vld [vmem:[#allocation67_spill] sm:$0xff] }
 0x6b7   : > { %v9100_v22 = vpack.c.bf16 %v4960_v9, %v4959_v4  ;;  %v9102_v33 = vpack.c.bf16 %v5024_v1, %v5023_v32  ;;  %v6620_v62 = vpop.f32.mrb[40].mxu0  ;;  %v6684_v5 = vpop.f32.mrb[44].mxu1 }
 0x6b8   : > { %v4057_v2 = vadd.f32 %v6620_v62, %v10076_v42  ;;  %v4313_v47 = vadd.f32 %v6684_v5, %v10077_v24  ;;  %v4048_v39 = vpop.f32.mrb[41].mxu0  ;;  %v4304_v54 = vpop.f32.mrb[45].mxu1 }
 0x6b9   : > { %v4049_v53 = vadd.f32 %v4048_v39, %v10078_v28  ;;  %v4305_v7 = vadd.f32 %v4304_v54, %v10079_v60  ;;  %v6621_v43 = vpop.f32.mrb[42].mxu0  ;;  %v6685_v51 = vpop.f32.mrb[46].mxu1  ;;  %5442 = vmatmul.mubr.bf16.vlgmr.msra.gmra.mrb[68].mxu0 %v8812_v37  ;;  %v10086_v28 = vld [vmem:[#allocation44_spill] sm:$0xff] }
 0x6ba   : > { %v4060_v50 = vadd.f32 %v6621_v43, %v10080_v11  ;;  %v4316_v25 = vadd.f32 %v6685_v51, %v10081_v29  ;;  %v4051_v46 = vpop.f32.mrb[43].mxu0  ;;  %v4307_v10 = vpop.f32.mrb[47].mxu1  ;;  %5481 = vmatprep.mubr.bf16.mxu0 %v5341_v3  ;;  %v4965_v44 = vmax.f32 %v4057_v2, 0.0  ;;  %v5029_v4 = vmax.f32 %v4313_v47, 0.0  ;;  %v10087_v60 = vld [vmem:[#allocation100_spill] sm:$0xff]  ;;  %v10088_v11 = vld [vmem:[#allocation42_spill] sm:$0xff] }
 0x6bb   : > { %v4052_v55 = vadd.f32 %v4051_v46, %v10082_v56  ;;  %v4308_v15 = vadd.f32 %v4307_v10, %v10083_v12  ;;  %v4963_v37 = vmax.f32 %v4049_v53, 0.0  ;;  %v5027_v1 = vmax.f32 %v4305_v7, 0.0  ;;  %v9121_v42 = vpop.permute.xlu0 %2469  ;;  %v9123_v24 = vpop.permute.xlu1 %2384  ;;  %v10089_v29 = vld [vmem:[#allocation96_spill] sm:$0xff]  ;;  %v7032_v56 = vld [vmem:[%s9889_s8 + $0x360] sm:$0xff]  }
 0x6bc   : > { %v4966_v32 = vmax.f32 %v4060_v50, 0.0  ;;  %v5030_v9 = vmax.f32 %v4316_v25, 0.0  ;;  %6791 = vmatmul.mubr.msk.bf16.gmra.mrb[152].mxu1 %vm535_vm0, %v7029_v17  ;;  %10084 = vst [vmem:[#allocation45_spill] sm:$0xff] %v9121_v42  ;;  %10085 = vst [vmem:[#allocation11_spill] sm:$0xff] %v9123_v24 }
 0x6bd   : > { %v4964_v62 = vmax.f32 %v4052_v55, 0.0  ;;  %v5028_v5 = vmax.f32 %v4308_v15, 0.0  ;;  %6794 = vmatprep.mubr.msk.bf16.mxu1 %vm535_vm0, %v7030_v21  ;;  %v7031_v21 = vld [vmem:[%s9889_s8 + $0x358] sm:$0xff]   ;;  %v10090_v55 = vld [vmem:[#allocation22_spill] sm:$0xff] }
 0x6be   : > { %v9125_v3 = vpack.c.bf16 %v4966_v32, %v4965_v44  ;;  %v9127_v39 = vpack.c.bf16 %v5030_v9, %v5029_v4  ;;  %v10091_v15 = vld [vmem:[#allocation77_spill] sm:$0xff] }
 0x6bf   : > { %v9129_v2 = vpack.c.bf16 %v4964_v62, %v4963_v37  ;;  %v9131_v47 = vpack.c.bf16 %v5028_v5, %v5027_v1  ;;  %v6624_v54 = vpop.f32.mrb[44].mxu0  ;;  %v6688_v17 = vpop.f32.mrb[48].mxu1  ;;  %v10092_v9 = vld [vmem:[#allocation21_spill] sm:$0xff]  ;;  %v10093_v1 = vld [vmem:[#allocation74_spill] sm:$0xff] }
 0x6c0   : > { %v4073_v53 = vadd.f32 %v6624_v54, %v10086_v28  ;;  %v4329_v7 = vadd.f32 %v6688_v17, %v10087_v60  ;;  %v4064_v43 = vpop.f32.mrb[45].mxu0  ;;  %v4320_v51 = vpop.f32.mrb[49].mxu1 }
 0x6c1   : > { %v4065_v50 = vadd.f32 %v4064_v43, %v10088_v11  ;;  %v4321_v25 = vadd.f32 %v4320_v51, %v10089_v29  ;;  %v6625_v46 = vpop.f32.mrb[46].mxu0  ;;  %v6689_v10 = vpop.f32.mrb[50].mxu1 }
 0x6c2   : > { %v4076_v12 = vadd.f32 %v6625_v46, %v10090_v55  ;;  %v4332_v44 = vadd.f32 %v6689_v10, %v10091_v15  ;;  %v4067_v4 = vpop.f32.mrb[47].mxu0  ;;  %v4323_v32 = vpop.f32.mrb[51].mxu1  ;;  %v4969_v5 = vmax.f32 %v4073_v53, 0.0  ;;  %v5033_v54 = vmax.f32 %v4329_v7, 0.0  ;;  %v10097_v15 = vld [vmem:[#allocation108_spill] sm:$0xff] }
 0x6c3   : > { %v4068_v37 = vadd.f32 %v4067_v4, %v10092_v9  ;;  %v4324_v62 = vadd.f32 %v4323_v32, %v10093_v1  ;;  %v4967_v60 = vmax.f32 %v4065_v50, 0.0  ;;  %v5031_v43 = vmax.f32 %v4321_v25, 0.0  ;;  %v9149_v29 = vpop.permute.xlu0 %2389  ;;  %v9151_v46 = vpop.permute.xlu1 %2474  ;;  %v10096_v50 = vld [vmem:[#allocation48_spill] sm:$0xff]  ;;  %v7033_v32 = vld [vmem:[%s9889_s8 + $0x368] sm:$0xff]   ;;  %v10098_v9 = vld [vmem:[#allocation46_spill] sm:$0xff] }
 0x6c4   : > { %v4970_v17 = vmax.f32 %v4076_v12, 0.0  ;;  %v5034_v28 = vmax.f32 %v4332_v44, 0.0  ;;  %6795 = vmatmul.mubr.msk.bf16.gmra.mrb[156].mxu1 %vm535_vm0, %v7031_v21  ;;  %10094 = vst [vmem:[#allocation43_spill] sm:$0xff] %v9149_v29  ;;  %10095 = vst [vmem:[#allocation34_spill] sm:$0xff] %v9151_v46  ;;  %v10099_v1 = vld [vmem:[#allocation104_spill] sm:$0xff] }
 0x6c5   : > { %v4968_v51 = vmax.f32 %v4068_v37, 0.0  ;;  %v5032_v11 = vmax.f32 %v4324_v62, 0.0  ;;  %6798 = vmatprep.mubr.msk.bf16.mxu1 %vm535_vm0, %v7032_v56 }
 0x6c6   : > { %v9153_v10 = vpack.c.bf16 %v4970_v17, %v4969_v5  ;;  %v9155_v55 = vpack.c.bf16 %v5034_v28, %v5033_v54  ;;  %v7034_v17 = vld [vmem:[%s9889_s8 + $0x370] sm:$0xff]  }
 0x6c7   : > { %v9157_v53 = vpack.c.bf16 %v4968_v51, %v4967_v60  ;;  %v9159_v7 = vpack.c.bf16 %v5032_v11, %v5031_v43  ;;  %v6628_v12 = vpop.f32.mrb[48].mxu0  ;;  %v6692_v21 = vpop.f32.mrb[52].mxu1  ;;  %v10100_v28 = vld [vmem:[#allocation24_spill] sm:$0xff]  ;;  %v10101_v43 = vld [vmem:[#allocation85_spill] sm:$0xff] }
 0x6c8   : > { %v4089_v25 = vadd.f32 %v6628_v12, %v10096_v50  ;;  %v4345_v44 = vadd.f32 %v6692_v21, %v10097_v15  ;;  %v4080_v4 = vpop.f32.mrb[49].mxu0  ;;  %v4336_v56 = vpop.f32.mrb[53].mxu1  ;;  %v10102_v21 = vld [vmem:[#allocation23_spill] sm:$0xff]  ;;  %v10103_v15 = vld [vmem:[#allocation81_spill] sm:$0xff] }
 0x6c9   : > { %v4081_v37 = vadd.f32 %v4080_v4, %v10098_v9  ;;  %v4337_v62 = vadd.f32 %v4336_v56, %v10099_v1  ;;  %v6629_v5 = vpop.f32.mrb[50].mxu0  ;;  %v6693_v54 = vpop.f32.mrb[54].mxu1 }
 0x6ca   : > { %v4092_v60 = vadd.f32 %v6629_v5, %v10100_v28  ;;  %v4348_v51 = vadd.f32 %v6693_v54, %v10101_v43  ;;  %v4083_v11 = vpop.f32.mrb[51].mxu0  ;;  %v4339_v12 = vpop.f32.mrb[55].mxu1  ;;  %v4973_v42 = vmax.f32 %v4089_v25, 0.0  ;;  %v5037_v4 = vmax.f32 %v4345_v44, 0.0 }
 0x6cb   : > { %v4084_v50 = vadd.f32 %v4083_v11, %v10102_v21  ;;  %v4340_v48 = vadd.f32 %v4339_v12, %v10103_v15  ;;  %v4971_v1 = vmax.f32 %v4081_v37, 0.0  ;;  %v5035_v57 = vmax.f32 %v4337_v62, 0.0  ;;  %v9177_v5 = vpop.permute.xlu0 %2479  ;;  %v9179_v54 = vpop.permute.xlu1 %2394  ;;  %v10107_v37 = vld [vmem:[#allocation51_spill] sm:$0xff]  ;;  %v7035_v12 = vld [vmem:[%s9889_s8 + $0x378] sm:$0xff]  }
 0x6cc   : > { %v4974_v9 = vmax.f32 %v4092_v60, 0.0  ;;  %v5038_v56 = vmax.f32 %v4348_v51, 0.0  ;;  %6799 = vmatmul.mubr.msk.bf16.gmra.mrb[160].mxu1 %vm535_vm0, %v7033_v32  ;;  %10104 = vst [vmem:[#allocation70_spill] sm:$0xff] %v9177_v5  ;;  %10105 = vst [vmem:[#allocation32_spill] sm:$0xff] %v9179_v54  ;;  %v10108_v51 = vld [vmem:[#allocation82_spill] sm:$0xff]  ;;  %v10114_v5 = vld [vmem:[#allocation60_spill] sm:$0xff] }
 0x6cd   : > { %v4972_v46 = vmax.f32 %v4084_v50, 0.0  ;;  %v5036_v0 = vmax.f32 %v4340_v48, 0.0  ;;  %6802 = vmatprep.mubr.msk.bf16.mxu1 %vm535_vm0, %v7034_v17  ;;  %v10110_v50 = vld [vmem:[#allocation78_spill] sm:$0xff] }
 0x6ce   : > { %v9181_v28 = vpack.c.bf16 %v4974_v9, %v4973_v42  ;;  %v9183_v43 = vpack.c.bf16 %v5038_v56, %v5037_v4  ;;  %v10109_v42 = vld [vmem:[#allocation49_spill] sm:$0xff]  ;;  %v10112_v56 = vld [vmem:[#allocation62_spill] sm:$0xff] }
 0x6cf   : > { %v9185_v25 = vpack.c.bf16 %v4972_v46, %v4971_v1  ;;  %v9187_v44 = vpack.c.bf16 %v5036_v0, %v5035_v57  ;;  %v6632_v60 = vpop.f32.mrb[52].mxu0  ;;  %v6696_v32 = vpop.f32.mrb[56].mxu1  ;;  %v7036_v0 = vld [vmem:[%s9889_s8 + $0x380] sm:$0xff]  }
 0x6d0   : > { %10106 = vst [vmem:[#allocation68_spill] sm:$0xff] %v9183_v43  ;;  %v4105_v62 = vadd.f32 %v6632_v60, %v10107_v37  ;;  %v4361_v48 = vadd.f32 %v6696_v32, %v10108_v51  ;;  %v4096_v11 = vpop.f32.mrb[53].mxu0  ;;  %v4352_v17 = vpop.f32.mrb[57].mxu1  ;;  %v10111_v57 = vld [vmem:[#allocation26_spill] sm:$0xff]  ;;  %v10113_v37 = vld [vmem:[#allocation25_spill] sm:$0xff] }
 0x6d1   : > { %v4097_v21 = vadd.f32 %v4096_v11, %v10109_v42  ;;  %v4353_v15 = vadd.f32 %v4352_v17, %v10110_v50  ;;  %v6633_v46 = vpop.f32.mrb[54].mxu0  ;;  %v6697_v4 = vpop.f32.mrb[58].mxu1 }
 0x6d2   : > { %v4108_v9 = vadd.f32 %v6633_v46, %v10111_v57  ;;  %v4364_v1 = vadd.f32 %v6697_v4, %v10112_v56  ;;  %v4099_v60 = vpop.f32.mrb[55].mxu0  ;;  %v4355_v32 = vpop.f32.mrb[59].mxu1  ;;  %v4977_v36 = vmax.f32 %v4105_v62, 0.0  ;;  %v5041_v11 = vmax.f32 %v4361_v48, 0.0 }
 0x6d3   : > { %v4100_v51 = vadd.f32 %v4099_v60, %v10113_v37  ;;  %v4356_v41 = vadd.f32 %v4355_v32, %v10114_v5  ;;  %v4975_v50 = vmax.f32 %v4097_v21, 0.0  ;;  %v5039_v29 = vmax.f32 %v4353_v15, 0.0  ;;  %v9205_v46 = vpop.permute.xlu0 %2399  ;;  %v9207_v4 = vpop.permute.xlu1 %2484  ;;  %v10118_v21 = vld [vmem:[#allocation90_spill] sm:$0xff]  ;;  %v10119_v32 = vld [vmem:[#allocation52_spill] sm:$0xff] }
 0x6d4   : > { %v4978_v42 = vmax.f32 %v4108_v9, 0.0  ;;  %v5042_v17 = vmax.f32 %v4364_v1, 0.0  ;;  %6803 = vmatmul.mubr.msk.bf16.gmra.mrb[164].mxu1 %vm535_vm0, %v7035_v12  ;;  %10115 = vst [vmem:[#allocation14_spill] sm:$0xff] %v9205_v46  ;;  %10116 = vst [vmem:[#allocation50_spill] sm:$0xff] %v9207_v4  ;;  %v10117_v1 = vld [vmem:[#allocation54_spill] sm:$0xff] }
 0x6d5   : > { %v4976_v24 = vmax.f32 %v4100_v51, 0.0  ;;  %v5040_v54 = vmax.f32 %v4356_v41, 0.0  ;;  %6806 = vmatprep.mubr.msk.bf16.mxu1 %vm535_vm0, %v7036_v0  ;;  %v7037_v0 = vld [vmem:[%s9889_s8 + $0x388] sm:$0xff]  }
 0x6d6   : > { %v5212_v57 = vpack.c.bf16 %v4978_v42, %v4977_v36  ;;  %v9209_v56 = vpack.c.bf16 %v5042_v17, %v5041_v11  ;;  %v10120_v36 = vld [vmem:[#allocation86_spill] sm:$0xff]  ;;  %v10122_v17 = vld [vmem:[#allocation69_spill] sm:$0xff] }
 0x6d7   : > { %v5211_v5 = vpack.c.bf16 %v4976_v24, %v4975_v50  ;;  %v9211_v62 = vpack.c.bf16 %v5040_v54, %v5039_v29  ;;  %v6636_v48 = vpop.f32.mrb[56].mxu0  ;;  %v6700_v9 = vpop.f32.mrb[60].mxu1  ;;  %v7038_v29 = vld [vmem:[%s9889_s8 + $0x390] sm:$0xff]  }
 0x6d8   : > { %v4121_v12 = vadd.f32 %v6636_v48, %v10117_v1  ;;  %v4377_v15 = vadd.f32 %v6700_v9, %v10118_v21  ;;  %v4112_v60 = vpop.f32.mrb[57].mxu0  ;;  %v4368_v41 = vpop.f32.mrb[61].mxu1  ;;  %v10121_v54 = vld [vmem:[#allocation28_spill] sm:$0xff]  ;;  %v10123_v1 = vld [vmem:[#allocation27_spill] sm:$0xff] }
 0x6d9   : > { %v4113_v37 = vadd.f32 %v4112_v60, %v10119_v32  ;;  %v4369_v51 = vadd.f32 %v4368_v41, %v10120_v36  ;;  %v6637_v11 = vpop.f32.mrb[58].mxu0  ;;  %v6701_v24 = vpop.f32.mrb[62].mxu1  ;;  %6383 = vmatprep.subr.bf16.mxu0 %v5211_v5  ;;  %v10124_v60 = vld [vmem:[#allocation65_spill] sm:$0xff] }
 0x6da   : > { %v4124_v42 = vadd.f32 %v6637_v11, %v10121_v54  ;;  %v4380_v50 = vadd.f32 %v6701_v24, %v10122_v17  ;;  %v4115_v48 = vpop.f32.mrb[59].mxu0  ;;  %v4371_v9 = vpop.f32.mrb[63].mxu1  ;;  %6384 = vmatpush3.bf16.msra.mxu0 %v9100_v22  ;;  %v4981_v41 = vmax.f32 %v4121_v12, 0.0  ;;  %v5045_v36 = vmax.f32 %v4377_v15, 0.0 }
 0x6db   : > { %v4116_v21 = vadd.f32 %v4115_v48, %v10123_v1  ;;  %v4372_v32 = vadd.f32 %v4371_v9, %v10124_v60  ;;  %6385 = vmatprep.subr.bf16.mxu0 %v5212_v57  ;;  %v4979_v46 = vmax.f32 %v4113_v37, 0.0  ;;  %v5043_v43 = vmax.f32 %v4369_v51, 0.0  ;;  %v9230_v24 = vpop.permute.xlu0 %2489  ;;  %v9232_v22 = vpop.permute.xlu1 %2404  ;;  %v10127_v37 = vld [vmem:[#allocation56_spill] sm:$0xff]  ;;  %v7039_v1 = vld [vmem:[%s9889_s8 + $0x398] sm:$0xff]   ;;  %v10130_v60 = vld [vmem:[#allocation94_spill] sm:$0xff] }
 0x6dc   : > { %v4982_v5 = vmax.f32 %v4124_v42, 0.0  ;;  %v5046_v4 = vmax.f32 %v4380_v50, 0.0  ;;  %6807 = vmatmul.mubr.msk.bf16.gmra.mrb[168].mxu1 %vm535_vm0, %v7037_v0  ;;  %10125 = vst [vmem:[#allocation13_spill] sm:$0xff] %v9230_v24  ;;  %10126 = vst [vmem:[#allocation47_spill] sm:$0xff] %v9232_v22  ;;  %v10128_v42 = vld [vmem:[#allocation98_spill] sm:$0xff] }
 0x6dd   : > { %v4980_v11 = vmax.f32 %v4116_v21, 0.0  ;;  %v5044_v54 = vmax.f32 %v4372_v32, 0.0  ;;  %6810 = vmatprep.mubr.msk.bf16.mxu1 %vm535_vm0, %v7038_v29  ;;  %v10129_v21 = vld [vmem:[#allocation55_spill] sm:$0xff] }
 0x6de   : > { %v5214_v17 = vpack.c.bf16 %v4982_v5, %v4981_v41  ;;  %v9234_v48 = vpack.c.bf16 %v5046_v4, %v5045_v36  ;;  %6386 = vmatpush3.bf16.msra.mxu0 %v9093_v52  ;;  %v10131_v41 = vld [vmem:[#allocation31_spill] sm:$0xff]  ;;  %v10132_v5 = vld [vmem:[#allocation76_spill] sm:$0xff] }
 0x6df   : > { %v5213_v57 = vpack.c.bf16 %v4980_v11, %v4979_v46  ;;  %v9237_v12 = vpack.c.bf16 %v5044_v54, %v5043_v43  ;;  %v6640_v15 = vpop.f32.mrb[60].mxu0  ;;  %v6704_v0 = vpop.f32.mrb[64].mxu1  ;;  %v7040_v43 = vld [vmem:[%s9889_s8 + $0x3a0] sm:$0xff]  }
 0x6e0   : > { %v4137_v51 = vadd.f32 %v6640_v15, %v10127_v37  ;;  %v4393_v50 = vadd.f32 %v6704_v0, %v10128_v42  ;;  %v4128_v9 = vpop.f32.mrb[61].mxu0  ;;  %v4384_v29 = vpop.f32.mrb[65].mxu1  ;;  %v10133_v0 = vld [vmem:[#allocation30_spill] sm:$0xff]  ;;  %v10134_v42 = vld [vmem:[#allocation73_spill] sm:$0xff] }
 0x6e1   : > { %v4129_v4 = vadd.f32 %v4128_v9, %v10129_v21  ;;  %v4385_v32 = vadd.f32 %v4384_v29, %v10130_v60  ;;  %v6641_v52 = vpop.f32.mrb[62].mxu0  ;;  %v6705_v46 = vpop.f32.mrb[66].mxu1  ;;  %6387 = vmatprep.subr.bf16.mxu0 %v5213_v57 }
 0x6e2   : > { %v4140_v36 = vadd.f32 %v6641_v52, %v10131_v41  ;;  %v4396_v11 = vadd.f32 %v6705_v46, %v10132_v5  ;;  %v4131_v54 = vpop.f32.mrb[63].mxu0  ;;  %v4387_v15 = vpop.f32.mrb[67].mxu1  ;;  %6388 = vmatpush3.bf16.msra.mxu0 %v9129_v2  ;;  %v4985_v29 = vmax.f32 %v4137_v51, 0.0  ;;  %v5049_v21 = vmax.f32 %v4393_v50, 0.0 }
 0x6e3   : > { %v4132_v37 = vadd.f32 %v4131_v54, %v10133_v0  ;;  %v4388_v9 = vadd.f32 %v4387_v15, %v10134_v42  ;;  %6389 = vmatprep.subr.bf16.mxu0 %v5214_v17  ;;  %v9255_v24 = vpop.permute.xlu0 %2409  ;;  %v4983_v52 = vmax.f32 %v4129_v4, 0.0  ;;  %v5047_v41 = vmax.f32 %v4385_v32, 0.0  ;;  %v9258_v2 = vpop.permute.xlu1 %2494  ;;  %v10138_v4 = vld [vmem:[#allocation106_spill] sm:$0xff] }
 0x6e4   : > { %v4986_v57 = vmax.f32 %v4140_v36, 0.0  ;;  %v5050_v60 = vmax.f32 %v4396_v11, 0.0  ;;  %6811 = vmatmul.mubr.msk.bf16.gmra.mrb[172].mxu1 %vm535_vm0, %v7039_v1  ;;  %10135 = vst [vmem:[#allocation37_spill] sm:$0xff] %v9255_v24  ;;  %10136 = vst [vmem:[#allocation75_spill] sm:$0xff] %v9258_v2  ;;  %v10137_v36 = vld [vmem:[#allocation59_spill] sm:$0xff]  ;;  %v10139_v42 = vld [vmem:[#allocation58_spill] sm:$0xff] }
 0x6e5   : > { %v4984_v46 = vmax.f32 %v4132_v37, 0.0  ;;  %v5048_v5 = vmax.f32 %v4388_v9, 0.0  ;;  %6814 = vmatprep.mubr.msk.bf16.mxu1 %vm535_vm0, %v7040_v43  ;;  %v7041_v43 = vld [vmem:[%s9889_s8 + $0x3a8] sm:$0xff]  }
 0x6e6   : > { %v5216_v54 = vpack.c.bf16 %v4986_v57, %v4985_v29  ;;  %v9260_v0 = vpack.c.bf16 %v5050_v60, %v5049_v21  ;;  %6390 = vmatpush3.bf16.msra.mxu0 %v9125_v3  ;;  %v10140_v29 = vld [vmem:[#allocation102_spill] sm:$0xff]  ;;  %v7042_v60 = vld [vmem:[%s9889_s8 + $0x3b0] sm:$0xff]  }
 0x6e7   : > { %v5215_v17 = vpack.c.bf16 %v4984_v46, %v4983_v52  ;;  %v9263_v51 = vpack.c.bf16 %v5048_v5, %v5047_v41  ;;  %v6644_v50 = vpop.f32.mrb[64].mxu0  ;;  %v6708_v1 = vpop.f32.mrb[68].mxu1  ;;  %v10141_v52 = vld [vmem:[#allocation35_spill] sm:$0xff] }
 0x6e8   : > { %v4153_v11 = vadd.f32 %v6644_v50, %v10137_v36  ;;  %v4409_v32 = vadd.f32 %v6708_v1, %v10138_v4  ;;  %v4144_v15 = vpop.f32.mrb[65].mxu0  ;;  %v4400_v37 = vpop.f32.mrb[69].mxu1  ;;  %v10142_v46 = vld [vmem:[#allocation83_spill] sm:$0xff]  ;;  %v10143_v4 = vld [vmem:[#allocation33_spill] sm:$0xff] }
 0x6e9   : > { %v4145_v9 = vadd.f32 %v4144_v15, %v10139_v42  ;;  %v4401_v21 = vadd.f32 %v4400_v37, %v10140_v29  ;;  %v6645_v3 = vpop.f32.mrb[66].mxu0  ;;  %v6709_v57 = vpop.f32.mrb[70].mxu1  ;;  %6391 = vmatprep.subr.bf16.mxu0 %v5215_v17  ;;  %v10144_v37 = vld [vmem:[#allocation79_spill] sm:$0xff] }
 0x6ea   : > { %v4156_v41 = vadd.f32 %v6645_v3, %v10141_v52  ;;  %v4412_v5 = vadd.f32 %v6709_v57, %v10142_v46  ;;  %v4147_v50 = vpop.f32.mrb[67].mxu0  ;;  %v4403_v1 = vpop.f32.mrb[71].mxu1  ;;  %6392 = vmatpush3.bf16.msra.mxu0 %v9157_v53  ;;  %v4989_v17 = vmax.f32 %v4153_v11, 0.0  ;;  %v5053_v29 = vmax.f32 %v4409_v32, 0.0 }
 0x6eb   : > { %v9278_v36 = vpop.permute.xlu0 %2499  ;;  %v4148_v15 = vadd.f32 %v4147_v50, %v10143_v4  ;;  %v4404_v42 = vadd.f32 %v4403_v1, %v10144_v37  ;;  %6393 = vmatprep.subr.bf16.mxu0 %v5216_v54  ;;  %v4987_v3 = vmax.f32 %v4145_v9, 0.0  ;;  %v5051_v52 = vmax.f32 %v4401_v21, 0.0  ;;  %v9287_v50 = vpop.permute.xlu1 %2414  ;;  %v10145_v9 = vld [vmem:[#allocation116_spill] sm:$0xff]  ;;  %v7045_v1 = vld [vmem:[%s9889_s8 + $0x3c0] sm:$0xff]   ;;  %v10147_v4 = vld [vmem:[#allocation93_spill] sm:$0xff] }
 0x6ec   : > { %v4990_v2 = vmax.f32 %v4156_v41, 0.0  ;;  %v5054_v24 = vmax.f32 %v4412_v5, 0.0  ;;  %6815 = vmatmul.mubr.msk.bf16.gmra.mrb[176].mxu1 %vm535_vm0, %v7041_v43  ;;  %v9294_v43 = vld [vmem:[%s9891_s10 + $0x8] sm:$0xff] }
 0x6ed   : > { %v4988_v57 = vmax.f32 %v4148_v15, 0.0  ;;  %v5052_v46 = vmax.f32 %v4404_v42, 0.0  ;;  %6818 = vmatprep.mubr.msk.bf16.mxu1 %vm535_vm0, %v7042_v60  ;;  %v9310_v42 = vrot.slane %v9294_v43, %v8802_v38 }
 0x6ee   : > { %v5218_v53 = vpack.c.bf16 %v4990_v2, %v4989_v17  ;;  %v9284_v22 = vpack.c.bf16 %v5054_v24, %v5053_v29  ;;  %6394 = vmatpush3.bf16.msra.mxu0 %v9153_v10  ;;  %v7043_v24 = vld [vmem:[%s9889_s8 + $0x3b8] sm:$0xff]   ;;  %v10146_v10 = vld [vmem:[#allocation112_spill] sm:$0xff] }
 0x6ef   : > { %v5217_v54 = vpack.c.bf16 %v4988_v57, %v4987_v3  ;;  %v9289_v11 = vpack.c.bf16 %v5052_v46, %v5051_v52  ;;  %v6712_v32 = vpop.f32.mrb[72].mxu1  ;;  %v9300_v2 = vpop.permute.xlu0 %2419  ;;  %v10148_v17 = vld [vmem:[#allocation89_spill] sm:$0xff] }
 0x6f0   : > { %v4425_v21 = vadd.f32 %v6712_v32, %v10145_v9  ;;  %v4416_v41 = vpop.f32.mrb[73].mxu1  ;;  %v9314_v57 = vpop.permute.xlu1 %2504 }
 0x6f1   : > { %v4417_v60 = vadd.f32 %v4416_v41, %v10146_v10  ;;  %v6713_v5 = vpop.f32.mrb[74].mxu1  ;;  %6395 = vmatprep.subr.bf16.mxu0 %v5217_v54  ;;  %v10149_v41 = vld [vmem:[#allocation121_spill] sm:$0xff] }
 0x6f2   : > { %v4428_v15 = vadd.f32 %v6713_v5, %v10147_v4  ;;  %v4419_v37 = vpop.f32.mrb[75].mxu1  ;;  %6396 = vmatpush3.bf16.msra.mxu0 %v9185_v25  ;;  %v5057_v3 = vmax.f32 %v4425_v21, 0.0  ;;  %v5357_v25 = vcombine.high %v9310_v42, %v9310_v42  ;;  %v10150_v5 = vld [vmem:[#allocation119_spill] sm:$0xff]  ;;  %v7047_v4 = vld [vmem:[%s9889_s8 + $0x3d0] sm:$0xff]  }
 0x6f3   : > { %v4420_v29 = vadd.f32 %v4419_v37, %v10148_v17  ;;  %6397 = vmatprep.subr.bf16.mxu0 %v5218_v53  ;;  %v5055_v46 = vmax.f32 %v4417_v60, 0.0  ;;  %v9322_v9 = vpop.permute.xlu0 %2509  ;;  %v7046_v60 = vld [vmem:[%s9889_s8 + $0x3c8] sm:$0xff]  }
 0x6f4   : > { %v5058_v52 = vmax.f32 %v4428_v15, 0.0  ;;  %6819 = vmatmul.mubr.msk.bf16.gmra.mrb[180].mxu1 %vm535_vm0, %v7043_v24  ;;  %v10151_v15 = vld [vmem:[#allocation101_spill] sm:$0xff] }
 0x6f5   : > { %v5056_v54 = vmax.f32 %v4420_v29, 0.0  ;;  %6822 = vmatprep.mubr.msk.bf16.mxu1 %vm535_vm0, %v7045_v1  ;;  %v10152_v29 = vld [vmem:[#allocation97_spill] sm:$0xff] }
 0x6f6   : > { %v9317_v32 = vpack.c.bf16 %v5058_v52, %v5057_v3  ;;  %6398 = vmatpush3.bf16.msra.mxu0 %v9181_v28 }
 0x6f7   : > { %v9324_v53 = vpack.c.bf16 %v5056_v54, %v5055_v46  ;;  %v6716_v21 = vpop.f32.mrb[76].mxu1  ;;  %6405 = vmatprep.subr.bf16.mxu0 %v8987_v34  ;;  %v9338_v34 = vpop.permute.xlu1 %2424 }
 0x6f8   : > { %v4441_v24 = vadd.f32 %v6716_v21, %v10149_v41  ;;  %v4432_v10 = vpop.f32.mrb[77].mxu1 }
 0x6f9   : > { %v4433_v1 = vadd.f32 %v4432_v10, %v10150_v5  ;;  %v6717_v28 = vpop.f32.mrb[78].mxu1  ;;  %5482 = vmatmul.mubr.bf16.vlgmr.msra.gmra.mrb[72].mxu0 %v9083_v26  ;;  %v9343_v26 = vpop.permute.xlu0 %2429 }
 0x6fa   : > { %v4444_v37 = vadd.f32 %v6717_v28, %v10151_v15  ;;  %v4435_v17 = vpop.f32.mrb[79].mxu1  ;;  %6406 = vmatpush3.bf16.msra.mxu0 %v8895_v63  ;;  %5521 = vmatprep.mubr.bf16.mxu0 %v5357_v25  ;;  %v5061_v52 = vmax.f32 %v4441_v24, 0.0  ;;  %v10155_v15 = vld [vmem:[#allocation109_spill] sm:$0xff] }
 0x6fb   : > { %v4436_v3 = vadd.f32 %v4435_v17, %v10152_v29  ;;  %6407 = vmatprep.subr.bf16.mxu0 %v8985_v59  ;;  %v5059_v54 = vmax.f32 %v4433_v1, 0.0  ;;  %v10153_v59 = vld [vmem:[#allocation125_spill] sm:$0xff]  ;;  %v9356_v5 = vpop.permute.xlu1 %2514  ;;  %v10154_v1 = vld [vmem:[#allocation123_spill] sm:$0xff] }
 0x6fc   : > { %v5062_v46 = vmax.f32 %v4444_v37, 0.0  ;;  %6823 = vmatmul.mubr.msk.bf16.gmra.mrb[184].mxu1 %vm535_vm0, %v7046_v60  ;;  %v7048_v60 = vld [vmem:[%s9889_s8 + $0x3d8] sm:$0xff]  }
 0x6fd   : > { %v5060_v21 = vmax.f32 %v4436_v3, 0.0  ;;  %6826 = vmatprep.mubr.msk.bf16.mxu1 %vm535_vm0, %v7047_v4  ;;  %v10156_v29 = vld [vmem:[#allocation105_spill] sm:$0xff] }
 0x6fe   : > { %v9346_v41 = vpack.c.bf16 %v5062_v46, %v5061_v52  ;;  %6408 = vmatpush3.bf16.msra.mxu0 %v8891_v31  ;;  %v7049_v31 = vld [vmem:[%s9889_s8 + $0x3e0] sm:$0xff]  }
 0x6ff   : > { %v9349_v63 = vpack.c.bf16 %v5060_v21, %v5059_v54  ;;  %v6720_v25 = vpop.f32.mrb[80].mxu1  ;;  %6409 = vmatprep.subr.bf16.mxu0 %v9013_v6  ;;  %v9364_v6 = vpop.permute.xlu0 %2519 }
 0x700   : > { %v4457_v24 = vadd.f32 %v6720_v25, %v10153_v59  ;;  %v4448_v10 = vpop.f32.mrb[81].mxu1  ;;  %v9373_v59 = vpop.permute.xlu1 %2434 }
 0x701   : > { %v4449_v28 = vadd.f32 %v4448_v10, %v10154_v1  ;;  %v6721_v4 = vpop.f32.mrb[82].mxu1 }
 0x702   : > { %v4460_v37 = vadd.f32 %v6721_v4, %v10155_v15  ;;  %v4451_v17 = vpop.f32.mrb[83].mxu1  ;;  %6410 = vmatpush3.bf16.msra.mxu0 %v8919_v18  ;;  %v5065_v52 = vmax.f32 %v4457_v24, 0.0  ;;  %v10158_v4 = vld [vmem:[#allocation127_spill] sm:$0xff] }
 0x703   : > { %v4452_v3 = vadd.f32 %v4451_v17, %v10156_v29  ;;  %6411 = vmatprep.subr.bf16.mxu0 %v9010_v16  ;;  %v5063_v54 = vmax.f32 %v4449_v28, 0.0  ;;  %v10157_v16 = vld [vmem:[#allocation129_spill] sm:$0xff]  ;;  %v9382_v28 = vpop.permute.xlu0 %2439 }
 0x704   : > { %v5066_v46 = vmax.f32 %v4460_v37, 0.0  ;;  %6827 = vmatmul.mubr.msk.bf16.gmra.mrb[188].mxu1 %vm535_vm0, %v7048_v60  ;;  %v7050_v60 = vld [vmem:[%s9889_s8 + $0x3e8] sm:$0xff]   ;;  %v10159_v37 = vld [vmem:[#allocation117_spill] sm:$0xff] }
 0x705   : > { %v5064_v21 = vmax.f32 %v4452_v3, 0.0  ;;  %6830 = vmatprep.mubr.msk.bf16.mxu1 %vm535_vm0, %v7049_v31 }
 0x706   : > { %v9370_v25 = vpack.c.bf16 %v5066_v46, %v5065_v52  ;;  %6412 = vmatpush3.bf16.msra.mxu0 %v8915_v27  ;;  %v7051_v27 = vld [vmem:[%s9889_s8 + $0x3f0] sm:$0xff]  }
 0x707   : > { %v9375_v18 = vpack.c.bf16 %v5064_v21, %v5063_v54  ;;  %v6724_v10 = vpop.f32.mrb[84].mxu1  ;;  %6413 = vmatprep.subr.bf16.mxu0 %v9039_v20  ;;  %v10160_v20 = vld [vmem:[#allocation113_spill] sm:$0xff]  ;;  %v9393_v54 = vpop.permute.xlu1 %2604 }
 0x708   : > { %v4473_v24 = vadd.f32 %v6724_v10, %v10157_v16  ;;  %v4464_v1 = vpop.f32.mrb[85].mxu1 }
 0x709   : > { %v4465_v31 = vadd.f32 %v4464_v1, %v10158_v4  ;;  %v6725_v15 = vpop.f32.mrb[86].mxu1  ;;  %v9401_v1 = vpop.permute.xlu0 %2609 }
 0x70a   : > { %v4476_v17 = vadd.f32 %v6725_v15, %v10159_v37  ;;  %v4467_v29 = vpop.f32.mrb[87].mxu1  ;;  %6414 = vmatpush3.bf16.msra.mxu0 %v8943_v30  ;;  %v5069_v52 = vmax.f32 %v4473_v24, 0.0  ;;  %v5342_v30 = vcombine.high %v9294_v43, %v9294_v43  ;;  %v7052_v15 = vld [vmem:[%s9889_s8 + $0x3f8] sm:$0xff]  }
 0x70b   : > { %v4468_v3 = vadd.f32 %v4467_v29, %v10160_v20  ;;  %6415 = vmatprep.subr.bf16.mxu0 %v9036_v13  ;;  %v5067_v21 = vmax.f32 %v4465_v31, 0.0 }
 0x70c   : > { %v5070_v46 = vmax.f32 %v4476_v17, 0.0  ;;  %6831 = vmatmul.mubr.msk.bf16.gmra.mrb[192].mxu1 %vm535_vm0, %v7050_v60  ;;  %v10161_v60 = vld [vmem:[#allocation114_spill] sm:$0xff]  ;;  %v10163_v17 = vld [vmem:[#allocation91_spill] sm:$0xff]  ;;  %v9414_v20 = vrot.slane %v5342_v30, %v8802_v38 }
 0x70d   : > { %v5068_v10 = vmax.f32 %v4468_v3, 0.0  ;;  %6834 = vmatprep.mubr.msk.bf16.mxu1 %vm535_vm0, %v7051_v27  ;;  %v10162_v27 = vld [vmem:[#allocation110_spill] sm:$0xff]  ;;  %v9416_v3 = vpop.permute.xlu1 %2524 }
 0x70e   : > { %v9396_v16 = vpack.c.bf16 %v5070_v46, %v5069_v52  ;;  %6416 = vmatpush3.bf16.msra.mxu0 %v8939_v58 }
 0x70f   : > { %v9403_v13 = vpack.c.bf16 %v5068_v10, %v5067_v21  ;;  %v6728_v24 = vpop.f32.mrb[88].mxu1  ;;  %6417 = vmatprep.subr.bf16.mxu0 %v9067_v49  ;;  %v10164_v49 = vld [vmem:[#allocation87_spill] sm:$0xff]  ;;  %v9421_v10 = vpop.permute.xlu0 %2529 }
 0x710   : > { %v4489_v4 = vadd.f32 %v6728_v24, %v10161_v60  ;;  %v4480_v31 = vpop.f32.mrb[89].mxu1 }
 0x711   : > { %v4481_v37 = vadd.f32 %v4480_v31, %v10162_v27  ;;  %v6729_v58 = vpop.f32.mrb[90].mxu1 }
 0x712   : > { %v4492_v29 = vadd.f32 %v6729_v58, %v10163_v17  ;;  %v4483_v43 = vpop.f32.mrb[91].mxu1  ;;  %6418 = vmatpush3.bf16.msra.mxu0 %v8967_v45  ;;  %v5073_v46 = vmax.f32 %v4489_v4, 0.0  ;;  %v5358_v45 = vcombine.high %v9414_v20, %v9414_v20  ;;  %v10166_v17 = vld [vmem:[#allocation118_spill] sm:$0xff] }
 0x713   : > { %v4484_v52 = vadd.f32 %v4483_v43, %v10164_v49  ;;  %6419 = vmatprep.subr.bf16.mxu0 %v9062_v61  ;;  %v5071_v24 = vmax.f32 %v4481_v37, 0.0  ;;  %v10165_v61 = vld [vmem:[#allocation120_spill] sm:$0xff]  ;;  %v10167_v43 = vld [vmem:[#allocation99_spill] sm:$0xff] }
 0x714   : > { %v5074_v21 = vmax.f32 %v4492_v29, 0.0  ;;  %6835 = vmatmul.mubr.msk.bf16.gmra.mrb[196].mxu1 %vm535_vm0, %v7052_v15  ;;  %v9432_v15 = vpop.permute.xlu1 %2614 }
 0x715   : > { %v5072_v60 = vmax.f32 %v4484_v52, 0.0  ;;  %v9438_v52 = vpop.permute.xlu0 %2619 }
 0x716   : > { %v9423_v31 = vpack.c.bf16 %v5074_v21, %v5073_v46  ;;  %6420 = vmatpush3.bf16.msra.mxu0 %v8963_v23  ;;  %v10168_v46 = vld [vmem:[#allocation95_spill] sm:$0xff] }
 0x717   : > { %v9428_v30 = vpack.c.bf16 %v5072_v60, %v5071_v24  ;;  %v6732_v27 = vpop.f32.mrb[92].mxu1  ;;  %6427 = vmatprep.subr.bf16.mxu0 %v9211_v62 }
 0x718   : > { %v4505_v4 = vadd.f32 %v6732_v27, %v10165_v61  ;;  %v4496_v58 = vpop.f32.mrb[93].mxu1 }
 0x719   : > { %v4497_v37 = vadd.f32 %v4496_v58, %v10166_v17  ;;  %v6733_v29 = vpop.f32.mrb[94].mxu1  ;;  %5522 = vmatmul.mubr.bf16.vlgmr.msra.gmra.mrb[76].mxu0 %v9310_v42  ;;  %v9445_v42 = vpop.permute.xlu1 %2534 }
 0x71a   : > { %v4508_v23 = vadd.f32 %v6733_v29, %v10167_v43  ;;  %v4499_v49 = vpop.f32.mrb[95].mxu1  ;;  %6428 = vmatpush3.bf16.msra.mxu0 %v9102_v33  ;;  %5561 = vmatprep.mubr.bf16.mxu0 %v5358_v45  ;;  %v5077_v21 = vmax.f32 %v4505_v4, 0.0  ;;  %v10169_v45 = vld [vmem:[#allocation124_spill] sm:$0xff]  ;;  %v9451_v43 = vpop.permute.xlu0 %2539 }
 0x71b   : > { %v4500_v62 = vadd.f32 %v4499_v49, %v10168_v46  ;;  %6429 = vmatprep.subr.bf16.mxu0 %v9209_v56  ;;  %v5075_v60 = vmax.f32 %v4497_v37, 0.0  ;;  %v10170_v56 = vld [vmem:[#allocation122_spill] sm:$0xff] }
 0x71c   : > { %v5078_v24 = vmax.f32 %v4508_v23, 0.0  ;;  %v10171_v23 = vld [vmem:[#allocation107_spill] sm:$0xff] }
 0x71d   : > { %v5076_v27 = vmax.f32 %v4500_v62, 0.0 }
 0x71e   : > { %v9442_v61 = vpack.c.bf16 %v5078_v24, %v5077_v21  ;;  %6430 = vmatpush3.bf16.msra.mxu0 %v9095_v35  ;;  %v10172_v35 = vld [vmem:[#allocation103_spill] sm:$0xff] }
 0x71f   : > { %v9447_v58 = vpack.c.bf16 %v5076_v27, %v5075_v60  ;;  %v6736_v33 = vpop.f32.mrb[96].mxu1  ;;  %6431 = vmatprep.subr.bf16.mxu0 %v9237_v12  ;;  %v9458_v12 = vpop.permute.xlu1 %2624 }
 0x720   : > { %v4521_v17 = vadd.f32 %v6736_v33, %v10169_v45  ;;  %v4512_v29 = vpop.f32.mrb[97].mxu1  ;;  %v9463_v45 = vpop.permute.xlu0 %2629 }
 0x721   : > { %v4513_v4 = vadd.f32 %v4512_v29, %v10170_v56  ;;  %v6737_v37 = vpop.f32.mrb[98].mxu1 }
 0x722   : > { %v4524_v49 = vadd.f32 %v6737_v37, %v10171_v23  ;;  %v4515_v46 = vpop.f32.mrb[99].mxu1  ;;  %6432 = vmatpush3.bf16.msra.mxu0 %v9131_v47  ;;  %v5081_v21 = vmax.f32 %v4521_v17, 0.0  ;;  %v10173_v47 = vld [vmem:[#allocation128_spill] sm:$0xff]  ;;  %v10174_v17 = vld [vmem:[#allocation126_spill] sm:$0xff] }
 0x723   : > { %v4516_v62 = vadd.f32 %v4515_v46, %v10172_v35  ;;  %6433 = vmatprep.subr.bf16.mxu0 %v9234_v48  ;;  %v5079_v60 = vmax.f32 %v4513_v4, 0.0  ;;  %v10175_v46 = vld [vmem:[#allocation115_spill] sm:$0xff] }
 0x724   : > { %v5082_v24 = vmax.f32 %v4524_v49, 0.0 }
 0x725   : > { %v5080_v27 = vmax.f32 %v4516_v62, 0.0  ;;  %v9472_v62 = vpop.permute.xlu1 %2544 }
 0x726   : > { %v9460_v33 = vpack.c.bf16 %v5082_v24, %v5081_v21  ;;  %6434 = vmatpush3.bf16.msra.mxu0 %v9127_v39  ;;  %v10176_v39 = vld [vmem:[#allocation111_spill] sm:$0xff] }
 0x727   : > { %v9465_v29 = vpack.c.bf16 %v5080_v27, %v5079_v60  ;;  %v6740_v56 = vpop.f32.mrb[100].mxu1  ;;  %6435 = vmatprep.subr.bf16.mxu0 %v9263_v51  ;;  %v9476_v51 = vpop.permute.xlu0 %2549 }
 0x728   : > { %v4537_v37 = vadd.f32 %v6740_v56, %v10173_v47  ;;  %v4528_v48 = vpop.f32.mrb[101].mxu1 }
 0x729   : > { %v4529_v23 = vadd.f32 %v4528_v48, %v10174_v17  ;;  %v6741_v49 = vpop.f32.mrb[102].mxu1 }
 0x72a   : > { %v4540_v4 = vadd.f32 %v6741_v49, %v10175_v46  ;;  %v4531_v35 = vpop.f32.mrb[103].mxu1  ;;  %6436 = vmatpush3.bf16.msra.mxu0 %v9159_v7  ;;  %v5085_v24 = vmax.f32 %v4537_v37, 0.0  ;;  %v9487_v7 = vld [vmem:[%s9891_s10 + $0x10] sm:$0xff]  ;;  %v9490_v49 = vpop.permute.xlu1 %2634 }
 0x72b   : > { %v4532_v21 = vadd.f32 %v4531_v35, %v10176_v39  ;;  %6437 = vmatprep.subr.bf16.mxu0 %v9260_v0  ;;  %v5083_v27 = vmax.f32 %v4529_v23, 0.0  ;;  %v9499_v35 = vpop.permute.xlu0 %2639 }
 0x72c   : > { %v5086_v60 = vmax.f32 %v4540_v4, 0.0 }
 0x72d   : > { %v5084_v56 = vmax.f32 %v4532_v21, 0.0 }
 0x72e   : > { %v9478_v47 = vpack.c.bf16 %v5086_v60, %v5085_v24  ;;  %6438 = vmatpush3.bf16.msra.mxu0 %v9155_v55 }
 0x72f   : > { %v9481_v48 = vpack.c.bf16 %v5084_v56, %v5083_v27  ;;  %v6744_v17 = vpop.f32.mrb[104].mxu1  ;;  %6439 = vmatprep.subr.bf16.mxu0 %v9289_v11  ;;  %v9497_v11 = vrot.slane %v9487_v7, %v8802_v38  ;;  %v9508_v27 = vpop.permute.xlu1 %2554 }
 0x730   : > { %v4553_v0 = vadd.f32 %v6744_v17, %v9060_v40  ;;  %v4544_v37 = vpop.f32.mrb[105].mxu1 }
 0x731   : > { %v4545_v23 = vadd.f32 %v4544_v37, %v9008_v8  ;;  %v6745_v46 = vpop.f32.mrb[106].mxu1  ;;  %v9514_v37 = vpop.permute.xlu0 %2559 }
 0x732   : > { %v4556_v55 = vadd.f32 %v6745_v46, %v9089_v19  ;;  %v4547_v4 = vpop.f32.mrb[107].mxu1  ;;  %6440 = vmatpush3.bf16.msra.mxu0 %v9187_v44  ;;  %v5089_v40 = vmax.f32 %v4553_v0, 0.0  ;;  %v10177_v19 = vld [vmem:[#allocation68_spill] sm:$0xff]  ;;  %v5374_v44 = vcombine.high %v9497_v11, %v9497_v11 }
 0x733   : > { %v4548_v39 = vadd.f32 %v4547_v4, %v9032_v14  ;;  %6441 = vmatprep.subr.bf16.mxu0 %v9284_v22  ;;  %v5087_v24 = vmax.f32 %v4545_v23, 0.0  ;;  %v10178_v14 = vld [vmem:[#allocation32_spill] sm:$0xff]  ;;  %v10179_v23 = vld [vmem:[#allocation11_spill] sm:$0xff]  ;;  %v10180_v4 = vld [vmem:[#allocation14_spill] sm:$0xff] }
 0x734   : > { %v5090_v21 = vmax.f32 %v4556_v55, 0.0 }
 0x735   : > { %v5088_v8 = vmax.f32 %v4548_v39, 0.0 }
 0x736   : > { %v9503_v60 = vpack.c.bf16 %v5090_v21, %v5089_v40  ;;  %6442 = vmatpush3.bf16.msra.mxu0 %v10177_v19  ;;  %v10181_v21 = vld [vmem:[#allocation43_spill] sm:$0xff]  ;;  %v9522_v19 = vpop.permute.xlu1 %2644 }
 0x737   : > { %v9510_v56 = vpack.c.bf16 %v5088_v8, %v5087_v24  ;;  %v6748_v17 = vpop.f32.mrb[108].mxu1  ;;  %6449 = vmatprep.subr.bf16.mxu0 %v9428_v30 }
 0x738   : > { %v4569_v22 = vadd.f32 %v6748_v17, %v10178_v14  ;;  %v4560_v0 = vpop.f32.mrb[109].mxu1 }
 0x739   : > { %v4561_v46 = vadd.f32 %v4560_v0, %v10179_v23  ;;  %v6749_v55 = vpop.f32.mrb[110].mxu1  ;;  %5562 = vmatmul.mubr.bf16.vlgmr.msra.gmra.mrb[80].mxu0 %v9414_v20  ;;  %v9527_v20 = vpop.permute.xlu0 %2649 }
 0x73a   : > { %v4572_v39 = vadd.f32 %v6749_v55, %v10180_v4  ;;  %v4563_v40 = vpop.f32.mrb[111].mxu1  ;;  %6450 = vmatpush3.bf16.msra.mxu0 %v9324_v53  ;;  %5601 = vmatprep.mubr.bf16.mxu0 %v5374_v44  ;;  %v5093_v30 = vmax.f32 %v4569_v22, 0.0  ;;  %v10182_v22 = vld [vmem:[#allocation47_spill] sm:$0xff] }
 0x73b   : > { %v4564_v24 = vadd.f32 %v4563_v40, %v10181_v21  ;;  %6451 = vmatprep.subr.bf16.mxu0 %v9423_v31  ;;  %v5091_v17 = vmax.f32 %v4561_v46, 0.0  ;;  %v9536_v40 = vpop.permute.xlu1 %2564 }
 0x73c   : > { %v5094_v8 = vmax.f32 %v4572_v39, 0.0 }
 0x73d   : > { %v5092_v14 = vmax.f32 %v4564_v24, 0.0 }
 0x73e   : > { %v9524_v0 = vpack.c.bf16 %v5094_v8, %v5093_v30  ;;  %6452 = vmatpush3.bf16.msra.mxu0 %v9317_v32  ;;  %v10183_v32 = vld [vmem:[#allocation37_spill] sm:$0xff] }
 0x73f   : > { %v9529_v23 = vpack.c.bf16 %v5092_v14, %v5091_v17  ;;  %v6752_v53 = vpop.f32.mrb[112].mxu1  ;;  %6453 = vmatprep.subr.bf16.mxu0 %v9447_v58  ;;  %v9540_v58 = vpop.permute.xlu0 %2569 }
 0x740   : > { %v4585_v44 = vadd.f32 %v6752_v53, %v9287_v50  ;;  %v4576_v31 = vpop.f32.mrb[113].mxu1 }
 0x741   : > { %v4577_v55 = vadd.f32 %v4576_v31, %v10182_v22  ;;  %v6753_v4 = vpop.f32.mrb[114].mxu1  ;;  %v9549_v31 = vpop.permute.xlu1 %2654 }
 0x742   : > { %v4588_v46 = vadd.f32 %v6753_v4, %v9300_v2  ;;  %v4579_v39 = vpop.f32.mrb[115].mxu1  ;;  %6454 = vmatpush3.bf16.msra.mxu0 %v9349_v63  ;;  %v5097_v24 = vmax.f32 %v4585_v44, 0.0 }
 0x743   : > { %v4580_v21 = vadd.f32 %v4579_v39, %v10183_v32  ;;  %6455 = vmatprep.subr.bf16.mxu0 %v9442_v61  ;;  %v5095_v50 = vmax.f32 %v4577_v55, 0.0  ;;  %v9554_v4 = vpop.permute.xlu0 %2659 }
 0x744   : > { %v5098_v30 = vmax.f32 %v4588_v46, 0.0 }
 0x745   : > { %v5096_v8 = vmax.f32 %v4580_v21, 0.0 }
 0x746   : > { %v9542_v17 = vpack.c.bf16 %v5098_v30, %v5097_v24  ;;  %6456 = vmatpush3.bf16.msra.mxu0 %v9346_v41 }
 0x747   : > { %v9545_v2 = vpack.c.bf16 %v5096_v8, %v5095_v50  ;;  %v6756_v14 = vpop.f32.mrb[116].mxu1  ;;  %6457 = vmatprep.subr.bf16.mxu0 %v9465_v29  ;;  %v9569_v30 = vpop.permute.xlu0 %2579  ;;  %v10185_v50 = vld [vmem:[#allocation130_spill] sm:$0xff] }
 0x748   : > { %v4601_v63 = vadd.f32 %v6756_v14, %v9373_v59  ;;  %v4592_v53 = vpop.f32.mrb[117].mxu1 }
 0x749   : > { %v4593_v61 = vadd.f32 %v4592_v53, %v9338_v34  ;;  %v6757_v44 = vpop.f32.mrb[118].mxu1  ;;  %v5359_v34 = vcombine.high %v9487_v7, %v9487_v7 }
 0x74a   : > { %v4604_v22 = vadd.f32 %v6757_v44, %v9382_v28  ;;  %v4595_v55 = vpop.f32.mrb[119].mxu1  ;;  %6458 = vmatpush3.bf16.msra.mxu0 %v9375_v18  ;;  %v5101_v29 = vmax.f32 %v4601_v63, 0.0  ;;  %v9563_v28 = vpop.permute.xlu1 %2574  ;;  %v10186_v63 = vld [vmem:[#allocation64_spill] sm:$0xff] }
 0x74b   : > { %v4596_v41 = vadd.f32 %v4595_v55, %v9343_v26  ;;  %6459 = vmatprep.subr.bf16.mxu0 %v9460_v33  ;;  %v5099_v59 = vmax.f32 %v4593_v61, 0.0  ;;  %v10184_v26 = vld [vmem:[#allocation29_spill] sm:$0xff]  ;;  %v9575_v7 = vrot.slane %v5359_v34, %v8802_v38  ;;  %v10187_v61 = vld [vmem:[#allocation66_spill] sm:$0xff] }
 0x74c   : > { %v5102_v46 = vmax.f32 %v4604_v22, 0.0 }
 0x74d   : > { %v5100_v39 = vmax.f32 %v4596_v41, 0.0 }
 0x74e   : > { %v9558_v32 = vpack.c.bf16 %v5102_v46, %v5101_v29  ;;  %6460 = vmatpush3.bf16.msra.mxu0 %v9370_v25  ;;  %v9579_v55 = vpop.permute.xlu1 %2664 }
 0x74f   : > { %v9565_v18 = vpack.c.bf16 %v5100_v39, %v5099_v59  ;;  %v6760_v21 = vpop.f32.mrb[120].mxu1  ;;  %6461 = vmatprep.subr.bf16.mxu0 %v9481_v48  ;;  %v5375_v59 = vcombine.high %v9575_v7, %v9575_v7 }
 0x750   : > { %v4617_v33 = vadd.f32 %v6760_v21, %v10184_v26  ;;  %v4608_v24 = vpop.f32.mrb[121].mxu1  ;;  %v10188_v21 = vld [vmem:[#allocation34_spill] sm:$0xff] }
 0x751   : > { %v4609_v8 = vadd.f32 %v4608_v24, %v10185_v50  ;;  %v6761_v14 = vpop.f32.mrb[122].mxu1 }
 0x752   : > { %v4620_v25 = vadd.f32 %v6761_v14, %v10186_v63  ;;  %v4611_v53 = vpop.f32.mrb[123].mxu1  ;;  %6462 = vmatpush3.bf16.msra.mxu0 %v9403_v13  ;;  %v5105_v48 = vmax.f32 %v4617_v33, 0.0  ;;  %v9584_v13 = vpop.permute.xlu0 %2669 }
 0x753   : > { %v4612_v44 = vadd.f32 %v4611_v53, %v10187_v61  ;;  %6463 = vmatprep.subr.bf16.mxu0 %v9478_v47  ;;  %v5103_v41 = vmax.f32 %v4609_v8, 0.0  ;;  %v10189_v47 = vld [vmem:[#allocation12_spill] sm:$0xff]  ;;  %v10190_v8 = vld [vmem:[#allocation70_spill] sm:$0xff] }
 0x754   : > { %v5106_v22 = vmax.f32 %v4620_v25, 0.0  ;;  %v10191_v25 = vld [vmem:[#allocation45_spill] sm:$0xff] }
 0x755   : > { %v5104_v29 = vmax.f32 %v4612_v44, 0.0 }
 0x756   : > { %v5276_v46 = vpack.c.bf16 %v5106_v22, %v5105_v48  ;;  %6464 = vmatpush3.bf16.msra.mxu0 %v9396_v16  ;;  %v9591_v16 = vpop.permute.xlu1 %2584  ;;  %v9594_v48 = vpop.permute.xlu0 %2589 }
 0x757   : > { %v5275_v39 = vpack.c.bf16 %v5104_v29, %v5103_v41  ;;  %v6764_v34 = vpop.f32.mrb[124].mxu1 }
 0x758   : > { %v4633_v26 = vadd.f32 %v6764_v34, %v10188_v21  ;;  %v4624_v24 = vpop.f32.mrb[125].mxu1  ;;  %v10192_v34 = vld [vmem:[#allocation75_spill] sm:$0xff] }
 0x759   : > { %v4625_v33 = vadd.f32 %v4624_v24, %v10189_v47  ;;  %v6765_v50 = vpop.f32.mrb[126].mxu1  ;;  %5602 = vmatmul.mubr.bf16.vlgmr.msra.gmra.mrb[84].mxu0 %v9497_v11  ;;  %6471 = vmatprep.subr.bf16.mxu0 %v5275_v39  ;;  %v10193_v24 = vld [vmem:[#allocation50_spill] sm:$0xff] }
 0x75a   : > { %v4636_v14 = vadd.f32 %v6765_v50, %v10190_v8  ;;  %v4627_v63 = vpop.f32.mrb[127].mxu1  ;;  %6472 = vmatpush3.bf16.msra.mxu0 %v9510_v56  ;;  %5641 = vmatprep.mubr.bf16.mxu0 %v5375_v59  ;;  %v5109_v61 = vmax.f32 %v4633_v26, 0.0  ;;  %v9598_v59 = vpop.permute.xlu1 %2674  ;;  %v10194_v8 = vld [vmem:[#allocation13_spill] sm:$0xff] }
 0x75b   : > { %v4628_v53 = vadd.f32 %v4627_v63, %v10191_v25  ;;  %6473 = vmatprep.subr.bf16.mxu0 %v5276_v46  ;;  %v5107_v22 = vmax.f32 %v4625_v33, 0.0  ;;  %v9603_v33 = vpop.permute.xlu0 %2679 }
 0x75c   : > { %v5110_v44 = vmax.f32 %v4636_v14, 0.0 }
 0x75d   : > { %v5108_v41 = vmax.f32 %v4628_v53, 0.0 }
 0x75e   : > { %v5278_v29 = vpack.c.bf16 %v5110_v44, %v5109_v61  ;;  %6474 = vmatpush3.bf16.msra.mxu0 %v9503_v60  ;;  %v9607_v44 = vpop.permute.xlu1 %2594 }
 0x75f   : > { %v5277_v11 = vpack.c.bf16 %v5108_v41, %v5107_v22  ;;  %v6768_v39 = vpop.f32.mrb[128].mxu1 }
 0x760   : > { %v4649_v21 = vadd.f32 %v6768_v39, %v10192_v34  ;;  %v4640_v56 = vpop.f32.mrb[129].mxu1 }
 0x761   : > { %v4641_v47 = vadd.f32 %v4640_v56, %v10193_v24  ;;  %v6769_v50 = vpop.f32.mrb[130].mxu1  ;;  %6475 = vmatprep.subr.bf16.mxu0 %v5277_v11 }
 0x762   : > { %v4652_v46 = vadd.f32 %v6769_v50, %v9278_v36  ;;  %v4643_v26 = vpop.f32.mrb[131].mxu1  ;;  %6476 = vmatpush3.bf16.msra.mxu0 %v9529_v23  ;;  %v5113_v14 = vmax.f32 %v4649_v21, 0.0  ;;  %v9610_v23 = vpop.permute.xlu0 %2599 }
 0x763   : > { %v4644_v60 = vadd.f32 %v4643_v26, %v10194_v8  ;;  %6477 = vmatprep.subr.bf16.mxu0 %v5278_v29  ;;  %v5111_v25 = vmax.f32 %v4641_v47, 0.0  ;;  %v9616_v47 = vpop.permute.xlu1 %2764 }
 0x764   : > { %v5114_v63 = vmax.f32 %v4652_v46, 0.0 }
 0x765   : > { %v5112_v53 = vmax.f32 %v4644_v60, 0.0 }
 0x766   : > { %v5280_v61 = vpack.c.bf16 %v5114_v63, %v5113_v14  ;;  %6478 = vmatpush3.bf16.msra.mxu0 %v9524_v0 }
 0x767   : > { %v5279_v22 = vpack.c.bf16 %v5112_v53, %v5111_v25  ;;  %v6772_v41 = vpop.f32.mrb[132].mxu1  ;;  %v9634_v53 = vpop.permute.xlu1 %2684 }
 0x768   : > { %v4665_v36 = vadd.f32 %v6772_v41, %v9356_v5  ;;  %v4656_v11 = vpop.f32.mrb[133].mxu1 }
 0x769   : > { %v4657_v39 = vadd.f32 %v4656_v11, %v9314_v57  ;;  %v6773_v34 = vpop.f32.mrb[134].mxu1  ;;  %6479 = vmatprep.subr.bf16.mxu0 %v5279_v22  ;;  %v9619_v57 = vpop.permute.xlu0 %2769 }
 0x76a   : > { %v4668_v29 = vadd.f32 %v6773_v34, %v9364_v6  ;;  %v4659_v21 = vpop.f32.mrb[135].mxu1  ;;  %6480 = vmatpush3.bf16.msra.mxu0 %v9545_v2  ;;  %v5117_v56 = vmax.f32 %v4665_v36, 0.0  ;;  %v9624_v6 = vld [vmem:[%s9891_s10 + $0x18] sm:$0xff] }
 0x76b   : > { %v4660_v0 = vadd.f32 %v4659_v21, %v9322_v9  ;;  %6481 = vmatprep.subr.bf16.mxu0 %v5280_v61  ;;  %v5115_v5 = vmax.f32 %v4657_v39, 0.0 }
 0x76c   : > { %v5118_v24 = vmax.f32 %v4668_v29, 0.0  ;;  %v9647_v29 = vpop.permute.xlu1 %2774 }
 0x76d   : > { %v5116_v50 = vmax.f32 %v4660_v0, 0.0  ;;  %v9637_v41 = vpop.permute.xlu0 %2689 }
 0x76e   : > { %v5282_v46 = vpack.c.bf16 %v5118_v24, %v5117_v56  ;;  %6482 = vmatpush3.bf16.msra.mxu0 %v9542_v17  ;;  %v9632_v17 = vrot.slane %v9624_v6, %v8802_v38 }
 0x76f   : > { %v5281_v26 = vpack.c.bf16 %v5116_v50, %v5115_v5  ;;  %v6776_v8 = vpop.f32.mrb[136].mxu1 }
 0x770   : > { %v4681_v9 = vadd.f32 %v6776_v8, %v9445_v42  ;;  %v4672_v2 = vpop.f32.mrb[137].mxu1 }
 0x771   : > { %v4673_v60 = vadd.f32 %v4672_v2, %v9416_v3  ;;  %v6777_v14 = vpop.f32.mrb[138].mxu1  ;;  %6483 = vmatprep.subr.bf16.mxu0 %v5281_v26 }
 0x772   : > { %v4684_v63 = vadd.f32 %v6777_v14, %v9451_v43  ;;  %v4675_v25 = vpop.f32.mrb[139].mxu1  ;;  %6484 = vmatpush3.bf16.msra.mxu0 %v9565_v18  ;;  %v5121_v42 = vmax.f32 %v4681_v9, 0.0  ;;  %v5391_v43 = vcombine.high %v9632_v17, %v9632_v17  ;;  %v9657_v9 = vpop.permute.xlu1 %2694 }
 0x773   : > { %v4676_v61 = vadd.f32 %v4675_v25, %v9421_v10  ;;  %6485 = vmatprep.subr.bf16.mxu0 %v5282_v46  ;;  %v5119_v3 = vmax.f32 %v4673_v60, 0.0 }
 0x774   : > { %v5122_v22 = vmax.f32 %v4684_v63, 0.0 }
 0x775   : > { %v5120_v36 = vmax.f32 %v4676_v61, 0.0 }
 0x776   : > { %v9639_v11 = vpack.c.bf16 %v5122_v22, %v5121_v42  ;;  %6486 = vmatpush3.bf16.msra.mxu0 %v9558_v32  ;;  %v9652_v32 = vpop.permute.xlu0 %2779 }
 0x777   : > { %v9644_v18 = vpack.c.bf16 %v5120_v36, %v5119_v3  ;;  %v6780_v39 = vpop.f32.mrb[140].mxu1  ;;  %v9667_v3 = vpop.permute.xlu1 %2784 }
 0x778   : > { %v4697_v34 = vadd.f32 %v6780_v39, %v9508_v27  ;;  %v4688_v10 = vpop.f32.mrb[141].mxu1 }
 0x779   : > { %v4689_v21 = vadd.f32 %v4688_v10, %v9472_v62  ;;  %v6781_v0 = vpop.f32.mrb[142].mxu1  ;;  %5642 = vmatmul.mubr.bf16.vlgmr.msra.gmra.mrb[88].mxu0 %v9575_v7 }
 0x77a   : > { %v4700_v56 = vadd.f32 %v6781_v0, %v9514_v37  ;;  %v4691_v24 = vpop.f32.mrb[143].mxu1  ;;  %5681 = vmatprep.mubr.bf16.mxu0 %v5391_v43  ;;  %v5125_v50 = vmax.f32 %v4697_v34, 0.0  ;;  %v9662_v60 = vpop.permute.xlu0 %2699 }
 0x77b   : > { %v4692_v5 = vadd.f32 %v4691_v24, %v9476_v51  ;;  %v5123_v26 = vmax.f32 %v4689_v21, 0.0  ;;  %v9678_v24 = vpop.permute.xlu1 %2704 }
 0x77c   : > { %v5126_v46 = vmax.f32 %v4700_v56, 0.0 }
 0x77d   : > { %v5124_v27 = vmax.f32 %v4692_v5, 0.0 }
 0x77e   : > { %v9655_v8 = vpack.c.bf16 %v5126_v46, %v5125_v50 }
 0x77f   : > { %v9659_v62 = vpack.c.bf16 %v5124_v27, %v5123_v26  ;;  %v6784_v2 = vpop.f32.mrb[144].mxu1 }
 0x780   : > { %v4713_v7 = vadd.f32 %v6784_v2, %v9563_v28  ;;  %v4704_v37 = vpop.f32.mrb[145].mxu1  ;;  %v9671_v28 = vpop.permute.xlu0 %2789 }
 0x781   : > { %v4705_v14 = vadd.f32 %v4704_v37, %v9536_v40  ;;  %v6785_v63 = vpop.f32.mrb[146].mxu1 }
 0x782   : > { %v4716_v51 = vadd.f32 %v6785_v63, %v9569_v30  ;;  %v4707_v25 = vpop.f32.mrb[147].mxu1  ;;  %v5129_v42 = vmax.f32 %v4713_v7, 0.0 }
 0x783   : > { %v4708_v61 = vadd.f32 %v4707_v25, %v9540_v58  ;;  %v5127_v36 = vmax.f32 %v4705_v14, 0.0 }
 0x784   : > { %v5130_v22 = vmax.f32 %v4716_v51, 0.0  ;;  %v9681_v27 = vpop.permute.xlu0 %2709 }
 0x785   : > { %v5128_v43 = vmax.f32 %v4708_v61, 0.0  ;;  %v9690_v61 = vpop.permute.xlu1 %2794 }
 0x786   : > { %v9669_v39 = vpack.c.bf16 %v5130_v22, %v5129_v42 }
 0x787   : > { %v9673_v34 = vpack.c.bf16 %v5128_v43, %v5127_v36  ;;  %v6788_v10 = vpop.f32.mrb[148].mxu1 }
 0x788   : > { %v4729_v40 = vadd.f32 %v6788_v10, %v9607_v44  ;;  %v4720_v21 = vpop.f32.mrb[149].mxu1  ;;  %v9694_v10 = vpop.permute.xlu0 %2799 }
 0x789   : > { %v4721_v30 = vadd.f32 %v4720_v21, %v9591_v16  ;;  %v6789_v0 = vpop.f32.mrb[150].mxu1 }
 0x78a   : > { %v4732_v58 = vadd.f32 %v6789_v0, %v9610_v23  ;;  %v4723_v56 = vpop.f32.mrb[151].mxu1  ;;  %v5133_v50 = vmax.f32 %v4729_v40, 0.0 }
 0x78b   : > { %v4724_v5 = vadd.f32 %v4723_v56, %v9594_v48  ;;  %v5131_v2 = vmax.f32 %v4721_v30, 0.0 }
 0x78c   : > { %v5134_v46 = vmax.f32 %v4732_v58, 0.0  ;;  %v6377_v26 = vpop.f32.mrb[68].mxu0 }
 0x78d   : > { %v5132_v7 = vmax.f32 %v4724_v5, 0.0  ;;  %v6378_v37 = vpop.f32.mrb[69].mxu0  ;;  %v9697_v5 = vpop.permute.xlu1 %2714 }
 0x78e   : > { %v9683_v44 = vpack.c.bf16 %v5134_v46, %v5133_v50  ;;  %v9685_v14 = vadd.f32 %v6378_v37, %v6377_v26  ;;  %v6380_v16 = vpop.f32.mrb[70].mxu0  ;;  %v9700_v26 = vpop.permute.xlu0 %2719 }
 0x78f   : > { %v9687_v63 = vpack.c.bf16 %v5132_v7, %v5131_v2  ;;  %v6792_v23 = vpop.f32.mrb[152].mxu1  ;;  %v6381_v51 = vpop.f32.mrb[71].mxu0 }
 0x790   : > { %v4745_v25 = vadd.f32 %v6792_v23, %v9432_v15  ;;  %v4736_v48 = vpop.f32.mrb[153].mxu1 }
 0x791   : > { %v4737_v42 = vadd.f32 %v4736_v48, %v9393_v54  ;;  %v6793_v22 = vpop.f32.mrb[154].mxu1  ;;  %v9706_v51 = vpop.permute.xlu1 %2804 }
 0x792   : > { %v4748_v36 = vadd.f32 %v6793_v22, %v9438_v52  ;;  %v4739_v43 = vpop.f32.mrb[155].mxu1  ;;  %v5137_v21 = vmax.f32 %v4745_v25, 0.0 }
 0x793   : > { %v4740_v40 = vadd.f32 %v4739_v43, %v9401_v1  ;;  %v5135_v0 = vmax.f32 %v4737_v42, 0.0 }
 0x794   : > { %v5138_v30 = vmax.f32 %v4748_v36, 0.0 }
 0x795   : > { %v5136_v58 = vmax.f32 %v4740_v40, 0.0 }
 0x796   : > { %v5292_v56 = vpack.c.bf16 %v5138_v30, %v5137_v21  ;;  %v9715_v21 = vpop.permute.xlu1 %2724 }
 0x797   : > { %v5291_v15 = vpack.c.bf16 %v5136_v58, %v5135_v0  ;;  %v6796_v50 = vpop.f32.mrb[156].mxu1 }
 0x798   : > { %v4761_v46 = vadd.f32 %v6796_v50, %v9490_v49  ;;  %v4752_v54 = vpop.f32.mrb[157].mxu1 }
 0x799   : > { %v4753_v52 = vadd.f32 %v4752_v54, %v9458_v12  ;;  %v6797_v2 = vpop.f32.mrb[158].mxu1  ;;  %6493 = vmatprep.subr.bf16.mxu0 %v5291_v15  ;;  %v9709_v12 = vpop.permute.xlu0 %2809 }
 0x79a   : > { %v4764_v1 = vadd.f32 %v6797_v2, %v9499_v35  ;;  %v4755_v7 = vpop.f32.mrb[159].mxu1  ;;  %6494 = vmatpush3.bf16.msra.mxu0 %v9644_v18  ;;  %v5141_v16 = vmax.f32 %v4761_v46, 0.0 }
 0x79b   : > { %v4756_v37 = vadd.f32 %v4755_v7, %v9463_v45  ;;  %6495 = vmatprep.subr.bf16.mxu0 %v5292_v56  ;;  %v5139_v49 = vmax.f32 %v4753_v52, 0.0 }
 0x79c   : > { %v5142_v23 = vmax.f32 %v4764_v1, 0.0 }
 0x79d   : > { %v5140_v25 = vmax.f32 %v4756_v37, 0.0  ;;  %v9718_v58 = vpop.permute.xlu0 %2729 }
 0x79e   : > { %v5294_v48 = vpack.c.bf16 %v5142_v23, %v5141_v16  ;;  %6496 = vmatpush3.bf16.msra.mxu0 %v9639_v11 }
 0x79f   : > { %v5293_v42 = vpack.c.bf16 %v5140_v25, %v5139_v49  ;;  %v6800_v22 = vpop.f32.mrb[160].mxu1 }
 0x7a0   : > { %v4777_v35 = vadd.f32 %v6800_v22, %v9549_v31  ;;  %v4768_v36 = vpop.f32.mrb[161].mxu1 }
 0x7a1   : > { %v4769_v18 = vadd.f32 %v4768_v36, %v9522_v19  ;;  %v6801_v45 = vpop.f32.mrb[162].mxu1  ;;  %6497 = vmatprep.subr.bf16.mxu0 %v5293_v42  ;;  %v9727_v1 = vpop.permute.xlu0 %2819 }
 0x7a2   : > { %v4780_v43 = vadd.f32 %v6801_v45, %v9554_v4  ;;  %v4771_v40 = vpop.f32.mrb[163].mxu1  ;;  %6498 = vmatpush3.bf16.msra.mxu0 %v9659_v62  ;;  %v5145_v30 = vmax.f32 %v4777_v35, 0.0  ;;  %v9722_v62 = vpop.permute.xlu1 %2814 }
 0x7a3   : > { %v4772_v11 = vadd.f32 %v4771_v40, %v9527_v20  ;;  %6499 = vmatprep.subr.bf16.mxu0 %v5294_v48  ;;  %v5143_v31 = vmax.f32 %v4769_v18, 0.0 }
 0x7a4   : > { %v5146_v0 = vmax.f32 %v4780_v43, 0.0 }
 0x7a5   : > { %v5144_v56 = vmax.f32 %v4772_v11, 0.0  ;;  %v2740_v42 = vpop.permute.xlu0 %2739 }
 0x7a6   : > { %v5296_v15 = vpack.c.bf16 %v5146_v0, %v5145_v30  ;;  %6500 = vmatpush3.bf16.msra.mxu0 %v9655_v8  ;;  %v2735_v49 = vpop.permute.xlu1 %2734 }
 0x7a7   : > { %v5295_v19 = vpack.c.bf16 %v5144_v56, %v5143_v31  ;;  %v6804_v50 = vpop.f32.mrb[164].mxu1 }
 0x7a8   : > { %v4793_v4 = vadd.f32 %v6804_v50, %v9598_v59  ;;  %v4784_v46 = vpop.f32.mrb[165].mxu1 }
 0x7a9   : > { %v4785_v54 = vadd.f32 %v4784_v46, %v9579_v55  ;;  %v6805_v20 = vpop.f32.mrb[166].mxu1  ;;  %6501 = vmatprep.subr.bf16.mxu0 %v5295_v19  ;;  %v5376_v55 = vcombine.high %v9624_v6, %v9624_v6 }
 0x7aa   : > { %v4796_v52 = vadd.f32 %v6805_v20, %v9603_v33  ;;  %v4787_v2 = vpop.f32.mrb[167].mxu1  ;;  %6502 = vmatpush3.bf16.msra.mxu0 %v9673_v34  ;;  %v5149_v7 = vmax.f32 %v4793_v4, 0.0 }
 0x7ab   : > { %v4788_v8 = vadd.f32 %v4787_v2, %v9584_v13  ;;  %6503 = vmatprep.subr.bf16.mxu0 %v5296_v15  ;;  %v5147_v59 = vmax.f32 %v4785_v54, 0.0 }
 0x7ac   : > { %v5150_v37 = vmax.f32 %v4796_v52, 0.0 }
 0x7ad   : > { %v5148_v16 = vmax.f32 %v4788_v8, 0.0 }
 0x7ae   : > { %v5298_v23 = vpack.c.bf16 %v5150_v37, %v5149_v7  ;;  %6504 = vmatpush3.bf16.msra.mxu0 %v9669_v39  ;;  %v9738_v39 = vrot.slane %v5376_v55, %v8802_v38 }
 0x7af   : > { %v5297_v33 = vpack.c.bf16 %v5148_v16, %v5147_v59  ;;  %v6808_v25 = vpop.f32.mrb[168].mxu1 }
 0x7b0   : > { %v4809_v34 = vadd.f32 %v6808_v25, %v9657_v9  ;;  %v4800_v48 = vpop.f32.mrb[169].mxu1  ;;  %v9741_v9 = vpop.permute.xlu1 %2824 }
 0x7b1   : > { %v4801_v13 = vadd.f32 %v4800_v48, %v9634_v53  ;;  %v6809_v22 = vpop.f32.mrb[170].mxu1  ;;  %6505 = vmatprep.subr.bf16.mxu0 %v5297_v33 }
 0x7b2   : > { %v4812_v35 = vadd.f32 %v6809_v22, %v9662_v60  ;;  %v4803_v36 = vpop.f32.mrb[171].mxu1  ;;  %6506 = vmatpush3.bf16.msra.mxu0 %v9687_v63  ;;  %v5153_v18 = vmax.f32 %v4809_v34, 0.0  ;;  %v5392_v60 = vcombine.high %v9738_v39, %v9738_v39  ;;  %v9748_v63 = vpop.permute.xlu0 %2829 }
 0x7b3   : > { %v4804_v6 = vadd.f32 %v4803_v36, %v9637_v41  ;;  %6507 = vmatprep.subr.bf16.mxu0 %v5298_v23  ;;  %v5151_v43 = vmax.f32 %v4801_v13, 0.0 }
 0x7b4   : > { %v5154_v45 = vmax.f32 %v4812_v35, 0.0 }
 0x7b5   : > { %v5152_v40 = vmax.f32 %v4804_v6, 0.0 }
 0x7b6   : > { %v9743_v53 = vpack.c.bf16 %v5154_v45, %v5153_v18  ;;  %6508 = vmatpush3.bf16.msra.mxu0 %v9683_v44  ;;  %v2745_v44 = vpop.permute.xlu1 %2744  ;;  %v2750_v46 = vpop.permute.xlu0 %2749 }
 0x7b7   : > { %v9750_v38 = vpack.c.bf16 %v5152_v40, %v5151_v43  ;;  %v6812_v11 = vpop.f32.mrb[172].mxu1 }
 0x7b8   : > { %v4825_v41 = vadd.f32 %v6812_v11, %v9697_v5  ;;  %v4816_v30 = vpop.f32.mrb[173].mxu1 }
 0x7b9   : > { %v4817_v0 = vadd.f32 %v4816_v30, %v9678_v24  ;;  %v6813_v31 = vpop.f32.mrb[174].mxu1  ;;  %5682 = vmatmul.mubr.bf16.vlgmr.msra.gmra.mrb[92].mxu0 %v9632_v17 }
 0x7ba   : > { %v4828_v56 = vadd.f32 %v6813_v31, %v9700_v26  ;;  %v4819_v15 = vpop.f32.mrb[175].mxu1  ;;  %5721 = vmatprep.mubr.bf16.mxu0 %v5392_v60  ;;  %v5157_v50 = vmax.f32 %v4825_v41, 0.0  ;;  %v9761_v17 = vpop.permute.xlu1 %2834 }
 0x7bb   : > { %v4820_v19 = vadd.f32 %v4819_v15, %v9681_v27  ;;  %v5155_v54 = vmax.f32 %v4817_v0, 0.0  ;;  %v9764_v27 = vpop.permute.xlu0 %2839 }
 0x7bc   : > { %v5158_v4 = vmax.f32 %v4828_v56, 0.0 }
 0x7bd   : > { %v5156_v20 = vmax.f32 %v4820_v19, 0.0 }
 0x7be   : > { %v9757_v52 = vpack.c.bf16 %v5158_v4, %v5157_v50  ;;  %v2755_v48 = vpop.permute.xlu1 %2754 }
 0x7bf   : > { %v9759_v5 = vpack.c.bf16 %v5156_v20, %v5155_v54  ;;  %v6816_v24 = vpop.f32.mrb[176].mxu1 }
 0x7c0   : > { %v4841_v2 = vadd.f32 %v6816_v24, %v2735_v49  ;;  %v4832_v8 = vpop.f32.mrb[177].mxu1 }
 0x7c1   : > { %v4833_v26 = vadd.f32 %v4832_v8, %v9715_v21  ;;  %v6817_v7 = vpop.f32.mrb[178].mxu1  ;;  %v2760_v21 = vpop.permute.xlu0 %2759 }
 0x7c2   : > { %v4844_v37 = vadd.f32 %v6817_v7, %v2740_v42  ;;  %v4835_v59 = vpop.f32.mrb[179].mxu1  ;;  %v5161_v23 = vmax.f32 %v4841_v2, 0.0  ;;  %v5319_v60 = vpop.permute.xlu1 %5318 }
 0x7c3   : > { %v4836_v16 = vadd.f32 %v4835_v59, %v9718_v58  ;;  %v5159_v33 = vmax.f32 %v4833_v26, 0.0  ;;  %v5444_v0 = vadd.f32 %v9685_v14, %v5319_v60 }
 0x7c4   : > { %v5162_v55 = vmax.f32 %v4844_v37, 0.0 }
 0x7c5   : > { %v5160_v25 = vmax.f32 %v4836_v16, 0.0 }
 0x7c6   : > { %v9767_v34 = vpack.c.bf16 %v5162_v55, %v5161_v23 }
 0x7c7   : > { %v9769_v49 = vpack.c.bf16 %v5160_v25, %v5159_v33  ;;  %v6820_v13 = vpop.f32.mrb[180].mxu1 }
 0x7c8   : > { %v4857_v22 = vadd.f32 %v6820_v13, %v2755_v48  ;;  %v4848_v35 = vpop.f32.mrb[181].mxu1 }
 0x7c9   : > { %v4849_v36 = vadd.f32 %v4848_v35, %v2745_v44  ;;  %v6821_v42 = vpop.f32.mrb[182].mxu1 }
 0x7ca   : > { %v4860_v6 = vadd.f32 %v6821_v42, %v2760_v21  ;;  %v4851_v18 = vpop.f32.mrb[183].mxu1  ;;  %v5165_v43 = vmax.f32 %v4857_v22, 0.0 }
 0x7cb   : > { %v4852_v45 = vadd.f32 %v4851_v18, %v2750_v46  ;;  %v5163_v11 = vmax.f32 %v4849_v36, 0.0 }
 0x7cc   : > { %v5166_v58 = vmax.f32 %v4860_v6, 0.0  ;;  %v6399_v40 = vpop.f32.mrb[72].mxu0 }
 0x7cd   : > { %v5164_v41 = vmax.f32 %v4852_v45, 0.0  ;;  %v6400_v30 = vpop.f32.mrb[73].mxu0 }
 0x7ce   : > { %v9772_v31 = vpack.c.bf16 %v5166_v58, %v5165_v43  ;;  %v6401_v56 = vadd.f32 %v6400_v30, %v6399_v40  ;;  %v6402_v15 = vpop.f32.mrb[74].mxu0 }
 0x7cf   : > { %v9774_v19 = vpack.c.bf16 %v5164_v41, %v5163_v11  ;;  %v6824_v44 = vpop.f32.mrb[184].mxu1  ;;  %v6403_v50 = vpop.f32.mrb[75].mxu0 }
 0x7d0   : > { %v9776_v4 = vadd.f32 %v6401_v56, %v5444_v0  ;;  %v4873_v46 = vadd.f32 %v6824_v44, %v9647_v29  ;;  %v4864_v54 = vpop.f32.mrb[185].mxu1 }
 0x7d1   : > { %v4865_v20 = vadd.f32 %v4864_v54, %v9616_v47  ;;  %v6825_v24 = vpop.f32.mrb[186].mxu1 }
 0x7d2   : > { %v4876_v2 = vadd.f32 %v6825_v24, %v9652_v32  ;;  %v4867_v8 = vpop.f32.mrb[187].mxu1  ;;  %v5169_v26 = vmax.f32 %v4873_v46, 0.0 }
 0x7d3   : > { %v4868_v14 = vadd.f32 %v4867_v8, %v9619_v57  ;;  %v5167_v37 = vmax.f32 %v4865_v20, 0.0 }
 0x7d4   : > { %v5170_v7 = vmax.f32 %v4876_v2, 0.0 }
 0x7d5   : > { %v5168_v59 = vmax.f32 %v4868_v14, 0.0 }
 0x7d6   : > { %v5308_v16 = vpack.c.bf16 %v5170_v7, %v5169_v26 }
 0x7d7   : > { %v5307_v23 = vpack.c.bf16 %v5168_v59, %v5167_v37  ;;  %v6828_v55 = vpop.f32.mrb[188].mxu1 }
 0x7d8   : > { %v4889_v33 = vadd.f32 %v6828_v55, %v9690_v61  ;;  %v4880_v25 = vpop.f32.mrb[189].mxu1 }
 0x7d9   : > { %v4881_v29 = vadd.f32 %v4880_v25, %v9667_v3  ;;  %v6829_v48 = vpop.f32.mrb[190].mxu1  ;;  %6515 = vmatprep.subr.bf16.mxu0 %v5307_v23 }
 0x7da   : > { %v4892_v47 = vadd.f32 %v6829_v48, %v9694_v10  ;;  %v4883_v32 = vpop.f32.mrb[191].mxu1  ;;  %6516 = vmatpush3.bf16.msra.mxu0 %v9750_v38  ;;  %v5173_v13 = vmax.f32 %v4889_v33, 0.0  ;;  %v5765_v48 = vld [vmem:[%s9895_s14] sm:$0xff] }
 0x7db   : > { %v4884_v57 = vadd.f32 %v4883_v32, %v9671_v28  ;;  %6517 = vmatprep.subr.bf16.mxu0 %v5308_v16  ;;  %v5171_v35 = vmax.f32 %v4881_v29, 0.0 }
 0x7dc   : > { %v5174_v22 = vmax.f32 %v4892_v47, 0.0  ;;  %v5766_v47 = vld [vmem:[%s9895_s14 + $0x8] sm:$0xff] }
 0x7dd   : > { %v5172_v21 = vmax.f32 %v4884_v57, 0.0  ;;  %v6866_v32 = vpack.c.bf16 %v5766_v47, %v5765_v48  ;;  %v5767_v57 = vld [vmem:[%s9895_s14 + $0x10] sm:$0xff] }
 0x7de   : > { %v5310_v36 = vpack.c.bf16 %v5174_v22, %v5173_v13  ;;  %6518 = vmatpush3.bf16.msra.mxu0 %v9743_v53  ;;  %v5768_v13 = vld [vmem:[%s9895_s14 + $0x18] sm:$0xff] }
 0x7df   : > { %v5309_v61 = vpack.c.bf16 %v5172_v21, %v5171_v35  ;;  %v6832_v42 = vpop.f32.mrb[192].mxu1  ;;  %v6869_v22 = vpack.c.bf16 %v5768_v13, %v5767_v57  ;;  %v5769_v35 = vld [vmem:[%s9895_s14 + $0x20] sm:$0xff]  ;;  %v5770_v21 = vld [vmem:[%s9895_s14 + $0x28] sm:$0xff] }
 0x7e0   : > { %v4905_v3 = vadd.f32 %v6832_v42, %v9722_v62  ;;  %v4896_v6 = vpop.f32.mrb[193].mxu1 }
 0x7e1   : > { %v4897_v10 = vadd.f32 %v4896_v6, %v9706_v51  ;;  %v6833_v18 = vpop.f32.mrb[194].mxu1  ;;  %6519 = vmatprep.subr.bf16.mxu0 %v5309_v61 }
 0x7e2   : > { %v4908_v38 = vadd.f32 %v6833_v18, %v9727_v1  ;;  %v4899_v28 = vpop.f32.mrb[195].mxu1  ;;  %6520 = vmatpush3.bf16.msra.mxu0 %v9759_v5  ;;  %v5177_v43 = vmax.f32 %v4905_v3, 0.0 }
 0x7e3   : > { %v4900_v45 = vadd.f32 %v4899_v28, %v9709_v12  ;;  %6521 = vmatprep.subr.bf16.mxu0 %v5310_v36  ;;  %v5175_v53 = vmax.f32 %v4897_v10, 0.0  ;;  %v6872_v36 = vpack.c.bf16 %v5770_v21, %v5769_v35 }
 0x7e4   : > { %v5178_v58 = vmax.f32 %v4908_v38, 0.0 }
 0x7e5   : > { %v5176_v40 = vmax.f32 %v4900_v45, 0.0 }
 0x7e6   : > { %v5312_v60 = vpack.c.bf16 %v5178_v58, %v5177_v43  ;;  %6522 = vmatpush3.bf16.msra.mxu0 %v9757_v52 }
 0x7e7   : > { %v5311_v62 = vpack.c.bf16 %v5176_v40, %v5175_v53  ;;  %v6836_v11 = vpop.f32.mrb[196].mxu1  ;;  %v10197_v40 = vld [vmem:[#allocation131_spill] sm:$0xff] }
 0x7e8   : > { %v4921_v51 = vadd.f32 %v6836_v11, %v9761_v17  ;;  %v4912_v41 = vpop.f32.mrb[197].mxu1 }
 0x7e9   : > { %v4913_v1 = vadd.f32 %v4912_v41, %v9741_v9  ;;  %v6837_v30 = vpop.f32.mrb[198].mxu1  ;;  %6523 = vmatprep.subr.bf16.mxu0 %v5311_v62 }
 0x7ea   : > { %v4924_v5 = vadd.f32 %v6837_v30, %v9764_v27  ;;  %v4915_v12 = vpop.f32.mrb[199].mxu1  ;;  %6524 = vmatpush3.bf16.msra.mxu0 %v9769_v49  ;;  %v5181_v56 = vmax.f32 %v4921_v51, 0.0  ;;  %v10196_v49 = vmov 0.0  }
 0x7eb   : > { %v4916_v0 = vadd.f32 %v4915_v12, %v9748_v63  ;;  %6525 = vmatprep.subr.bf16.mxu0 %v5312_v60  ;;  %v5179_v44 = vmax.f32 %v4913_v1, 0.0  ;;  %v10195_v63 = vmov 0.0|0.0  }
 0x7ec   : > { %v5182_v15 = vmax.f32 %v4924_v5, 0.0  ;;  %v6421_v52 = vpop.f32.mrb[76].mxu0 }
 0x7ed   : > { %v5180_v50 = vmax.f32 %v4916_v0, 0.0  ;;  %v6422_v46 = vpop.f32.mrb[77].mxu0 }
 0x7ee   : > { %v5314_v17 = vpack.c.bf16 %v5182_v15, %v5181_v56  ;;  %v6423_v54 = vadd.f32 %v6422_v46, %v6421_v52  ;;  %6526 = vmatpush3.bf16.msra.mxu0 %v9767_v34  ;;  %v6424_v9 = vpop.f32.mrb[78].mxu0 }
 0x7ef   : > { %v5313_v20 = vpack.c.bf16 %v5180_v50, %v5179_v44  ;;  %v6425_v24 = vpop.f32.mrb[79].mxu0 }
 0x7f0   : > { %v5524_v27 = vadd.f32 %v6423_v54, %v9776_v4 }
 0x7f1   : > { %6527 = vmatprep.subr.bf16.mxu0 %v5313_v20 }
 0x7f2   : > { %6528 = vmatpush3.bf16.msra.mxu0 %v9774_v19 }
 0x7f3   : > { %6529 = vmatprep.subr.bf16.mxu0 %v5314_v17 }
 0x7f6   : > { %6530 = vmatpush3.bf16.msra.mxu0 %v9772_v31 }
 0x7f7   : > { %6865 = vmatprep.subr.bf16.mxu0 %v10195_v63 }
 0x7f9   : > { %5722 = vmatmul.mubr.bf16.vlgmr.msra.gmra.mrb[96].mxu0 %v9738_v39 }
 0x7fa   : > { %6850 = vmatprep.mubr.msk.f32.mxu0 %vm7150_vm3, %v10196_v49  ;;  %6867 = vmatpush3.bf16.msra.mxu0 %v6866_v32 }
 0x7fb   : > { %6868 = vmatprep.subr.bf16.mxu0 %v10195_v63 }
 0x7fe   : > { %6870 = vmatpush3.bf16.msra.mxu0 %v6869_v22 }
 0x7ff   : > { %6871 = vmatprep.subr.bf16.mxu0 %v10195_v63  ;;  %v5756_v63 = vpop.permute.xlu0 %5755 }
 0x802   : > { %6873 = vmatpush3.bf16.msra.mxu0 %v6872_v36 }
 0x80c   : > { %v6443_v2 = vpop.f32.mrb[80].mxu0 }
 0x80d   : > { %v6444_v34 = vpop.f32.mrb[81].mxu0 }
 0x80e   : > { %v6445_v8 = vadd.f32 %v6444_v34, %v6443_v2  ;;  %v6446_v14 = vpop.f32.mrb[82].mxu0  ;;  %v5762_v2 = vpop.permute.xlu1 %5761 }
 0x80f   : > { %v6447_v26 = vpop.f32.mrb[83].mxu0 }
 0x810   : > { %v5564_v7 = vadd.f32 %v6445_v8, %v5524_v27  ;;  %v6207_v8 = vld [vmem:[%s9896_s15] ss:$0 sm:$0xff] }
 0x82c   : > { %v6465_v4 = vpop.f32.mrb[84].mxu0 }
 0x82d   : > { %v6466_v37 = vpop.f32.mrb[85].mxu0 }
 0x82e   : > { %v6467_v59 = vadd.f32 %v6466_v37, %v6465_v4  ;;  %v6468_v19 = vpop.f32.mrb[86].mxu0 }
 0x82f   : > { %v6469_v16 = vpop.f32.mrb[87].mxu0 }
 0x830   : > { %v5604_v23 = vadd.f32 %v6467_v59, %v5564_v7 }
 0x84c   : > { %v6487_v31 = vpop.f32.mrb[88].mxu0 }
 0x84d   : > { %v6488_v55 = vpop.f32.mrb[89].mxu0 }
 0x84e   : > { %v6489_v33 = vadd.f32 %v6488_v55, %v6487_v31  ;;  %v6490_v25 = vpop.f32.mrb[90].mxu0 }
 0x84f   : > { %v6491_v39 = vpop.f32.mrb[91].mxu0 }
 0x850   : > { %v5644_v29 = vadd.f32 %v6489_v33, %v5604_v23 }
 0x88c   : > { %v6509_v61 = vpop.f32.mrb[92].mxu0 }
 0x88d   : > { %v6510_v42 = vpop.f32.mrb[93].mxu0 }
 0x88e   : > { %v6511_v3 = vadd.f32 %v6510_v42, %v6509_v61  ;;  %v6512_v6 = vpop.f32.mrb[94].mxu0 }
 0x88f   : > { %v6513_v10 = vpop.f32.mrb[95].mxu0 }
 0x890   : > { %v5684_v18 = vadd.f32 %v6511_v3, %v5644_v29 }
 0x8cc   : > { %v6531_v38 = vpop.f32.mrb[96].mxu0 }
 0x8cd   : > { %v6532_v28 = vpop.f32.mrb[97].mxu0 }
 0x8ce   : > { %v6533_v45 = vadd.f32 %v6532_v28, %v6531_v38  ;;  %v6534_v43 = vpop.f32.mrb[98].mxu0 }
 0x8cf   : > { %v6535_v58 = vpop.f32.mrb[99].mxu0 }
 0x8d0   : > { %v5724_v53 = vadd.f32 %v6533_v45, %v5684_v18 }
 0x8d2   : > { %v5729_v60 = vadd.f32 %v5724_v53, %v10197_v40 }
 0x8d4   : > { %v5732_v62 = vsel %vm1014_vm5, %v5729_v60, 0.0 }
 0x8d5   : > { %v5733_v11 = vrot.slane %v5732_v62, 4 }
 0x8d7   : > { %v5734_v51 = vadd.f32 %v5733_v11, %v5732_v62 }
 0x8d9   : > { %v5735_v41 = vrot.slane %v5734_v51, 2 }
 0x8db   : > { %v5736_v1 = vadd.f32 %v5735_v41, %v5734_v51 }
 0x8dd   : > { %v5737_v30 = vrot.slane %v5736_v1, 1 }
 0x8df   : > { %v5738_v5 = vadd.f32 %v5737_v30, %v5736_v1 }
 0x8e1   : > { %v5739_v12 = vmul.f32 0.25, %v5738_v5 }
 0x8e3   : > { %v5740_v0 = vsub.f32 %v5729_v60, %v5739_v12 }
 0x8e5   : > { %v5741_v56 = vmul.f32 %v5740_v0, %v5740_v0 }
 0x8e7   : > { %v5742_v15 = vsel %vm1014_vm5, %v5741_v56, 0.0 }
 0x8e8   : > { %v5743_v52 = vrot.slane %v5742_v15, 4 }
 0x8ea   : > { %v5744_v44 = vadd.f32 %v5743_v52, %v5742_v15 }
 0x8ec   : > { %v5745_v50 = vrot.slane %v5744_v44, 2 }
 0x8ee   : > { %v5746_v46 = vadd.f32 %v5745_v50, %v5744_v44 }
 0x8f0   : > { %v5747_v17 = vrot.slane %v5746_v46, 1 }
 0x8f2   : > { %v5748_v54 = vadd.f32 %v5747_v17, %v5746_v46 }
 0x8f4   : > { %v5749_v9 = vmul.f32 0.25, %v5748_v54 }
 0x8f6   : > { %v5750_v20 = vadd.f32 1e-05, %v5749_v9 }
 0x8f8   : > { %7082 = vrsqrt.f32 %v5750_v20 }
 0x902   : > { %v7083_v24 = vpop.eup %7082 }
 0x903   : > { %v5752_v27 = vmul.f32 %v7083_v24, %v5740_v0 }
 0x905   : > { %v5758_v49 = vmul.f32 %v5756_v63, %v5752_v27 }
 0x907   : > { %v5764_v34 = vadd.f32 %v5762_v2, %v5758_v49 }
 0x909   : > { %6851 = vmatmul.mubr.msk.f32.vlgmr.msra.gmra.mrb[100].mxu0 %vm770_vm2, %v5764_v34 }
 0x9dc   : > { %v5847_v14 = vpop.f32.mrb[100].mxu0 }
 0x9dd   : > { %v5848_v26 = vadd.f32 %v6207_v8, %v5847_v14  ;;  %v6852_v7 = vpop.f32.mrb[101].mxu0 }
 0x9df   : > { %5852 = vst.msk [vmem:[%s512_s17] sm:$0xf] %vm5851_vm7, %v5848_v26 }
 0x9e0   : > { %7097 = shalt.err (!%p7094_p3)
}
 0x9e1   : > { %s7098_s21 = scalar_lea.hbm %s9839_s29, 64  ;;  %s7102_s17 = scalar_lea.hbm %s9897_s16, 128 }
 0x9e2   : > { %p7099_p4 = scmp.ne.s32.totalorder %s9839_s29, %s7098_s21  ;;  %p7103_p9 = scmp.lt.u32.totalorder %s9839_s29, %s9897_s16 }
 0x9e3   : > { %p7104_p10 = scmp.lt.u32.totalorder %s7102_s17, %s7098_s21  ;;  %p7106_p12 = scmp.lt.u32.totalorder %s7098_s21, %s9839_s29 }
 0x9e4   : > { %p7100_p7 = pnand %p7099_p4, %p7277_p5 }
 0x9e5   : > { %p7105_p11 = por %p7104_p10, %p7103_p9 }
 0x9e6   : > { %p7101_p8 = pneg %p7100_p7 }
 0x9e7   : > { %p7107_p13 = por %p7106_p12, %p7105_p11 }
 0x9e9   : > { %p7108_p0 = pnand %p7107_p13, %p7101_p8 }
 0x9eb   : > { %7111 = shalt.err (!%p7108_p0)
}
 0x9ec   : > { %6878 = dma.vmem_to_hbm [thread:$0]  (%p7277_p5), %s9841_s20, 64, %s9839_s29, %s5854_s18  }
 0x9ed PF: > { %s10198_s19 = sld [smem:[#allocation7_spill]]  ;;  %s10199_s25 = sld [smem:[#allocation5_spill]] }
 0x9f3   : > { %p6884_p1 = scmp.ge.s32.totalorder %s10198_s19, 2  ;;  %s5879_s24 = sand.u32 1, %s10199_s25  }
 0x9f4   : > { %s5880_s27 = scalar_lea.sflag [#allocation3], %s5879_s24 }
 0x9f5   : > { %p6881_p2 = pnand %p6884_p1, %p7281_p6 }
 0x9f7   : > { %7129 = dma.done.wait (!%p6881_p2), %s5880_s27, 64  }
 0x9f8   : > { %7131 = vsyncadd (!%p6881_p2), %s5880_s27, 4294967232  ;;  %s10201_s24 = sld [smem:[#allocation8_spill]]  ;;  %s10202_s30 = sld [smem:[#allocation6_spill]] }
 0x9f9   : > { %s10203_s23 = sld [smem:[#allocation9_spill]]  ;;  %s10204_s21 = smov %s7138_s22 }
 0x9fe   : > { %p26_p3 = scmp.ge.s32.totalorder %s10201_s24, 4   ;;  %s10205_s22 = smov %s10202_s30 }
 0xa00   :  { %28 = sbr.rel (!%p26_p3) target bundleno = 5 (0x5), region = 119 }
 0xa07   :  { %5885 = vsyncpa [#allocation3], 1 }
 0xa08   :  { %5887 = vsyncpa [#allocation3 + $0x1], 1 }

</bundles_post_ra>
